<compile_context>
chip_gen: v7x
topology: tpu7x:2x2x1
jax: 0.10.0
libtpu: 0.0.40
codegen_flags: <defaults>
</compile_context>

<pallas_src>
import math
from functools import partial

import jax
import jax.numpy as jnp
from jax.experimental import pallas as pl
from jax.experimental.pallas import tpu as pltpu


# ----------------------------- host-side constant builders -----------------------------

def _ru(x, m):
    return (x + m - 1) // m * m


def make_upsample_matrix(n_in):
    """PyTorch UpsamplingBilinear2d(scale_factor=2) == bilinear, align_corners=True."""
    n_out = 2 * n_in
    i = jnp.arange(n_out, dtype=jnp.float32)
    src = i * (n_in - 1) / (n_out - 1)
    lo = jnp.floor(src).astype(jnp.int32)
    hi = jnp.minimum(lo + 1, n_in - 1)
    frac = src - lo.astype(jnp.float32)
    m = jnp.zeros((n_out, n_in), jnp.float32)
    m = m.at[jnp.arange(n_out), lo].add(1.0 - frac)
    m = m.at[jnp.arange(n_out), hi].add(frac)
    return m  # (2n, n)


def _shift_select(n, d):
    """(n, n) with S[src, dst] = 1 iff src == dst + d (zero column when out of range)."""
    r = jnp.arange(n)
    return (r[:, None] == (r[None, :] + d)).astype(jnp.float32)


def _axis_factor(n_prev, up, d):
    """(n_prev, n_cur): optional x2 bilinear upsample followed by tap shift d (zero pad)."""
    if up:
        u = make_upsample_matrix(n_prev).T            # (n_prev, 2*n_prev)
        n_cur = 2 * n_prev
    else:
        u = jnp.eye(n_prev, dtype=jnp.float32)
        n_cur = n_prev
    return u @ _shift_select(n_cur, d)


def _build_g_stack(ph, pw, up):
    """(9, ph*pw, hc*wc): maps the previous activation (grid ph x pw, optionally
    upsampled x2) to the 9 zero-padded 3x3 tap copies at the current grid."""
    mats = []
    for dy in (-1, 0, 1):
        fh = _axis_factor(ph, up, dy)
        for dx in (-1, 0, 1):
            fw = _axis_factor(pw, up, dx)
            mats.append(jnp.kron(fh, fw))
    return jnp.stack(mats)


def _build_u(h, w):
    """(h*w, 4*h*w): full 2-D bilinear x2 upsample (align_corners=True)."""
    return jnp.kron(make_upsample_matrix(h).T, make_upsample_matrix(w).T)


# ----------------------------- fused Pallas forward -----------------------------

def assymetric_decoder_forward(feat_list_nchw, params):
    B = feat_list_nchw[0].shape[0]
    out_h, out_w = feat_list_nchw[0].shape[2], feat_list_nchw[0].shape[3]
    out_hw = out_h * out_w
    c_out = params[0][0]["w"].shape[0]
    c_in_max = max(max(l["w"].shape[1] for l in layers) for layers in params)
    CP = _ru(max(c_out, c_in_max), 8)                       # padded channel count (sublanes)

    # ---- packed per-batch activations: one lane-dense (B, CP, total) slab ------------
    slabs, offs, off = [], [], 0
    for level in feat_list_nchw:
        _, cin, H, W = level.shape
        hw = H * W
        slot = _ru(hw, 128)                                  # 128-aligned lane offsets
        x = level.astype(jnp.float32).reshape(B, cin, hw)
        x = jnp.pad(x, ((0, 0), (0, CP - cin), (0, slot - hw)))
        slabs.append(x)
        offs.append(off)
        off += slot
    x_all = jnp.concatenate(slabs, axis=-1)                  # (B, CP, total_lanes)
    total_lanes = off

    # ---- packed conv weights (BN scale folded in) and biases -------------------------
    w_list, b_list = [], []
    for layers in params:
        for layer in layers:
            w = layer["w"] * layer["scale"][:, None, None, None]   # fold BN scale
            cout, cin = w.shape[0], w.shape[1]
            blocks = []
            for ky in range(3):
                for kx in range(3):
                    blocks.append(jnp.pad(w[:, :, ky, kx],
                                          ((0, CP - cout), (0, CP - cin))))
            w_list.append(jnp.concatenate(blocks, axis=1))   # (CP, 9*CP)
            b_list.append(jnp.pad(layer["bias"], (0, CP - cout)).reshape(CP, 1))
    w_all = jnp.stack(w_list)                                # (L, CP, 9*CP)
    b_all = jnp.stack(b_list)                                # (L, CP, 1)

    # ---- de-duplicated spatial shift / upsample Kronecker constants ------------------
    const_arrays, const_index = [], {}

    def get_const(key, build):
        if key not in const_index:
            const_index[key] = len(const_arrays)
            const_arrays.append(build())
        return const_index[key]

    plan = []
    for lv_idx, (level, layers) in enumerate(zip(feat_list_nchw, params)):
        H, W = level.shape[2], level.shape[3]
        lv = dict(off=offs[lv_idx], hw=H * W, g=[], u=None)
        ph, pw, pup = H, W, False                            # previous activation grid / flag
        for layer in layers:
            lv["g"].append(get_const(("G", ph, pw, pup),
                                     partial(_build_g_stack, ph, pw, pup)))
            if pup:
                ph, pw = 2 * ph, 2 * pw                      # grid of this conv layer
            pup = bool(layer["upsample"])
        if pup:
            lv["u"] = get_const(("U", ph, pw), partial(_build_u, ph, pw))
            final_h, final_w = 2 * ph, 2 * pw
        else:
            final_h, final_w = ph, pw
        assert (final_h, final_w) == (out_h, out_w), (final_h, final_w, out_h, out_w)
        plan.append(lv)

    # ---- pallas inputs / specs --------------------------------------------------------
    inputs = [x_all, w_all, b_all] + const_arrays
    in_specs = [
        pl.BlockSpec((None, CP, total_lanes), lambda b: (b, 0, 0)),
        pl.BlockSpec(w_all.shape, lambda b: (0, 0, 0)),
        pl.BlockSpec(b_all.shape, lambda b: (0, 0, 0)),
    ]
    for arr in const_arrays:
        in_specs.append(pl.BlockSpec(arr.shape, lambda b, _nd=arr.ndim: (0,) * _nd))

    def kernel(x_ref, w_ref, b_ref, *rest):
        const_refs = rest[:-1]
        out_ref = rest[-1]                                   # (CP, out_hw)

        acc = jnp.zeros((CP, out_hw), jnp.float32)
        li = 0
        for lv in plan:
            cur = x_ref[:, lv["off"]:lv["off"] + lv["hw"]]   # (CP, hw_level)
            for g_idx in lv["g"]:
                g_ref = const_refs[g_idx]                    # (9, P, Q)
                # 9 shifted (optionally pre-upsampled) copies -> im2col along sublanes.
                cols = [jnp.dot(cur, g_ref[t], preferred_element_type=jnp.float32)
                        for t in range(9)]
                xcol = jnp.concatenate(cols, axis=0)         # (9*CP, Q)
                y = jnp.dot(w_ref[li], xcol,
                            preferred_element_type=jnp.float32)      # (CP, Q)
                cur = jnp.maximum(y + b_ref[li], 0.0)        # folded BN bias + ReLU
                li += 1
            if lv["u"] is not None:                          # final x2 upsample of the level
                cur = jnp.dot(cur, const_refs[lv["u"]][...],
                              preferred_element_type=jnp.float32)     # (CP, out_hw)
            acc = acc + cur
        out_ref[...] = acc * 0.25

    out = pl.pallas_call(
        kernel,
        out_shape=jax.ShapeDtypeStruct((B, CP, out_hw), jnp.float32),
        grid=(B,),
        in_specs=in_specs,
        out_specs=pl.BlockSpec((None, CP, out_hw), lambda b: (b, 0, 0)),
        compiler_params=pltpu.CompilerParams(
            dimension_semantics=("parallel",),
            vmem_limit_bytes=32 * 1024 * 1024),
    )(*inputs)

    # lane-dense kernel output -> NCHW in the wrapper (cheap layout plumbing).
    return out[:, :c_out, :].reshape(B, c_out, out_h, out_w)


# ----------------------------- parameters -----------------------------

def init_params(key, in_channels, out_channels,
                in_feat_output_strides=(4, 8, 16, 32), out_feat_output_stride=4):
    """Deterministic synthetic parameters matching AssymetricDecoder.__init__ shapes."""
    eps = 1e-5
    params = []
    for in_os in in_feat_output_strides:
        num_up = int(math.log2(int(in_os))) - int(math.log2(int(out_feat_output_stride)))
        num_layers = num_up if num_up != 0 else 1
        layers = []
        for idx in range(num_layers):
            cin = in_channels if idx == 0 else out_channels
            key, k1, k2, k3, k4, k5 = jax.random.split(key, 6)
            w = 0.1 * jax.random.normal(k1, (out_channels, cin, 3, 3), jnp.float32)  # OIHW
            gamma = 1.0 + 0.1 * jax.random.normal(k2, (out_channels,), jnp.float32)
            beta = 0.1 * jax.random.normal(k3, (out_channels,), jnp.float32)
            rmean = 0.05 * jax.random.normal(k4, (out_channels,), jnp.float32)
            rvar = 1.0 + 0.1 * jnp.abs(jax.random.normal(k5, (out_channels,), jnp.float32))
            scale = gamma / jnp.sqrt(rvar + eps)
            bias = beta - rmean * scale
            layers.append(dict(w=w, scale=scale, bias=bias, upsample=(num_up != 0)))
        params.append(layers)
    return params


# ----------------------------- pure-JAX reference -----------------------------

def _ref_forward(feat_list_nchw, params):
    hp = jax.lax.Precision.HIGHEST
    inner = []
    for level, layers in zip(feat_list_nchw, params):
        x = jnp.transpose(level, (0, 2, 3, 1)).astype(jnp.float32)   # NCHW -> NHWC
        for layer in layers:
            B, H, W, cin = x.shape
            cout = layer["w"].shape[0]
            w2d = jnp.transpose(layer["w"], (2, 3, 1, 0)).reshape(9 * cin, cout)
            xp = jnp.pad(x, ((0, 0), (1, 1), (1, 1), (0, 0)))
            cols = jnp.concatenate(
                [xp[:, dy:dy + H, dx:dx + W, :] for dy in range(3) for dx in range(3)],
                axis=-1)
            y = jnp.dot(cols.reshape(B * H * W, 9 * cin), w2d, precision=hp)
            y = jnp.maximum(y * layer["scale"][None, :] + layer["bias"][None, :], 0.0)
            x = y.reshape(B, H, W, cout)
            if layer["upsample"]:
                uh = make_upsample_matrix(x.shape[1])
                uw = make_upsample_matrix(x.shape[2])
                x = jnp.einsum('oh,bhwc->bowc', uh, x, precision=hp)
                x = jnp.einsum('pw,bowc->bopc', uw, x, precision=hp)
        inner.append(x)
    out = (inner[0] + inner[1] + inner[2] + inner[3]) / 4.0
    return jnp.transpose(out, (0, 3, 1, 2))


# ----------------------------------- main -----------------------------------

if __name__ == "__main__":
    key = jax.random.PRNGKey(0)
    in_channels, out_channels = 4, 8
    B, base = 2, 16                       # base = spatial size at output stride 4
    strides = (4, 8, 16, 32)

    kparams, kfeat = jax.random.split(key)
    params = init_params(kparams, in_channels, out_channels, strides, 4)

    feat_keys = jax.random.split(kfeat, len(strides))
    feat_list = [
        jax.random.normal(k, (B, in_channels, base * 4 // s, base * 4 // s), jnp.float32)
        for k, s in zip(feat_keys, strides)
    ]

    out = assymetric_decoder_forward(feat_list, params)
    out = jax.block_until_ready(out)

    ref = _ref_forward(feat_list, params)
    assert out.shape == (B, out_channels, base, base), out.shape
    # Tolerance covers TPU matmul operand rounding; structural bugs are orders larger.
    err = float(jnp.max(jnp.abs(out - ref)))
    assert jnp.allclose(out, ref, atol=1e-3, rtol=1e-3), f"mismatch vs reference: {err}"

    print("KERNEL_OK")
</pallas_src>

<mosaic_0001>
module attributes {stable_mosaic.version = 11 : i64} {
  func.func @kernel(%arg0: i32, %arg1: memref<1x8x640xf32, #tpu.memory_space<vmem>>, %arg2: memref<7x8x72xf32, #tpu.memory_space<vmem>>, %arg3: memref<7x8x1xf32, #tpu.memory_space<vmem>>, %arg4: memref<9x256x256xf32, #tpu.memory_space<vmem>>, %arg5: memref<9x64x64xf32, #tpu.memory_space<vmem>>, %arg6: memref<64x256xf32, #tpu.memory_space<vmem>>, %arg7: memref<9x16x16xf32, #tpu.memory_space<vmem>>, %arg8: memref<9x16x64xf32, #tpu.memory_space<vmem>>, %arg9: memref<9x4x4xf32, #tpu.memory_space<vmem>>, %arg10: memref<9x4x16xf32, #tpu.memory_space<vmem>>, %arg11: memref<1x8x256xf32, #tpu.memory_space<vmem>>) attributes {dimension_semantics = [#tpu.dimension_semantics<parallel>], iteration_bounds = array<i64: 2>, scalar_prefetch = 0 : i64, scratch_operands = 0 : i64, tpu.core_type = #tpu.core_type<tc>, window_params = [{transform_indices = @transform_0, window_bounds = array<i64: 1, 8, 640>}, {pipeline_mode = #tpu.pipeline_mode<synchronous>, transform_indices = @transform_1, window_bounds = array<i64: 7, 8, 72>}, {pipeline_mode = #tpu.pipeline_mode<synchronous>, transform_indices = @transform_2, window_bounds = array<i64: 7, 8, 1>}, {pipeline_mode = #tpu.pipeline_mode<synchronous>, transform_indices = @transform_3, window_bounds = array<i64: 9, 256, 256>}, {pipeline_mode = #tpu.pipeline_mode<synchronous>, transform_indices = @transform_4, window_bounds = array<i64: 9, 64, 64>}, {pipeline_mode = #tpu.pipeline_mode<synchronous>, transform_indices = @transform_5, window_bounds = array<i64: 64, 256>}, {pipeline_mode = #tpu.pipeline_mode<synchronous>, transform_indices = @transform_6, window_bounds = array<i64: 9, 16, 16>}, {pipeline_mode = #tpu.pipeline_mode<synchronous>, transform_indices = @transform_7, window_bounds = array<i64: 9, 16, 64>}, {pipeline_mode = #tpu.pipeline_mode<synchronous>, transform_indices = @transform_8, window_bounds = array<i64: 9, 4, 4>}, {pipeline_mode = #tpu.pipeline_mode<synchronous>, transform_indices = @transform_9, window_bounds = array<i64: 9, 4, 16>}, {transform_indices = @transform_10, window_bounds = array<i64: 1, 8, 256>}]} {
    %cst = arith.constant 0.000000e+00 : f32
    %0 = vector.broadcast %cst : f32 to vector<8x256xf32>
    %c0 = arith.constant 0 : index
    %c0_0 = arith.constant 0 : index
    %c0_1 = arith.constant 0 : index
    %1 = vector.load %arg1[%c0, %c0_0, %c0_1] : memref<1x8x640xf32, #tpu.memory_space<vmem>>, vector<1x8x256xf32>
    %2 = vector.shape_cast %1 : vector<1x8x256xf32> to vector<8x256xf32>
    %c0_2 = arith.constant 0 : index
    %c0_3 = arith.constant 0 : index
    %c0_4 = arith.constant 0 : index
    %3 = vector.load %arg4[%c0_2, %c0_3, %c0_4] : memref<9x256x256xf32, #tpu.memory_space<vmem>>, vector<1x256x256xf32>
    %4 = vector.shape_cast %3 : vector<1x256x256xf32> to vector<256x256xf32>
    %cst_5 = arith.constant dense<0.000000e+00> : vector<8x256xf32>
    %5 = tpu.matmul %2, %4, %cst_5 {dimension_numbers = #tpu.dot_dimension_numbers<[1], [0], [0], [1], [0, 0, 1, 1], [], []>} : vector<8x256xf32>, vector<256x256xf32>, vector<8x256xf32> -> vector<8x256xf32>
    %c1 = arith.constant 1 : index
    %c0_6 = arith.constant 0 : index
    %c0_7 = arith.constant 0 : index
    %6 = vector.load %arg4[%c1, %c0_6, %c0_7] : memref<9x256x256xf32, #tpu.memory_space<vmem>>, vector<1x256x256xf32>
    %7 = vector.shape_cast %6 : vector<1x256x256xf32> to vector<256x256xf32>
    %cst_8 = arith.constant dense<0.000000e+00> : vector<8x256xf32>
    %8 = tpu.matmul %2, %7, %cst_8 {dimension_numbers = #tpu.dot_dimension_numbers<[1], [0], [0], [1], [0, 0, 1, 1], [], []>} : vector<8x256xf32>, vector<256x256xf32>, vector<8x256xf32> -> vector<8x256xf32>
    %c2 = arith.constant 2 : index
    %c0_9 = arith.constant 0 : index
    %c0_10 = arith.constant 0 : index
    %9 = vector.load %arg4[%c2, %c0_9, %c0_10] : memref<9x256x256xf32, #tpu.memory_space<vmem>>, vector<1x256x256xf32>
    %10 = vector.shape_cast %9 : vector<1x256x256xf32> to vector<256x256xf32>
    %cst_11 = arith.constant dense<0.000000e+00> : vector<8x256xf32>
    %11 = tpu.matmul %2, %10, %cst_11 {dimension_numbers = #tpu.dot_dimension_numbers<[1], [0], [0], [1], [0, 0, 1, 1], [], []>} : vector<8x256xf32>, vector<256x256xf32>, vector<8x256xf32> -> vector<8x256xf32>
    %c3 = arith.constant 3 : index
    %c0_12 = arith.constant 0 : index
    %c0_13 = arith.constant 0 : index
    %12 = vector.load %arg4[%c3, %c0_12, %c0_13] : memref<9x256x256xf32, #tpu.memory_space<vmem>>, vector<1x256x256xf32>
    %13 = vector.shape_cast %12 : vector<1x256x256xf32> to vector<256x256xf32>
    %cst_14 = arith.constant dense<0.000000e+00> : vector<8x256xf32>
    %14 = tpu.matmul %2, %13, %cst_14 {dimension_numbers = #tpu.dot_dimension_numbers<[1], [0], [0], [1], [0, 0, 1, 1], [], []>} : vector<8x256xf32>, vector<256x256xf32>, vector<8x256xf32> -> vector<8x256xf32>
    %c4 = arith.constant 4 : index
    %c0_15 = arith.constant 0 : index
    %c0_16 = arith.constant 0 : index
    %15 = vector.load %arg4[%c4, %c0_15, %c0_16] : memref<9x256x256xf32, #tpu.memory_space<vmem>>, vector<1x256x256xf32>
    %16 = vector.shape_cast %15 : vector<1x256x256xf32> to vector<256x256xf32>
    %cst_17 = arith.constant dense<0.000000e+00> : vector<8x256xf32>
    %17 = tpu.matmul %2, %16, %cst_17 {dimension_numbers = #tpu.dot_dimension_numbers<[1], [0], [0], [1], [0, 0, 1, 1], [], []>} : vector<8x256xf32>, vector<256x256xf32>, vector<8x256xf32> -> vector<8x256xf32>
    %c5 = arith.constant 5 : index
    %c0_18 = arith.constant 0 : index
    %c0_19 = arith.constant 0 : index
    %18 = vector.load %arg4[%c5, %c0_18, %c0_19] : memref<9x256x256xf32, #tpu.memory_space<vmem>>, vector<1x256x256xf32>
    %19 = vector.shape_cast %18 : vector<1x256x256xf32> to vector<256x256xf32>
    %cst_20 = arith.constant dense<0.000000e+00> : vector<8x256xf32>
    %20 = tpu.matmul %2, %19, %cst_20 {dimension_numbers = #tpu.dot_dimension_numbers<[1], [0], [0], [1], [0, 0, 1, 1], [], []>} : vector<8x256xf32>, vector<256x256xf32>, vector<8x256xf32> -> vector<8x256xf32>
    %c6 = arith.constant 6 : index
    %c0_21 = arith.constant 0 : index
    %c0_22 = arith.constant 0 : index
    %21 = vector.load %arg4[%c6, %c0_21, %c0_22] : memref<9x256x256xf32, #tpu.memory_space<vmem>>, vector<1x256x256xf32>
    %22 = vector.shape_cast %21 : vector<1x256x256xf32> to vector<256x256xf32>
    %cst_23 = arith.constant dense<0.000000e+00> : vector<8x256xf32>
    %23 = tpu.matmul %2, %22, %cst_23 {dimension_numbers = #tpu.dot_dimension_numbers<[1], [0], [0], [1], [0, 0, 1, 1], [], []>} : vector<8x256xf32>, vector<256x256xf32>, vector<8x256xf32> -> vector<8x256xf32>
    %c7 = arith.constant 7 : index
    %c0_24 = arith.constant 0 : index
    %c0_25 = arith.constant 0 : index
    %24 = vector.load %arg4[%c7, %c0_24, %c0_25] : memref<9x256x256xf32, #tpu.memory_space<vmem>>, vector<1x256x256xf32>
    %25 = vector.shape_cast %24 : vector<1x256x256xf32> to vector<256x256xf32>
    %cst_26 = arith.constant dense<0.000000e+00> : vector<8x256xf32>
    %26 = tpu.matmul %2, %25, %cst_26 {dimension_numbers = #tpu.dot_dimension_numbers<[1], [0], [0], [1], [0, 0, 1, 1], [], []>} : vector<8x256xf32>, vector<256x256xf32>, vector<8x256xf32> -> vector<8x256xf32>
    %c8 = arith.constant 8 : index
    %c0_27 = arith.constant 0 : index
    %c0_28 = arith.constant 0 : index
    %27 = vector.load %arg4[%c8, %c0_27, %c0_28] : memref<9x256x256xf32, #tpu.memory_space<vmem>>, vector<1x256x256xf32>
    %28 = vector.shape_cast %27 : vector<1x256x256xf32> to vector<256x256xf32>
    %cst_29 = arith.constant dense<0.000000e+00> : vector<8x256xf32>
    %29 = tpu.matmul %2, %28, %cst_29 {dimension_numbers = #tpu.dot_dimension_numbers<[1], [0], [0], [1], [0, 0, 1, 1], [], []>} : vector<8x256xf32>, vector<256x256xf32>, vector<8x256xf32> -> vector<8x256xf32>
    %30 = tpu.concatenate %5, %8, %11, %14, %17, %20, %23, %26, %29 in 0 : vector<8x256xf32>, vector<8x256xf32>, vector<8x256xf32>, vector<8x256xf32>, vector<8x256xf32>, vector<8x256xf32>, vector<8x256xf32>, vector<8x256xf32>, vector<8x256xf32> -> vector<72x256xf32>
    %c0_30 = arith.constant 0 : index
    %c0_31 = arith.constant 0 : index
    %c0_32 = arith.constant 0 : index
    %31 = vector.load %arg2[%c0_30, %c0_31, %c0_32] : memref<7x8x72xf32, #tpu.memory_space<vmem>>, vector<1x8x72xf32>
    %32 = vector.shape_cast %31 : vector<1x8x72xf32> to vector<8x72xf32>
    %cst_33 = arith.constant dense<0.000000e+00> : vector<8x256xf32>
    %33 = tpu.matmul %32, %30, %cst_33 {dimension_numbers = #tpu.dot_dimension_numbers<[1], [0], [0], [1], [0, 0, 1, 1], [], []>} : vector<8x72xf32>, vector<72x256xf32>, vector<8x256xf32> -> vector<8x256xf32>
    %c0_34 = arith.constant 0 : index
    %c0_35 = arith.constant 0 : index
    %c0_36 = arith.constant 0 : index
    %34 = vector.load %arg3[%c0_34, %c0_35, %c0_36] : memref<7x8x1xf32, #tpu.memory_space<vmem>>, vector<1x8x1xf32>
    %35 = vector.shape_cast %34 : vector<1x8x1xf32> to vector<8x1xf32>
    %36 = vector.broadcast %35 : vector<8x1xf32> to vector<8x256xf32>
    %37 = arith.addf %33, %36 : vector<8x256xf32>
    %cst_37 = arith.constant 0.000000e+00 : f32
    %38 = vector.broadcast %cst_37 : f32 to vector<8x256xf32>
    %39 = arith.maximumf %37, %38 : vector<8x256xf32>
    %40 = arith.addf %0, %39 : vector<8x256xf32>
    %c0_38 = arith.constant 0 : index
    %c0_39 = arith.constant 0 : index
    %c256 = arith.constant 256 : index
    %41 = vector.load %arg1[%c0_38, %c0_39, %c256] : memref<1x8x640xf32, #tpu.memory_space<vmem>>, vector<1x8x64xf32>
    %42 = vector.shape_cast %41 : vector<1x8x64xf32> to vector<8x64xf32>
    %c0_40 = arith.constant 0 : index
    %c0_41 = arith.constant 0 : index
    %c0_42 = arith.constant 0 : index
    %43 = vector.load %arg5[%c0_40, %c0_41, %c0_42] : memref<9x64x64xf32, #tpu.memory_space<vmem>>, vector<1x64x64xf32>
    %44 = vector.shape_cast %43 : vector<1x64x64xf32> to vector<64x64xf32>
    %cst_43 = arith.constant dense<0.000000e+00> : vector<8x64xf32>
    %45 = tpu.matmul %42, %44, %cst_43 {dimension_numbers = #tpu.dot_dimension_numbers<[1], [0], [0], [1], [0, 0, 1, 1], [], []>} : vector<8x64xf32>, vector<64x64xf32>, vector<8x64xf32> -> vector<8x64xf32>
    %c1_44 = arith.constant 1 : index
    %c0_45 = arith.constant 0 : index
    %c0_46 = arith.constant 0 : index
    %46 = vector.load %arg5[%c1_44, %c0_45, %c0_46] : memref<9x64x64xf32, #tpu.memory_space<vmem>>, vector<1x64x64xf32>
    %47 = vector.shape_cast %46 : vector<1x64x64xf32> to vector<64x64xf32>
    %cst_47 = arith.constant dense<0.000000e+00> : vector<8x64xf32>
    %48 = tpu.matmul %42, %47, %cst_47 {dimension_numbers = #tpu.dot_dimension_numbers<[1], [0], [0], [1], [0, 0, 1, 1], [], []>} : vector<8x64xf32>, vector<64x64xf32>, vector<8x64xf32> -> vector<8x64xf32>
    %c2_48 = arith.constant 2 : index
    %c0_49 = arith.constant 0 : index
    %c0_50 = arith.constant 0 : index
    %49 = vector.load %arg5[%c2_48, %c0_49, %c0_50] : memref<9x64x64xf32, #tpu.memory_space<vmem>>, vector<1x64x64xf32>
    %50 = vector.shape_cast %49 : vector<1x64x64xf32> to vector<64x64xf32>
    %cst_51 = arith.constant dense<0.000000e+00> : vector<8x64xf32>
    %51 = tpu.matmul %42, %50, %cst_51 {dimension_numbers = #tpu.dot_dimension_numbers<[1], [0], [0], [1], [0, 0, 1, 1], [], []>} : vector<8x64xf32>, vector<64x64xf32>, vector<8x64xf32> -> vector<8x64xf32>
    %c3_52 = arith.constant 3 : index
    %c0_53 = arith.constant 0 : index
    %c0_54 = arith.constant 0 : index
    %52 = vector.load %arg5[%c3_52, %c0_53, %c0_54] : memref<9x64x64xf32, #tpu.memory_space<vmem>>, vector<1x64x64xf32>
    %53 = vector.shape_cast %52 : vector<1x64x64xf32> to vector<64x64xf32>
    %cst_55 = arith.constant dense<0.000000e+00> : vector<8x64xf32>
    %54 = tpu.matmul %42, %53, %cst_55 {dimension_numbers = #tpu.dot_dimension_numbers<[1], [0], [0], [1], [0, 0, 1, 1], [], []>} : vector<8x64xf32>, vector<64x64xf32>, vector<8x64xf32> -> vector<8x64xf32>
    %c4_56 = arith.constant 4 : index
    %c0_57 = arith.constant 0 : index
    %c0_58 = arith.constant 0 : index
    %55 = vector.load %arg5[%c4_56, %c0_57, %c0_58] : memref<9x64x64xf32, #tpu.memory_space<vmem>>, vector<1x64x64xf32>
    %56 = vector.shape_cast %55 : vector<1x64x64xf32> to vector<64x64xf32>
    %cst_59 = arith.constant dense<0.000000e+00> : vector<8x64xf32>
    %57 = tpu.matmul %42, %56, %cst_59 {dimension_numbers = #tpu.dot_dimension_numbers<[1], [0], [0], [1], [0, 0, 1, 1], [], []>} : vector<8x64xf32>, vector<64x64xf32>, vector<8x64xf32> -> vector<8x64xf32>
    %c5_60 = arith.constant 5 : index
    %c0_61 = arith.constant 0 : index
    %c0_62 = arith.constant 0 : index
    %58 = vector.load %arg5[%c5_60, %c0_61, %c0_62] : memref<9x64x64xf32, #tpu.memory_space<vmem>>, vector<1x64x64xf32>
    %59 = vector.shape_cast %58 : vector<1x64x64xf32> to vector<64x64xf32>
    %cst_63 = arith.constant dense<0.000000e+00> : vector<8x64xf32>
    %60 = tpu.matmul %42, %59, %cst_63 {dimension_numbers = #tpu.dot_dimension_numbers<[1], [0], [0], [1], [0, 0, 1, 1], [], []>} : vector<8x64xf32>, vector<64x64xf32>, vector<8x64xf32> -> vector<8x64xf32>
    %c6_64 = arith.constant 6 : index
    %c0_65 = arith.constant 0 : index
    %c0_66 = arith.constant 0 : index
    %61 = vector.load %arg5[%c6_64, %c0_65, %c0_66] : memref<9x64x64xf32, #tpu.memory_space<vmem>>, vector<1x64x64xf32>
    %62 = vector.shape_cast %61 : vector<1x64x64xf32> to vector<64x64xf32>
    %cst_67 = arith.constant dense<0.000000e+00> : vector<8x64xf32>
    %63 = tpu.matmul %42, %62, %cst_67 {dimension_numbers = #tpu.dot_dimension_numbers<[1], [0], [0], [1], [0, 0, 1, 1], [], []>} : vector<8x64xf32>, vector<64x64xf32>, vector<8x64xf32> -> vector<8x64xf32>
    %c7_68 = arith.constant 7 : index
    %c0_69 = arith.constant 0 : index
    %c0_70 = arith.constant 0 : index
    %64 = vector.load %arg5[%c7_68, %c0_69, %c0_70] : memref<9x64x64xf32, #tpu.memory_space<vmem>>, vector<1x64x64xf32>
    %65 = vector.shape_cast %64 : vector<1x64x64xf32> to vector<64x64xf32>
    %cst_71 = arith.constant dense<0.000000e+00> : vector<8x64xf32>
    %66 = tpu.matmul %42, %65, %cst_71 {dimension_numbers = #tpu.dot_dimension_numbers<[1], [0], [0], [1], [0, 0, 1, 1], [], []>} : vector<8x64xf32>, vector<64x64xf32>, vector<8x64xf32> -> vector<8x64xf32>
    %c8_72 = arith.constant 8 : index
    %c0_73 = arith.constant 0 : index
    %c0_74 = arith.constant 0 : index
    %67 = vector.load %arg5[%c8_72, %c0_73, %c0_74] : memref<9x64x64xf32, #tpu.memory_space<vmem>>, vector<1x64x64xf32>
    %68 = vector.shape_cast %67 : vector<1x64x64xf32> to vector<64x64xf32>
    %cst_75 = arith.constant dense<0.000000e+00> : vector<8x64xf32>
    %69 = tpu.matmul %42, %68, %cst_75 {dimension_numbers = #tpu.dot_dimension_numbers<[1], [0], [0], [1], [0, 0, 1, 1], [], []>} : vector<8x64xf32>, vector<64x64xf32>, vector<8x64xf32> -> vector<8x64xf32>
    %70 = tpu.concatenate %45, %48, %51, %54, %57, %60, %63, %66, %69 in 0 : vector<8x64xf32>, vector<8x64xf32>, vector<8x64xf32>, vector<8x64xf32>, vector<8x64xf32>, vector<8x64xf32>, vector<8x64xf32>, vector<8x64xf32>, vector<8x64xf32> -> vector<72x64xf32>
    %c1_76 = arith.constant 1 : index
    %c0_77 = arith.constant 0 : index
    %c0_78 = arith.constant 0 : index
    %71 = vector.load %arg2[%c1_76, %c0_77, %c0_78] : memref<7x8x72xf32, #tpu.memory_space<vmem>>, vector<1x8x72xf32>
    %72 = vector.shape_cast %71 : vector<1x8x72xf32> to vector<8x72xf32>
    %cst_79 = arith.constant dense<0.000000e+00> : vector<8x64xf32>
    %73 = tpu.matmul %72, %70, %cst_79 {dimension_numbers = #tpu.dot_dimension_numbers<[1], [0], [0], [1], [0, 0, 1, 1], [], []>} : vector<8x72xf32>, vector<72x64xf32>, vector<8x64xf32> -> vector<8x64xf32>
    %c1_80 = arith.constant 1 : index
    %c0_81 = arith.constant 0 : index
    %c0_82 = arith.constant 0 : index
    %74 = vector.load %arg3[%c1_80, %c0_81, %c0_82] : memref<7x8x1xf32, #tpu.memory_space<vmem>>, vector<1x8x1xf32>
    %75 = vector.shape_cast %74 : vector<1x8x1xf32> to vector<8x1xf32>
    %76 = vector.broadcast %75 : vector<8x1xf32> to vector<8x64xf32>
    %77 = arith.addf %73, %76 : vector<8x64xf32>
    %cst_83 = arith.constant 0.000000e+00 : f32
    %78 = vector.broadcast %cst_83 : f32 to vector<8x64xf32>
    %79 = arith.maximumf %77, %78 : vector<8x64xf32>
    %c0_84 = arith.constant 0 : index
    %c0_85 = arith.constant 0 : index
    %80 = vector.load %arg6[%c0_84, %c0_85] : memref<64x256xf32, #tpu.memory_space<vmem>>, vector<64x256xf32>
    %cst_86 = arith.constant dense<0.000000e+00> : vector<8x256xf32>
    %81 = tpu.matmul %79, %80, %cst_86 {dimension_numbers = #tpu.dot_dimension_numbers<[1], [0], [0], [1], [0, 0, 1, 1], [], []>} : vector<8x64xf32>, vector<64x256xf32>, vector<8x256xf32> -> vector<8x256xf32>
    %82 = arith.addf %40, %81 : vector<8x256xf32>
    %c0_87 = arith.constant 0 : index
    %c0_88 = arith.constant 0 : index
    %c384 = arith.constant 384 : index
    %83 = vector.load %arg1[%c0_87, %c0_88, %c384] : memref<1x8x640xf32, #tpu.memory_space<vmem>>, vector<1x8x16xf32>
    %84 = vector.shape_cast %83 : vector<1x8x16xf32> to vector<8x16xf32>
    %c0_89 = arith.constant 0 : index
    %c0_90 = arith.constant 0 : index
    %c0_91 = arith.constant 0 : index
    %85 = vector.load %arg7[%c0_89, %c0_90, %c0_91] : memref<9x16x16xf32, #tpu.memory_space<vmem>>, vector<1x16x16xf32>
    %86 = vector.shape_cast %85 : vector<1x16x16xf32> to vector<16x16xf32>
    %cst_92 = arith.constant dense<0.000000e+00> : vector<8x16xf32>
    %87 = tpu.matmul %84, %86, %cst_92 {dimension_numbers = #tpu.dot_dimension_numbers<[1], [0], [0], [1], [0, 0, 1, 1], [], []>} : vector<8x16xf32>, vector<16x16xf32>, vector<8x16xf32> -> vector<8x16xf32>
    %c1_93 = arith.constant 1 : index
    %c0_94 = arith.constant 0 : index
    %c0_95 = arith.constant 0 : index
    %88 = vector.load %arg7[%c1_93, %c0_94, %c0_95] : memref<9x16x16xf32, #tpu.memory_space<vmem>>, vector<1x16x16xf32>
    %89 = vector.shape_cast %88 : vector<1x16x16xf32> to vector<16x16xf32>
    %cst_96 = arith.constant dense<0.000000e+00> : vector<8x16xf32>
    %90 = tpu.matmul %84, %89, %cst_96 {dimension_numbers = #tpu.dot_dimension_numbers<[1], [0], [0], [1], [0, 0, 1, 1], [], []>} : vector<8x16xf32>, vector<16x16xf32>, vector<8x16xf32> -> vector<8x16xf32>
    %c2_97 = arith.constant 2 : index
    %c0_98 = arith.constant 0 : index
    %c0_99 = arith.constant 0 : index
    %91 = vector.load %arg7[%c2_97, %c0_98, %c0_99] : memref<9x16x16xf32, #tpu.memory_space<vmem>>, vector<1x16x16xf32>
    %92 = vector.shape_cast %91 : vector<1x16x16xf32> to vector<16x16xf32>
    %cst_100 = arith.constant dense<0.000000e+00> : vector<8x16xf32>
    %93 = tpu.matmul %84, %92, %cst_100 {dimension_numbers = #tpu.dot_dimension_numbers<[1], [0], [0], [1], [0, 0, 1, 1], [], []>} : vector<8x16xf32>, vector<16x16xf32>, vector<8x16xf32> -> vector<8x16xf32>
    %c3_101 = arith.constant 3 : index
    %c0_102 = arith.constant 0 : index
    %c0_103 = arith.constant 0 : index
    %94 = vector.load %arg7[%c3_101, %c0_102, %c0_103] : memref<9x16x16xf32, #tpu.memory_space<vmem>>, vector<1x16x16xf32>
    %95 = vector.shape_cast %94 : vector<1x16x16xf32> to vector<16x16xf32>
    %cst_104 = arith.constant dense<0.000000e+00> : vector<8x16xf32>
    %96 = tpu.matmul %84, %95, %cst_104 {dimension_numbers = #tpu.dot_dimension_numbers<[1], [0], [0], [1], [0, 0, 1, 1], [], []>} : vector<8x16xf32>, vector<16x16xf32>, vector<8x16xf32> -> vector<8x16xf32>
    %c4_105 = arith.constant 4 : index
    %c0_106 = arith.constant 0 : index
    %c0_107 = arith.constant 0 : index
    %97 = vector.load %arg7[%c4_105, %c0_106, %c0_107] : memref<9x16x16xf32, #tpu.memory_space<vmem>>, vector<1x16x16xf32>
    %98 = vector.shape_cast %97 : vector<1x16x16xf32> to vector<16x16xf32>
    %cst_108 = arith.constant dense<0.000000e+00> : vector<8x16xf32>
    %99 = tpu.matmul %84, %98, %cst_108 {dimension_numbers = #tpu.dot_dimension_numbers<[1], [0], [0], [1], [0, 0, 1, 1], [], []>} : vector<8x16xf32>, vector<16x16xf32>, vector<8x16xf32> -> vector<8x16xf32>
    %c5_109 = arith.constant 5 : index
    %c0_110 = arith.constant 0 : index
    %c0_111 = arith.constant 0 : index
    %100 = vector.load %arg7[%c5_109, %c0_110, %c0_111] : memref<9x16x16xf32, #tpu.memory_space<vmem>>, vector<1x16x16xf32>
    %101 = vector.shape_cast %100 : vector<1x16x16xf32> to vector<16x16xf32>
    %cst_112 = arith.constant dense<0.000000e+00> : vector<8x16xf32>
    %102 = tpu.matmul %84, %101, %cst_112 {dimension_numbers = #tpu.dot_dimension_numbers<[1], [0], [0], [1], [0, 0, 1, 1], [], []>} : vector<8x16xf32>, vector<16x16xf32>, vector<8x16xf32> -> vector<8x16xf32>
    %c6_113 = arith.constant 6 : index
    %c0_114 = arith.constant 0 : index
    %c0_115 = arith.constant 0 : index
    %103 = vector.load %arg7[%c6_113, %c0_114, %c0_115] : memref<9x16x16xf32, #tpu.memory_space<vmem>>, vector<1x16x16xf32>
    %104 = vector.shape_cast %103 : vector<1x16x16xf32> to vector<16x16xf32>
    %cst_116 = arith.constant dense<0.000000e+00> : vector<8x16xf32>
    %105 = tpu.matmul %84, %104, %cst_116 {dimension_numbers = #tpu.dot_dimension_numbers<[1], [0], [0], [1], [0, 0, 1, 1], [], []>} : vector<8x16xf32>, vector<16x16xf32>, vector<8x16xf32> -> vector<8x16xf32>
    %c7_117 = arith.constant 7 : index
    %c0_118 = arith.constant 0 : index
    %c0_119 = arith.constant 0 : index
    %106 = vector.load %arg7[%c7_117, %c0_118, %c0_119] : memref<9x16x16xf32, #tpu.memory_space<vmem>>, vector<1x16x16xf32>
    %107 = vector.shape_cast %106 : vector<1x16x16xf32> to vector<16x16xf32>
    %cst_120 = arith.constant dense<0.000000e+00> : vector<8x16xf32>
    %108 = tpu.matmul %84, %107, %cst_120 {dimension_numbers = #tpu.dot_dimension_numbers<[1], [0], [0], [1], [0, 0, 1, 1], [], []>} : vector<8x16xf32>, vector<16x16xf32>, vector<8x16xf32> -> vector<8x16xf32>
    %c8_121 = arith.constant 8 : index
    %c0_122 = arith.constant 0 : index
    %c0_123 = arith.constant 0 : index
    %109 = vector.load %arg7[%c8_121, %c0_122, %c0_123] : memref<9x16x16xf32, #tpu.memory_space<vmem>>, vector<1x16x16xf32>
    %110 = vector.shape_cast %109 : vector<1x16x16xf32> to vector<16x16xf32>
    %cst_124 = arith.constant dense<0.000000e+00> : vector<8x16xf32>
    %111 = tpu.matmul %84, %110, %cst_124 {dimension_numbers = #tpu.dot_dimension_numbers<[1], [0], [0], [1], [0, 0, 1, 1], [], []>} : vector<8x16xf32>, vector<16x16xf32>, vector<8x16xf32> -> vector<8x16xf32>
    %112 = tpu.concatenate %87, %90, %93, %96, %99, %102, %105, %108, %111 in 0 : vector<8x16xf32>, vector<8x16xf32>, vector<8x16xf32>, vector<8x16xf32>, vector<8x16xf32>, vector<8x16xf32>, vector<8x16xf32>, vector<8x16xf32>, vector<8x16xf32> -> vector<72x16xf32>
    %c2_125 = arith.constant 2 : index
    %c0_126 = arith.constant 0 : index
    %c0_127 = arith.constant 0 : index
    %113 = vector.load %arg2[%c2_125, %c0_126, %c0_127] : memref<7x8x72xf32, #tpu.memory_space<vmem>>, vector<1x8x72xf32>
    %114 = vector.shape_cast %113 : vector<1x8x72xf32> to vector<8x72xf32>
    %cst_128 = arith.constant dense<0.000000e+00> : vector<8x16xf32>
    %115 = tpu.matmul %114, %112, %cst_128 {dimension_numbers = #tpu.dot_dimension_numbers<[1], [0], [0], [1], [0, 0, 1, 1], [], []>} : vector<8x72xf32>, vector<72x16xf32>, vector<8x16xf32> -> vector<8x16xf32>
    %c2_129 = arith.constant 2 : index
    %c0_130 = arith.constant 0 : index
    %c0_131 = arith.constant 0 : index
    %116 = vector.load %arg3[%c2_129, %c0_130, %c0_131] : memref<7x8x1xf32, #tpu.memory_space<vmem>>, vector<1x8x1xf32>
    %117 = vector.shape_cast %116 : vector<1x8x1xf32> to vector<8x1xf32>
    %118 = vector.broadcast %117 : vector<8x1xf32> to vector<8x16xf32>
    %119 = arith.addf %115, %118 : vector<8x16xf32>
    %cst_132 = arith.constant 0.000000e+00 : f32
    %120 = vector.broadcast %cst_132 : f32 to vector<8x16xf32>
    %121 = arith.maximumf %119, %120 : vector<8x16xf32>
    %c0_133 = arith.constant 0 : index
    %c0_134 = arith.constant 0 : index
    %c0_135 = arith.constant 0 : index
    %122 = vector.load %arg8[%c0_133, %c0_134, %c0_135] : memref<9x16x64xf32, #tpu.memory_space<vmem>>, vector<1x16x64xf32>
    %123 = vector.shape_cast %122 : vector<1x16x64xf32> to vector<16x64xf32>
    %cst_136 = arith.constant dense<0.000000e+00> : vector<8x64xf32>
    %124 = tpu.matmul %121, %123, %cst_136 {dimension_numbers = #tpu.dot_dimension_numbers<[1], [0], [0], [1], [0, 0, 1, 1], [], []>} : vector<8x16xf32>, vector<16x64xf32>, vector<8x64xf32> -> vector<8x64xf32>
    %c1_137 = arith.constant 1 : index
    %c0_138 = arith.constant 0 : index
    %c0_139 = arith.constant 0 : index
    %125 = vector.load %arg8[%c1_137, %c0_138, %c0_139] : memref<9x16x64xf32, #tpu.memory_space<vmem>>, vector<1x16x64xf32>
    %126 = vector.shape_cast %125 : vector<1x16x64xf32> to vector<16x64xf32>
    %cst_140 = arith.constant dense<0.000000e+00> : vector<8x64xf32>
    %127 = tpu.matmul %121, %126, %cst_140 {dimension_numbers = #tpu.dot_dimension_numbers<[1], [0], [0], [1], [0, 0, 1, 1], [], []>} : vector<8x16xf32>, vector<16x64xf32>, vector<8x64xf32> -> vector<8x64xf32>
    %c2_141 = arith.constant 2 : index
    %c0_142 = arith.constant 0 : index
    %c0_143 = arith.constant 0 : index
    %128 = vector.load %arg8[%c2_141, %c0_142, %c0_143] : memref<9x16x64xf32, #tpu.memory_space<vmem>>, vector<1x16x64xf32>
    %129 = vector.shape_cast %128 : vector<1x16x64xf32> to vector<16x64xf32>
    %cst_144 = arith.constant dense<0.000000e+00> : vector<8x64xf32>
    %130 = tpu.matmul %121, %129, %cst_144 {dimension_numbers = #tpu.dot_dimension_numbers<[1], [0], [0], [1], [0, 0, 1, 1], [], []>} : vector<8x16xf32>, vector<16x64xf32>, vector<8x64xf32> -> vector<8x64xf32>
    %c3_145 = arith.constant 3 : index
    %c0_146 = arith.constant 0 : index
    %c0_147 = arith.constant 0 : index
    %131 = vector.load %arg8[%c3_145, %c0_146, %c0_147] : memref<9x16x64xf32, #tpu.memory_space<vmem>>, vector<1x16x64xf32>
    %132 = vector.shape_cast %131 : vector<1x16x64xf32> to vector<16x64xf32>
    %cst_148 = arith.constant dense<0.000000e+00> : vector<8x64xf32>
    %133 = tpu.matmul %121, %132, %cst_148 {dimension_numbers = #tpu.dot_dimension_numbers<[1], [0], [0], [1], [0, 0, 1, 1], [], []>} : vector<8x16xf32>, vector<16x64xf32>, vector<8x64xf32> -> vector<8x64xf32>
    %c4_149 = arith.constant 4 : index
    %c0_150 = arith.constant 0 : index
    %c0_151 = arith.constant 0 : index
    %134 = vector.load %arg8[%c4_149, %c0_150, %c0_151] : memref<9x16x64xf32, #tpu.memory_space<vmem>>, vector<1x16x64xf32>
    %135 = vector.shape_cast %134 : vector<1x16x64xf32> to vector<16x64xf32>
    %cst_152 = arith.constant dense<0.000000e+00> : vector<8x64xf32>
    %136 = tpu.matmul %121, %135, %cst_152 {dimension_numbers = #tpu.dot_dimension_numbers<[1], [0], [0], [1], [0, 0, 1, 1], [], []>} : vector<8x16xf32>, vector<16x64xf32>, vector<8x64xf32> -> vector<8x64xf32>
    %c5_153 = arith.constant 5 : index
    %c0_154 = arith.constant 0 : index
    %c0_155 = arith.constant 0 : index
    %137 = vector.load %arg8[%c5_153, %c0_154, %c0_155] : memref<9x16x64xf32, #tpu.memory_space<vmem>>, vector<1x16x64xf32>
    %138 = vector.shape_cast %137 : vector<1x16x64xf32> to vector<16x64xf32>
    %cst_156 = arith.constant dense<0.000000e+00> : vector<8x64xf32>
    %139 = tpu.matmul %121, %138, %cst_156 {dimension_numbers = #tpu.dot_dimension_numbers<[1], [0], [0], [1], [0, 0, 1, 1], [], []>} : vector<8x16xf32>, vector<16x64xf32>, vector<8x64xf32> -> vector<8x64xf32>
    %c6_157 = arith.constant 6 : index
    %c0_158 = arith.constant 0 : index
    %c0_159 = arith.constant 0 : index
    %140 = vector.load %arg8[%c6_157, %c0_158, %c0_159] : memref<9x16x64xf32, #tpu.memory_space<vmem>>, vector<1x16x64xf32>
    %141 = vector.shape_cast %140 : vector<1x16x64xf32> to vector<16x64xf32>
    %cst_160 = arith.constant dense<0.000000e+00> : vector<8x64xf32>
    %142 = tpu.matmul %121, %141, %cst_160 {dimension_numbers = #tpu.dot_dimension_numbers<[1], [0], [0], [1], [0, 0, 1, 1], [], []>} : vector<8x16xf32>, vector<16x64xf32>, vector<8x64xf32> -> vector<8x64xf32>
    %c7_161 = arith.constant 7 : index
    %c0_162 = arith.constant 0 : index
    %c0_163 = arith.constant 0 : index
    %143 = vector.load %arg8[%c7_161, %c0_162, %c0_163] : memref<9x16x64xf32, #tpu.memory_space<vmem>>, vector<1x16x64xf32>
    %144 = vector.shape_cast %143 : vector<1x16x64xf32> to vector<16x64xf32>
    %cst_164 = arith.constant dense<0.000000e+00> : vector<8x64xf32>
    %145 = tpu.matmul %121, %144, %cst_164 {dimension_numbers = #tpu.dot_dimension_numbers<[1], [0], [0], [1], [0, 0, 1, 1], [], []>} : vector<8x16xf32>, vector<16x64xf32>, vector<8x64xf32> -> vector<8x64xf32>
    %c8_165 = arith.constant 8 : index
    %c0_166 = arith.constant 0 : index
    %c0_167 = arith.constant 0 : index
    %146 = vector.load %arg8[%c8_165, %c0_166, %c0_167] : memref<9x16x64xf32, #tpu.memory_space<vmem>>, vector<1x16x64xf32>
    %147 = vector.shape_cast %146 : vector<1x16x64xf32> to vector<16x64xf32>
    %cst_168 = arith.constant dense<0.000000e+00> : vector<8x64xf32>
    %148 = tpu.matmul %121, %147, %cst_168 {dimension_numbers = #tpu.dot_dimension_numbers<[1], [0], [0], [1], [0, 0, 1, 1], [], []>} : vector<8x16xf32>, vector<16x64xf32>, vector<8x64xf32> -> vector<8x64xf32>
    %149 = tpu.concatenate %124, %127, %130, %133, %136, %139, %142, %145, %148 in 0 : vector<8x64xf32>, vector<8x64xf32>, vector<8x64xf32>, vector<8x64xf32>, vector<8x64xf32>, vector<8x64xf32>, vector<8x64xf32>, vector<8x64xf32>, vector<8x64xf32> -> vector<72x64xf32>
    %c3_169 = arith.constant 3 : index
    %c0_170 = arith.constant 0 : index
    %c0_171 = arith.constant 0 : index
    %150 = vector.load %arg2[%c3_169, %c0_170, %c0_171] : memref<7x8x72xf32, #tpu.memory_space<vmem>>, vector<1x8x72xf32>
    %151 = vector.shape_cast %150 : vector<1x8x72xf32> to vector<8x72xf32>
    %cst_172 = arith.constant dense<0.000000e+00> : vector<8x64xf32>
    %152 = tpu.matmul %151, %149, %cst_172 {dimension_numbers = #tpu.dot_dimension_numbers<[1], [0], [0], [1], [0, 0, 1, 1], [], []>} : vector<8x72xf32>, vector<72x64xf32>, vector<8x64xf32> -> vector<8x64xf32>
    %c3_173 = arith.constant 3 : index
    %c0_174 = arith.constant 0 : index
    %c0_175 = arith.constant 0 : index
    %153 = vector.load %arg3[%c3_173, %c0_174, %c0_175] : memref<7x8x1xf32, #tpu.memory_space<vmem>>, vector<1x8x1xf32>
    %154 = vector.shape_cast %153 : vector<1x8x1xf32> to vector<8x1xf32>
    %155 = vector.broadcast %154 : vector<8x1xf32> to vector<8x64xf32>
    %156 = arith.addf %152, %155 : vector<8x64xf32>
    %cst_176 = arith.constant 0.000000e+00 : f32
    %157 = vector.broadcast %cst_176 : f32 to vector<8x64xf32>
    %158 = arith.maximumf %156, %157 : vector<8x64xf32>
    %c0_177 = arith.constant 0 : index
    %c0_178 = arith.constant 0 : index
    %159 = vector.load %arg6[%c0_177, %c0_178] : memref<64x256xf32, #tpu.memory_space<vmem>>, vector<64x256xf32>
    %cst_179 = arith.constant dense<0.000000e+00> : vector<8x256xf32>
    %160 = tpu.matmul %158, %159, %cst_179 {dimension_numbers = #tpu.dot_dimension_numbers<[1], [0], [0], [1], [0, 0, 1, 1], [], []>} : vector<8x64xf32>, vector<64x256xf32>, vector<8x256xf32> -> vector<8x256xf32>
    %161 = arith.addf %82, %160 : vector<8x256xf32>
    %c0_180 = arith.constant 0 : index
    %c0_181 = arith.constant 0 : index
    %c512 = arith.constant 512 : index
    %162 = vector.load %arg1[%c0_180, %c0_181, %c512] : memref<1x8x640xf32, #tpu.memory_space<vmem>>, vector<1x8x4xf32>
    %163 = vector.shape_cast %162 : vector<1x8x4xf32> to vector<8x4xf32>
    %c0_182 = arith.constant 0 : index
    %c0_183 = arith.constant 0 : index
    %c0_184 = arith.constant 0 : index
    %164 = vector.load %arg9[%c0_182, %c0_183, %c0_184] : memref<9x4x4xf32, #tpu.memory_space<vmem>>, vector<1x4x4xf32>
    %165 = vector.shape_cast %164 : vector<1x4x4xf32> to vector<4x4xf32>
    %cst_185 = arith.constant dense<0.000000e+00> : vector<8x4xf32>
    %166 = tpu.matmul %163, %165, %cst_185 {dimension_numbers = #tpu.dot_dimension_numbers<[1], [0], [0], [1], [0, 0, 1, 1], [], []>} : vector<8x4xf32>, vector<4x4xf32>, vector<8x4xf32> -> vector<8x4xf32>
    %c1_186 = arith.constant 1 : index
    %c0_187 = arith.constant 0 : index
    %c0_188 = arith.constant 0 : index
    %167 = vector.load %arg9[%c1_186, %c0_187, %c0_188] : memref<9x4x4xf32, #tpu.memory_space<vmem>>, vector<1x4x4xf32>
    %168 = vector.shape_cast %167 : vector<1x4x4xf32> to vector<4x4xf32>
    %cst_189 = arith.constant dense<0.000000e+00> : vector<8x4xf32>
    %169 = tpu.matmul %163, %168, %cst_189 {dimension_numbers = #tpu.dot_dimension_numbers<[1], [0], [0], [1], [0, 0, 1, 1], [], []>} : vector<8x4xf32>, vector<4x4xf32>, vector<8x4xf32> -> vector<8x4xf32>
    %c2_190 = arith.constant 2 : index
    %c0_191 = arith.constant 0 : index
    %c0_192 = arith.constant 0 : index
    %170 = vector.load %arg9[%c2_190, %c0_191, %c0_192] : memref<9x4x4xf32, #tpu.memory_space<vmem>>, vector<1x4x4xf32>
    %171 = vector.shape_cast %170 : vector<1x4x4xf32> to vector<4x4xf32>
    %cst_193 = arith.constant dense<0.000000e+00> : vector<8x4xf32>
    %172 = tpu.matmul %163, %171, %cst_193 {dimension_numbers = #tpu.dot_dimension_numbers<[1], [0], [0], [1], [0, 0, 1, 1], [], []>} : vector<8x4xf32>, vector<4x4xf32>, vector<8x4xf32> -> vector<8x4xf32>
    %c3_194 = arith.constant 3 : index
    %c0_195 = arith.constant 0 : index
    %c0_196 = arith.constant 0 : index
    %173 = vector.load %arg9[%c3_194, %c0_195, %c0_196] : memref<9x4x4xf32, #tpu.memory_space<vmem>>, vector<1x4x4xf32>
    %174 = vector.shape_cast %173 : vector<1x4x4xf32> to vector<4x4xf32>
    %cst_197 = arith.constant dense<0.000000e+00> : vector<8x4xf32>
    %175 = tpu.matmul %163, %174, %cst_197 {dimension_numbers = #tpu.dot_dimension_numbers<[1], [0], [0], [1], [0, 0, 1, 1], [], []>} : vector<8x4xf32>, vector<4x4xf32>, vector<8x4xf32> -> vector<8x4xf32>
    %c4_198 = arith.constant 4 : index
    %c0_199 = arith.constant 0 : index
    %c0_200 = arith.constant 0 : index
    %176 = vector.load %arg9[%c4_198, %c0_199, %c0_200] : memref<9x4x4xf32, #tpu.memory_space<vmem>>, vector<1x4x4xf32>
    %177 = vector.shape_cast %176 : vector<1x4x4xf32> to vector<4x4xf32>
    %cst_201 = arith.constant dense<0.000000e+00> : vector<8x4xf32>
    %178 = tpu.matmul %163, %177, %cst_201 {dimension_numbers = #tpu.dot_dimension_numbers<[1], [0], [0], [1], [0, 0, 1, 1], [], []>} : vector<8x4xf32>, vector<4x4xf32>, vector<8x4xf32> -> vector<8x4xf32>
    %c5_202 = arith.constant 5 : index
    %c0_203 = arith.constant 0 : index
    %c0_204 = arith.constant 0 : index
    %179 = vector.load %arg9[%c5_202, %c0_203, %c0_204] : memref<9x4x4xf32, #tpu.memory_space<vmem>>, vector<1x4x4xf32>
    %180 = vector.shape_cast %179 : vector<1x4x4xf32> to vector<4x4xf32>
    %cst_205 = arith.constant dense<0.000000e+00> : vector<8x4xf32>
    %181 = tpu.matmul %163, %180, %cst_205 {dimension_numbers = #tpu.dot_dimension_numbers<[1], [0], [0], [1], [0, 0, 1, 1], [], []>} : vector<8x4xf32>, vector<4x4xf32>, vector<8x4xf32> -> vector<8x4xf32>
    %c6_206 = arith.constant 6 : index
    %c0_207 = arith.constant 0 : index
    %c0_208 = arith.constant 0 : index
    %182 = vector.load %arg9[%c6_206, %c0_207, %c0_208] : memref<9x4x4xf32, #tpu.memory_space<vmem>>, vector<1x4x4xf32>
    %183 = vector.shape_cast %182 : vector<1x4x4xf32> to vector<4x4xf32>
    %cst_209 = arith.constant dense<0.000000e+00> : vector<8x4xf32>
    %184 = tpu.matmul %163, %183, %cst_209 {dimension_numbers = #tpu.dot_dimension_numbers<[1], [0], [0], [1], [0, 0, 1, 1], [], []>} : vector<8x4xf32>, vector<4x4xf32>, vector<8x4xf32> -> vector<8x4xf32>
    %c7_210 = arith.constant 7 : index
    %c0_211 = arith.constant 0 : index
    %c0_212 = arith.constant 0 : index
    %185 = vector.load %arg9[%c7_210, %c0_211, %c0_212] : memref<9x4x4xf32, #tpu.memory_space<vmem>>, vector<1x4x4xf32>
    %186 = vector.shape_cast %185 : vector<1x4x4xf32> to vector<4x4xf32>
    %cst_213 = arith.constant dense<0.000000e+00> : vector<8x4xf32>
    %187 = tpu.matmul %163, %186, %cst_213 {dimension_numbers = #tpu.dot_dimension_numbers<[1], [0], [0], [1], [0, 0, 1, 1], [], []>} : vector<8x4xf32>, vector<4x4xf32>, vector<8x4xf32> -> vector<8x4xf32>
    %c8_214 = arith.constant 8 : index
    %c0_215 = arith.constant 0 : index
    %c0_216 = arith.constant 0 : index
    %188 = vector.load %arg9[%c8_214, %c0_215, %c0_216] : memref<9x4x4xf32, #tpu.memory_space<vmem>>, vector<1x4x4xf32>
    %189 = vector.shape_cast %188 : vector<1x4x4xf32> to vector<4x4xf32>
    %cst_217 = arith.constant dense<0.000000e+00> : vector<8x4xf32>
    %190 = tpu.matmul %163, %189, %cst_217 {dimension_numbers = #tpu.dot_dimension_numbers<[1], [0], [0], [1], [0, 0, 1, 1], [], []>} : vector<8x4xf32>, vector<4x4xf32>, vector<8x4xf32> -> vector<8x4xf32>
    %191 = tpu.concatenate %166, %169, %172, %175, %178, %181, %184, %187, %190 in 0 : vector<8x4xf32>, vector<8x4xf32>, vector<8x4xf32>, vector<8x4xf32>, vector<8x4xf32>, vector<8x4xf32>, vector<8x4xf32>, vector<8x4xf32>, vector<8x4xf32> -> vector<72x4xf32>
    %c4_218 = arith.constant 4 : index
    %c0_219 = arith.constant 0 : index
    %c0_220 = arith.constant 0 : index
    %192 = vector.load %arg2[%c4_218, %c0_219, %c0_220] : memref<7x8x72xf32, #tpu.memory_space<vmem>>, vector<1x8x72xf32>
    %193 = vector.shape_cast %192 : vector<1x8x72xf32> to vector<8x72xf32>
    %cst_221 = arith.constant dense<0.000000e+00> : vector<8x4xf32>
    %194 = tpu.matmul %193, %191, %cst_221 {dimension_numbers = #tpu.dot_dimension_numbers<[1], [0], [0], [1], [0, 0, 1, 1], [], []>} : vector<8x72xf32>, vector<72x4xf32>, vector<8x4xf32> -> vector<8x4xf32>
    %c4_222 = arith.constant 4 : index
    %c0_223 = arith.constant 0 : index
    %c0_224 = arith.constant 0 : index
    %195 = vector.load %arg3[%c4_222, %c0_223, %c0_224] : memref<7x8x1xf32, #tpu.memory_space<vmem>>, vector<1x8x1xf32>
    %196 = vector.shape_cast %195 : vector<1x8x1xf32> to vector<8x1xf32>
    %197 = vector.broadcast %196 : vector<8x1xf32> to vector<8x4xf32>
    %198 = arith.addf %194, %197 : vector<8x4xf32>
    %cst_225 = arith.constant 0.000000e+00 : f32
    %199 = vector.broadcast %cst_225 : f32 to vector<8x4xf32>
    %200 = arith.maximumf %198, %199 : vector<8x4xf32>
    %c0_226 = arith.constant 0 : index
    %c0_227 = arith.constant 0 : index
    %c0_228 = arith.constant 0 : index
    %201 = vector.load %arg10[%c0_226, %c0_227, %c0_228] : memref<9x4x16xf32, #tpu.memory_space<vmem>>, vector<1x4x16xf32>
    %202 = vector.shape_cast %201 : vector<1x4x16xf32> to vector<4x16xf32>
    %cst_229 = arith.constant dense<0.000000e+00> : vector<8x16xf32>
    %203 = tpu.matmul %200, %202, %cst_229 {dimension_numbers = #tpu.dot_dimension_numbers<[1], [0], [0], [1], [0, 0, 1, 1], [], []>} : vector<8x4xf32>, vector<4x16xf32>, vector<8x16xf32> -> vector<8x16xf32>
    %c1_230 = arith.constant 1 : index
    %c0_231 = arith.constant 0 : index
    %c0_232 = arith.constant 0 : index
    %204 = vector.load %arg10[%c1_230, %c0_231, %c0_232] : memref<9x4x16xf32, #tpu.memory_space<vmem>>, vector<1x4x16xf32>
    %205 = vector.shape_cast %204 : vector<1x4x16xf32> to vector<4x16xf32>
    %cst_233 = arith.constant dense<0.000000e+00> : vector<8x16xf32>
    %206 = tpu.matmul %200, %205, %cst_233 {dimension_numbers = #tpu.dot_dimension_numbers<[1], [0], [0], [1], [0, 0, 1, 1], [], []>} : vector<8x4xf32>, vector<4x16xf32>, vector<8x16xf32> -> vector<8x16xf32>
    %c2_234 = arith.constant 2 : index
    %c0_235 = arith.constant 0 : index
    %c0_236 = arith.constant 0 : index
    %207 = vector.load %arg10[%c2_234, %c0_235, %c0_236] : memref<9x4x16xf32, #tpu.memory_space<vmem>>, vector<1x4x16xf32>
    %208 = vector.shape_cast %207 : vector<1x4x16xf32> to vector<4x16xf32>
    %cst_237 = arith.constant dense<0.000000e+00> : vector<8x16xf32>
    %209 = tpu.matmul %200, %208, %cst_237 {dimension_numbers = #tpu.dot_dimension_numbers<[1], [0], [0], [1], [0, 0, 1, 1], [], []>} : vector<8x4xf32>, vector<4x16xf32>, vector<8x16xf32> -> vector<8x16xf32>
    %c3_238 = arith.constant 3 : index
    %c0_239 = arith.constant 0 : index
    %c0_240 = arith.constant 0 : index
    %210 = vector.load %arg10[%c3_238, %c0_239, %c0_240] : memref<9x4x16xf32, #tpu.memory_space<vmem>>, vector<1x4x16xf32>
    %211 = vector.shape_cast %210 : vector<1x4x16xf32> to vector<4x16xf32>
    %cst_241 = arith.constant dense<0.000000e+00> : vector<8x16xf32>
    %212 = tpu.matmul %200, %211, %cst_241 {dimension_numbers = #tpu.dot_dimension_numbers<[1], [0], [0], [1], [0, 0, 1, 1], [], []>} : vector<8x4xf32>, vector<4x16xf32>, vector<8x16xf32> -> vector<8x16xf32>
    %c4_242 = arith.constant 4 : index
    %c0_243 = arith.constant 0 : index
    %c0_244 = arith.constant 0 : index
    %213 = vector.load %arg10[%c4_242, %c0_243, %c0_244] : memref<9x4x16xf32, #tpu.memory_space<vmem>>, vector<1x4x16xf32>
    %214 = vector.shape_cast %213 : vector<1x4x16xf32> to vector<4x16xf32>
    %cst_245 = arith.constant dense<0.000000e+00> : vector<8x16xf32>
    %215 = tpu.matmul %200, %214, %cst_245 {dimension_numbers = #tpu.dot_dimension_numbers<[1], [0], [0], [1], [0, 0, 1, 1], [], []>} : vector<8x4xf32>, vector<4x16xf32>, vector<8x16xf32> -> vector<8x16xf32>
    %c5_246 = arith.constant 5 : index
    %c0_247 = arith.constant 0 : index
    %c0_248 = arith.constant 0 : index
    %216 = vector.load %arg10[%c5_246, %c0_247, %c0_248] : memref<9x4x16xf32, #tpu.memory_space<vmem>>, vector<1x4x16xf32>
    %217 = vector.shape_cast %216 : vector<1x4x16xf32> to vector<4x16xf32>
    %cst_249 = arith.constant dense<0.000000e+00> : vector<8x16xf32>
    %218 = tpu.matmul %200, %217, %cst_249 {dimension_numbers = #tpu.dot_dimension_numbers<[1], [0], [0], [1], [0, 0, 1, 1], [], []>} : vector<8x4xf32>, vector<4x16xf32>, vector<8x16xf32> -> vector<8x16xf32>
    %c6_250 = arith.constant 6 : index
    %c0_251 = arith.constant 0 : index
    %c0_252 = arith.constant 0 : index
    %219 = vector.load %arg10[%c6_250, %c0_251, %c0_252] : memref<9x4x16xf32, #tpu.memory_space<vmem>>, vector<1x4x16xf32>
    %220 = vector.shape_cast %219 : vector<1x4x16xf32> to vector<4x16xf32>
    %cst_253 = arith.constant dense<0.000000e+00> : vector<8x16xf32>
    %221 = tpu.matmul %200, %220, %cst_253 {dimension_numbers = #tpu.dot_dimension_numbers<[1], [0], [0], [1], [0, 0, 1, 1], [], []>} : vector<8x4xf32>, vector<4x16xf32>, vector<8x16xf32> -> vector<8x16xf32>
    %c7_254 = arith.constant 7 : index
    %c0_255 = arith.constant 0 : index
    %c0_256 = arith.constant 0 : index
    %222 = vector.load %arg10[%c7_254, %c0_255, %c0_256] : memref<9x4x16xf32, #tpu.memory_space<vmem>>, vector<1x4x16xf32>
    %223 = vector.shape_cast %222 : vector<1x4x16xf32> to vector<4x16xf32>
    %cst_257 = arith.constant dense<0.000000e+00> : vector<8x16xf32>
    %224 = tpu.matmul %200, %223, %cst_257 {dimension_numbers = #tpu.dot_dimension_numbers<[1], [0], [0], [1], [0, 0, 1, 1], [], []>} : vector<8x4xf32>, vector<4x16xf32>, vector<8x16xf32> -> vector<8x16xf32>
    %c8_258 = arith.constant 8 : index
    %c0_259 = arith.constant 0 : index
    %c0_260 = arith.constant 0 : index
    %225 = vector.load %arg10[%c8_258, %c0_259, %c0_260] : memref<9x4x16xf32, #tpu.memory_space<vmem>>, vector<1x4x16xf32>
    %226 = vector.shape_cast %225 : vector<1x4x16xf32> to vector<4x16xf32>
    %cst_261 = arith.constant dense<0.000000e+00> : vector<8x16xf32>
    %227 = tpu.matmul %200, %226, %cst_261 {dimension_numbers = #tpu.dot_dimension_numbers<[1], [0], [0], [1], [0, 0, 1, 1], [], []>} : vector<8x4xf32>, vector<4x16xf32>, vector<8x16xf32> -> vector<8x16xf32>
    %228 = tpu.concatenate %203, %206, %209, %212, %215, %218, %221, %224, %227 in 0 : vector<8x16xf32>, vector<8x16xf32>, vector<8x16xf32>, vector<8x16xf32>, vector<8x16xf32>, vector<8x16xf32>, vector<8x16xf32>, vector<8x16xf32>, vector<8x16xf32> -> vector<72x16xf32>
    %c5_262 = arith.constant 5 : index
    %c0_263 = arith.constant 0 : index
    %c0_264 = arith.constant 0 : index
    %229 = vector.load %arg2[%c5_262, %c0_263, %c0_264] : memref<7x8x72xf32, #tpu.memory_space<vmem>>, vector<1x8x72xf32>
    %230 = vector.shape_cast %229 : vector<1x8x72xf32> to vector<8x72xf32>
    %cst_265 = arith.constant dense<0.000000e+00> : vector<8x16xf32>
    %231 = tpu.matmul %230, %228, %cst_265 {dimension_numbers = #tpu.dot_dimension_numbers<[1], [0], [0], [1], [0, 0, 1, 1], [], []>} : vector<8x72xf32>, vector<72x16xf32>, vector<8x16xf32> -> vector<8x16xf32>
    %c5_266 = arith.constant 5 : index
    %c0_267 = arith.constant 0 : index
    %c0_268 = arith.constant 0 : index
    %232 = vector.load %arg3[%c5_266, %c0_267, %c0_268] : memref<7x8x1xf32, #tpu.memory_space<vmem>>, vector<1x8x1xf32>
    %233 = vector.shape_cast %232 : vector<1x8x1xf32> to vector<8x1xf32>
    %234 = vector.broadcast %233 : vector<8x1xf32> to vector<8x16xf32>
    %235 = arith.addf %231, %234 : vector<8x16xf32>
    %cst_269 = arith.constant 0.000000e+00 : f32
    %236 = vector.broadcast %cst_269 : f32 to vector<8x16xf32>
    %237 = arith.maximumf %235, %236 : vector<8x16xf32>
    %c0_270 = arith.constant 0 : index
    %c0_271 = arith.constant 0 : index
    %c0_272 = arith.constant 0 : index
    %238 = vector.load %arg8[%c0_270, %c0_271, %c0_272] : memref<9x16x64xf32, #tpu.memory_space<vmem>>, vector<1x16x64xf32>
    %239 = vector.shape_cast %238 : vector<1x16x64xf32> to vector<16x64xf32>
    %cst_273 = arith.constant dense<0.000000e+00> : vector<8x64xf32>
    %240 = tpu.matmul %237, %239, %cst_273 {dimension_numbers = #tpu.dot_dimension_numbers<[1], [0], [0], [1], [0, 0, 1, 1], [], []>} : vector<8x16xf32>, vector<16x64xf32>, vector<8x64xf32> -> vector<8x64xf32>
    %c1_274 = arith.constant 1 : index
    %c0_275 = arith.constant 0 : index
    %c0_276 = arith.constant 0 : index
    %241 = vector.load %arg8[%c1_274, %c0_275, %c0_276] : memref<9x16x64xf32, #tpu.memory_space<vmem>>, vector<1x16x64xf32>
    %242 = vector.shape_cast %241 : vector<1x16x64xf32> to vector<16x64xf32>
    %cst_277 = arith.constant dense<0.000000e+00> : vector<8x64xf32>
    %243 = tpu.matmul %237, %242, %cst_277 {dimension_numbers = #tpu.dot_dimension_numbers<[1], [0], [0], [1], [0, 0, 1, 1], [], []>} : vector<8x16xf32>, vector<16x64xf32>, vector<8x64xf32> -> vector<8x64xf32>
    %c2_278 = arith.constant 2 : index
    %c0_279 = arith.constant 0 : index
    %c0_280 = arith.constant 0 : index
    %244 = vector.load %arg8[%c2_278, %c0_279, %c0_280] : memref<9x16x64xf32, #tpu.memory_space<vmem>>, vector<1x16x64xf32>
    %245 = vector.shape_cast %244 : vector<1x16x64xf32> to vector<16x64xf32>
    %cst_281 = arith.constant dense<0.000000e+00> : vector<8x64xf32>
    %246 = tpu.matmul %237, %245, %cst_281 {dimension_numbers = #tpu.dot_dimension_numbers<[1], [0], [0], [1], [0, 0, 1, 1], [], []>} : vector<8x16xf32>, vector<16x64xf32>, vector<8x64xf32> -> vector<8x64xf32>
    %c3_282 = arith.constant 3 : index
    %c0_283 = arith.constant 0 : index
    %c0_284 = arith.constant 0 : index
    %247 = vector.load %arg8[%c3_282, %c0_283, %c0_284] : memref<9x16x64xf32, #tpu.memory_space<vmem>>, vector<1x16x64xf32>
    %248 = vector.shape_cast %247 : vector<1x16x64xf32> to vector<16x64xf32>
    %cst_285 = arith.constant dense<0.000000e+00> : vector<8x64xf32>
    %249 = tpu.matmul %237, %248, %cst_285 {dimension_numbers = #tpu.dot_dimension_numbers<[1], [0], [0], [1], [0, 0, 1, 1], [], []>} : vector<8x16xf32>, vector<16x64xf32>, vector<8x64xf32> -> vector<8x64xf32>
    %c4_286 = arith.constant 4 : index
    %c0_287 = arith.constant 0 : index
    %c0_288 = arith.constant 0 : index
    %250 = vector.load %arg8[%c4_286, %c0_287, %c0_288] : memref<9x16x64xf32, #tpu.memory_space<vmem>>, vector<1x16x64xf32>
    %251 = vector.shape_cast %250 : vector<1x16x64xf32> to vector<16x64xf32>
    %cst_289 = arith.constant dense<0.000000e+00> : vector<8x64xf32>
    %252 = tpu.matmul %237, %251, %cst_289 {dimension_numbers = #tpu.dot_dimension_numbers<[1], [0], [0], [1], [0, 0, 1, 1], [], []>} : vector<8x16xf32>, vector<16x64xf32>, vector<8x64xf32> -> vector<8x64xf32>
    %c5_290 = arith.constant 5 : index
    %c0_291 = arith.constant 0 : index
    %c0_292 = arith.constant 0 : index
    %253 = vector.load %arg8[%c5_290, %c0_291, %c0_292] : memref<9x16x64xf32, #tpu.memory_space<vmem>>, vector<1x16x64xf32>
    %254 = vector.shape_cast %253 : vector<1x16x64xf32> to vector<16x64xf32>
    %cst_293 = arith.constant dense<0.000000e+00> : vector<8x64xf32>
    %255 = tpu.matmul %237, %254, %cst_293 {dimension_numbers = #tpu.dot_dimension_numbers<[1], [0], [0], [1], [0, 0, 1, 1], [], []>} : vector<8x16xf32>, vector<16x64xf32>, vector<8x64xf32> -> vector<8x64xf32>
    %c6_294 = arith.constant 6 : index
    %c0_295 = arith.constant 0 : index
    %c0_296 = arith.constant 0 : index
    %256 = vector.load %arg8[%c6_294, %c0_295, %c0_296] : memref<9x16x64xf32, #tpu.memory_space<vmem>>, vector<1x16x64xf32>
    %257 = vector.shape_cast %256 : vector<1x16x64xf32> to vector<16x64xf32>
    %cst_297 = arith.constant dense<0.000000e+00> : vector<8x64xf32>
    %258 = tpu.matmul %237, %257, %cst_297 {dimension_numbers = #tpu.dot_dimension_numbers<[1], [0], [0], [1], [0, 0, 1, 1], [], []>} : vector<8x16xf32>, vector<16x64xf32>, vector<8x64xf32> -> vector<8x64xf32>
    %c7_298 = arith.constant 7 : index
    %c0_299 = arith.constant 0 : index
    %c0_300 = arith.constant 0 : index
    %259 = vector.load %arg8[%c7_298, %c0_299, %c0_300] : memref<9x16x64xf32, #tpu.memory_space<vmem>>, vector<1x16x64xf32>
    %260 = vector.shape_cast %259 : vector<1x16x64xf32> to vector<16x64xf32>
    %cst_301 = arith.constant dense<0.000000e+00> : vector<8x64xf32>
    %261 = tpu.matmul %237, %260, %cst_301 {dimension_numbers = #tpu.dot_dimension_numbers<[1], [0], [0], [1], [0, 0, 1, 1], [], []>} : vector<8x16xf32>, vector<16x64xf32>, vector<8x64xf32> -> vector<8x64xf32>
    %c8_302 = arith.constant 8 : index
    %c0_303 = arith.constant 0 : index
    %c0_304 = arith.constant 0 : index
    %262 = vector.load %arg8[%c8_302, %c0_303, %c0_304] : memref<9x16x64xf32, #tpu.memory_space<vmem>>, vector<1x16x64xf32>
    %263 = vector.shape_cast %262 : vector<1x16x64xf32> to vector<16x64xf32>
    %cst_305 = arith.constant dense<0.000000e+00> : vector<8x64xf32>
    %264 = tpu.matmul %237, %263, %cst_305 {dimension_numbers = #tpu.dot_dimension_numbers<[1], [0], [0], [1], [0, 0, 1, 1], [], []>} : vector<8x16xf32>, vector<16x64xf32>, vector<8x64xf32> -> vector<8x64xf32>
    %265 = tpu.concatenate %240, %243, %246, %249, %252, %255, %258, %261, %264 in 0 : vector<8x64xf32>, vector<8x64xf32>, vector<8x64xf32>, vector<8x64xf32>, vector<8x64xf32>, vector<8x64xf32>, vector<8x64xf32>, vector<8x64xf32>, vector<8x64xf32> -> vector<72x64xf32>
    %c6_306 = arith.constant 6 : index
    %c0_307 = arith.constant 0 : index
    %c0_308 = arith.constant 0 : index
    %266 = vector.load %arg2[%c6_306, %c0_307, %c0_308] : memref<7x8x72xf32, #tpu.memory_space<vmem>>, vector<1x8x72xf32>
    %267 = vector.shape_cast %266 : vector<1x8x72xf32> to vector<8x72xf32>
    %cst_309 = arith.constant dense<0.000000e+00> : vector<8x64xf32>
    %268 = tpu.matmul %267, %265, %cst_309 {dimension_numbers = #tpu.dot_dimension_numbers<[1], [0], [0], [1], [0, 0, 1, 1], [], []>} : vector<8x72xf32>, vector<72x64xf32>, vector<8x64xf32> -> vector<8x64xf32>
    %c6_310 = arith.constant 6 : index
    %c0_311 = arith.constant 0 : index
    %c0_312 = arith.constant 0 : index
    %269 = vector.load %arg3[%c6_310, %c0_311, %c0_312] : memref<7x8x1xf32, #tpu.memory_space<vmem>>, vector<1x8x1xf32>
    %270 = vector.shape_cast %269 : vector<1x8x1xf32> to vector<8x1xf32>
    %271 = vector.broadcast %270 : vector<8x1xf32> to vector<8x64xf32>
    %272 = arith.addf %268, %271 : vector<8x64xf32>
    %cst_313 = arith.constant 0.000000e+00 : f32
    %273 = vector.broadcast %cst_313 : f32 to vector<8x64xf32>
    %274 = arith.maximumf %272, %273 : vector<8x64xf32>
    %c0_314 = arith.constant 0 : index
    %c0_315 = arith.constant 0 : index
    %275 = vector.load %arg6[%c0_314, %c0_315] : memref<64x256xf32, #tpu.memory_space<vmem>>, vector<64x256xf32>
    %cst_316 = arith.constant dense<0.000000e+00> : vector<8x256xf32>
    %276 = tpu.matmul %274, %275, %cst_316 {dimension_numbers = #tpu.dot_dimension_numbers<[1], [0], [0], [1], [0, 0, 1, 1], [], []>} : vector<8x64xf32>, vector<64x256xf32>, vector<8x256xf32> -> vector<8x256xf32>
    %277 = arith.addf %161, %276 : vector<8x256xf32>
    %cst_317 = arith.constant 2.500000e-01 : f32
    %278 = vector.broadcast %cst_317 : f32 to vector<8x256xf32>
    %279 = arith.mulf %277, %278 : vector<8x256xf32>
    %c0_318 = arith.constant 0 : index
    %c0_319 = arith.constant 0 : index
    %c0_320 = arith.constant 0 : index
    %280 = vector.load %arg11[%c0_318, %c0_319, %c0_320] : memref<1x8x256xf32, #tpu.memory_space<vmem>>, vector<1x8x256xf32>
    %281 = vector.shape_cast %280 : vector<1x8x256xf32> to vector<8x256xf32>
    %282 = vector.shape_cast %279 : vector<8x256xf32> to vector<1x8x256xf32>
    tpu.vector_store %arg11[%c0_318, %c0_319, %c0_320], %282 {strides = array<i32>} : memref<1x8x256xf32, #tpu.memory_space<vmem>>, vector<1x8x256xf32>,
    return
  }
  func.func @transform_0(%arg0: i32) -> (i32, i32, i32) {
    %c0_i32 = arith.constant 0 : i32
    %c0_i32_0 = arith.constant 0 : i32
    %c0_i32_1 = arith.constant 0 : i32
    return %arg0, %c0_i32, %c0_i32_0 : i32, i32, i32
  }
  func.func @transform_1(%arg0: i32) -> (i32, i32, i32) {
    %c0_i32 = arith.constant 0 : i32
    %c0_i32_0 = arith.constant 0 : i32
    %c0_i32_1 = arith.constant 0 : i32
    %c0_i32_2 = arith.constant 0 : i32
    return %c0_i32, %c0_i32_0, %c0_i32_1 : i32, i32, i32
  }
  func.func @transform_2(%arg0: i32) -> (i32, i32, i32) {
    %c0_i32 = arith.constant 0 : i32
    %c0_i32_0 = arith.constant 0 : i32
    %c0_i32_1 = arith.constant 0 : i32
    %c0_i32_2 = arith.constant 0 : i32
    return %c0_i32, %c0_i32_0, %c0_i32_1 : i32, i32, i32
  }
  func.func @transform_3(%arg0: i32) -> (i32, i32, i32) {
    %c0_i32 = arith.constant 0 : i32
    %c0_i32_0 = arith.constant 0 : i32
    %c0_i32_1 = arith.constant 0 : i32
    %c0_i32_2 = arith.constant 0 : i32
    return %c0_i32, %c0_i32_0, %c0_i32_1 : i32, i32, i32
  }
  func.func @transform_4(%arg0: i32) -> (i32, i32, i32) {
    %c0_i32 = arith.constant 0 : i32
    %c0_i32_0 = arith.constant 0 : i32
    %c0_i32_1 = arith.constant 0 : i32
    %c0_i32_2 = arith.constant 0 : i32
    return %c0_i32, %c0_i32_0, %c0_i32_1 : i32, i32, i32
  }
  func.func @transform_5(%arg0: i32) -> (i32, i32) {
    %c0_i32 = arith.constant 0 : i32
    %c0_i32_0 = arith.constant 0 : i32
    %c0_i32_1 = arith.constant 0 : i32
    return %c0_i32, %c0_i32_0 : i32, i32
  }
  func.func @transform_6(%arg0: i32) -> (i32, i32, i32) {
    %c0_i32 = arith.constant 0 : i32
    %c0_i32_0 = arith.constant 0 : i32
    %c0_i32_1 = arith.constant 0 : i32
    %c0_i32_2 = arith.constant 0 : i32
    return %c0_i32, %c0_i32_0, %c0_i32_1 : i32, i32, i32
  }
  func.func @transform_7(%arg0: i32) -> (i32, i32, i32) {
    %c0_i32 = arith.constant 0 : i32
    %c0_i32_0 = arith.constant 0 : i32
    %c0_i32_1 = arith.constant 0 : i32
    %c0_i32_2 = arith.constant 0 : i32
    return %c0_i32, %c0_i32_0, %c0_i32_1 : i32, i32, i32
  }
  func.func @transform_8(%arg0: i32) -> (i32, i32, i32) {
    %c0_i32 = arith.constant 0 : i32
    %c0_i32_0 = arith.constant 0 : i32
    %c0_i32_1 = arith.constant 0 : i32
    %c0_i32_2 = arith.constant 0 : i32
    return %c0_i32, %c0_i32_0, %c0_i32_1 : i32, i32, i32
  }
  func.func @transform_9(%arg0: i32) -> (i32, i32, i32) {
    %c0_i32 = arith.constant 0 : i32
    %c0_i32_0 = arith.constant 0 : i32
    %c0_i32_1 = arith.constant 0 : i32
    %c0_i32_2 = arith.constant 0 : i32
    return %c0_i32, %c0_i32_0, %c0_i32_1 : i32, i32, i32
  }
  func.func @transform_10(%arg0: i32) -> (i32, i32, i32) {
    %c0_i32 = arith.constant 0 : i32
    %c0_i32_0 = arith.constant 0 : i32
    %c0_i32_1 = arith.constant 0 : i32
    return %arg0, %c0_i32, %c0_i32_0 : i32, i32, i32
  }
}

</mosaic_0001>

<bundles_post_ra>
// kernel: tpu_custom_call.1
= control target key start
LH: loop header
LB: loop body
LE: loop exit
PB: predicated region body
PF: predicated region fallthrough
CT: control target
= control target key end

     0   :  { %s9953_s0 = inlined_call_operand.hbm [shape: f32[2,8,640], index: 0, kind: input, shape index: {}]   ;;  %s9954_s1 = inlined_call_operand.hbm [shape: f32[7,8,72], index: 1, kind: input, shape index: {}]   ;;  %s9955_s2 = inlined_call_operand.vmem [shape: f32[7,8,1], index: 2, kind: input, shape index: {}]   ;;  %s9956_s3 = inlined_call_operand.hbm [shape: f32[9,256,256], index: 3, kind: input, shape index: {}]   ;;  %s9957_s4 = inlined_call_operand.hbm [shape: f32[9,64,64], index: 4, kind: input, shape index: {}]   ;;  %s9958_s5 = inlined_call_operand.hbm [shape: f32[64,256], index: 5, kind: input, shape index: {}]   ;;  %s9959_s6 = inlined_call_operand.hbm [shape: f32[9,16,16], index: 6, kind: input, shape index: {}]   ;;  %s9960_s7 = inlined_call_operand.hbm [shape: f32[9,16,64], index: 7, kind: input, shape index: {}]   ;;  %s9961_s8 = inlined_call_operand.vmem [shape: f32[9,4,4], index: 8, kind: input, shape index: {}]   ;;  %s9962_s9 = inlined_call_operand.hbm [shape: f32[9,4,16], index: 9, kind: input, shape index: {}]   ;;  %s9963_s10 = inlined_call_operand.hbm [shape: f32[2,8,256], index: 10, kind: output, shape index: {}]  }
   0x1   :  { %9971 = sst [smem:[#allocation23_spill]] %s9954_s1 }
   0x2   :  { %9972 = sst [smem:[#allocation24_spill]] %s9956_s3 }
   0x3   :  { %9973 = sst [smem:[#allocation25_spill]] %s9961_s8 }
   0x4   :  { %9974 = sst [smem:[#allocation26_spill]] %s9963_s10 }
   0x5   :  { %15 = vsyncpa [#allocation3], 0 }
   0x6   :  { %17 = vsyncpa [#allocation3 + $0x1], 0 }
   0x7   :  { %18 = vsyncpa [#allocation6], 0 }
   0x8   :  { %19 = vsyncpa [#allocation9], 0 }
   0x9   :  { %20 = vsyncpa [#allocation12], 0 }
   0xa   :  { %21 = vsyncpa [#allocation15], 0 }
   0xb   :  { %22 = vsyncpa [#allocation4], 0 }
   0xc   :  { %24 = vsyncpa [#allocation4 + $0x1], 0  ;;  %s9093_s13 = smov 0   ;;  %s9095_s14 = smov 0  }
   0xd   :  { %s9097_s15 = smov 0   ;;  %s9099_s16 = smov 0  }
   0xe LB: > { %s9019_s17 = smov [#allocation5]   ;;  %s9114_s19 = sadd.s32 4294967295, %s9017_s16   ;;  %s9017_s16 = sphi %s9099_s16, %s10004_s16   ;;  %s9013_s15 = sphi %s9097_s15, %s10003_s15   ;;  %s9009_s14 = sphi %s9095_s14, %s10002_s14   ;;  %s9005_s13 = sphi %s9093_s13, %s10001_s13  }
   0xf   : > { %s288_s18 = sshll.u32 %s9019_s17, 4  ;;  %p6713_p0 = scmp.ge.s32.totalorder %s9017_s16, 1  ;;  %s9119_s18 = int_to_ptr.vmem [resolvable:$true] %s288_s18 }
  0x10   : > { %p9966_p1 = scmp.eq.s32.totalorder %s9114_s19, 0  ;;  %p276_p2 = scmp.lt.s32.totalorder %s9017_s16, 3 }
  0x11   : > { %s9020_s21 = smov [#allocation8]   ;;  %s9021_s24 = smov [#allocation11]  }
  0x12   : > { %p9121_p3 = pnand %p6713_p0, %p276_p2  ;;  %s317_s22 = sshll.u32 %s9020_s21, 4  ;;  %s9134_s22 = int_to_ptr.vmem [resolvable:$true] %s317_s22 }
  0x13   : > { %s343_s25 = sshll.u32 %s9021_s24, 4  ;;  %s9977_s1 = sld [smem:[#allocation23_spill]]  ;;  %s9136_s25 = int_to_ptr.vmem [resolvable:$true] %s343_s25 }
  0x14   : > { %s9975_s20 = scalar_select %p9121_p3, 1, 0 }
  0x15   : > { %p8610_p5 = pneg %p9121_p3 }
  0x17   : > { %p9130_p6 = pnand %p8610_p5, %p9966_p1 }
  0x19   : > { %s8709_s28 = scalar_lea.hbm %s9977_s1, 896  ;;  %p9146_p8 = pneg %p9130_p6 }
  0x1a   : > { %p8710_p7 = scmp.ne.s32.totalorder %s9977_s1, %s8709_s28  ;;  %p8716_p11 = scmp.lt.u32.totalorder %s8709_s28, %s9977_s1 }
  0x1c   : > { %p8712_p9 = pnand %p9146_p8, %p8710_p7 }
  0x1e   : > { %p8713_p10 = pneg %p8712_p9 }
  0x20   : > { %p8718_p12 = pnand %p8716_p11, %p8713_p10 }
  0x22   : > { %8721 = shalt.err (!%p8718_p12)
}
  0x23   : > { %s8722_s21 = scalar_lea.vmem %s9119_s18, 896  ;;  %p8730_p5 = scmp.lt.s32.totalorder %s9119_s18, %s9119_s18 }
  0x24   : > { %p8723_p13 = scmp.ne.s32.totalorder %s9119_s18, %s8722_s21  ;;  %p8731_p4 = scmp.lt.s32.totalorder %s8722_s21, %s8722_s21 }
  0x26   : > { %p8725_p0 = pnand %p8723_p13, %p9146_p8  ;;  %p8732_p7 = por %p8731_p4, %p8730_p5 }
  0x28   : > { %p8726_p2 = pneg %p8725_p0 }
  0x2a   : > { %p8733_p9 = pnand %p8732_p7, %p8726_p2 }
  0x2c   : > { %8736 = shalt.err (!%p8733_p9)
}
  0x2d   : > { %s9968_s24 = smov 128   ;;  %s9969_s26 = smov 8  }
  0x2e   : > { %8613 = dma.hbm_to_vmem [thread:$0]  (!%p9130_p6), %s9977_s1, 896, %s9119_s18, [#allocation6], %s9968_s24, %s9968_s24, %s9969_s26  }
  0x2f   : > { %s8737_s12 = scalar_lea.hbm %s9957_s4, 9216 }
  0x30   : > { %p8738_p4 = scmp.ne.s32.totalorder %s9957_s4, %s8737_s12  ;;  %p8744_p12 = scmp.lt.u32.totalorder %s8737_s12, %s9957_s4 }
  0x32   : > { %p8740_p10 = pnand %p8738_p4, %p9146_p8 }
  0x34   : > { %p8741_p11 = pneg %p8740_p10 }
  0x36   : > { %p8746_p13 = pnand %p8744_p12, %p8741_p11 }
  0x38   : > { %8749 = shalt.err (!%p8746_p13)
}
  0x39   : > { %s8750_s18 = scalar_lea.vmem %s9134_s22, 9216  ;;  %p8758_p7 = scmp.lt.s32.totalorder %s9134_s22, %s9134_s22 }
  0x3a   : > { %p8751_p0 = scmp.ne.s32.totalorder %s9134_s22, %s8750_s18  ;;  %p8759_p9 = scmp.lt.s32.totalorder %s8750_s18, %s8750_s18 }
  0x3c   : > { %p8753_p2 = pnand %p8751_p0, %p9146_p8  ;;  %p8760_p4 = por %p8759_p9, %p8758_p7 }
  0x3e   : > { %p8754_p5 = pneg %p8753_p2 }
  0x40   : > { %p8761_p10 = pnand %p8760_p4, %p8754_p5 }
  0x42   : > { %8764 = shalt.err (!%p8761_p10)
}
  0x43   : > { %8619 = dma.hbm_to_vmem [thread:$0]  (!%p9130_p6), %s9957_s4, 9216, %s9134_s22, [#allocation9], %s9968_s24, %s9968_s24, %s9969_s26  }
  0x44   : > { %s8765_s29 = scalar_lea.hbm %s9959_s6, 2304 }
  0x45   : > { %p8766_p11 = scmp.ne.s32.totalorder %s9959_s6, %s8765_s29  ;;  %p8772_p0 = scmp.lt.u32.totalorder %s8765_s29, %s9959_s6 }
  0x47   : > { %p8768_p12 = pnand %p8766_p11, %p9146_p8 }
  0x49   : > { %p8769_p13 = pneg %p8768_p12 }
  0x4b   : > { %p8774_p2 = pnand %p8772_p0, %p8769_p13 }
  0x4d   : > { %8777 = shalt.err (!%p8774_p2)
}
  0x4e   : > { %s8778_s22 = scalar_lea.vmem %s9136_s25, 2304  ;;  %p8786_p4 = scmp.lt.s32.totalorder %s9136_s25, %s9136_s25 }
  0x4f   : > { %p8779_p5 = scmp.ne.s32.totalorder %s9136_s25, %s8778_s22  ;;  %p8787_p10 = scmp.lt.s32.totalorder %s8778_s22, %s8778_s22 }
  0x51   : > { %p8781_p7 = pnand %p8779_p5, %p9146_p8  ;;  %p8788_p11 = por %p8787_p10, %p8786_p4 }
  0x53   : > { %p8782_p9 = pneg %p8781_p7 }
  0x55   : > { %p8789_p12 = pnand %p8788_p11, %p8782_p9 }
  0x57   : > { %8792 = shalt.err (!%p8789_p12)
}
  0x58   : > { %8625 = dma.hbm_to_vmem [thread:$0]  (!%p9130_p6), %s9959_s6, 2304, %s9136_s25, [#allocation12], %s9968_s24, %s9968_s24, %s9969_s26  }
  0x59   : > { %s9024_s10 = smov [#allocation7]   ;;  %s9979_s3 = sld [smem:[#allocation24_spill]] }
  0x5a   : > { %s304_s27 = sshll.u32 %s9024_s10, 4  ;;  %s305_s27 = int_to_ptr.vmem [resolvable:$true] %s304_s27 }
  0x5f   : > { %s8793_s30 = scalar_lea.hbm %s9979_s3, 73728 }
  0x60   : > { %p8794_p13 = scmp.ne.s32.totalorder %s9979_s3, %s8793_s30  ;;  %p8800_p5 = scmp.lt.u32.totalorder %s8793_s30, %s9979_s3 }
  0x62   : > { %p8796_p0 = pnand %p8794_p13, %p9146_p8 }
  0x64   : > { %p8797_p2 = pneg %p8796_p0 }
  0x66   : > { %p8802_p7 = pnand %p8800_p5, %p8797_p2 }
  0x68   : > { %8805 = shalt.err (!%p8802_p7)
}
  0x69   : > { %s8806_s25 = scalar_lea.vmem %s305_s27, 73728  ;;  %p8814_p11 = scmp.lt.s32.totalorder %s305_s27, %s305_s27 }
  0x6a   : > { %p8807_p9 = scmp.ne.s32.totalorder %s305_s27, %s8806_s25  ;;  %p8815_p12 = scmp.lt.s32.totalorder %s8806_s25, %s8806_s25 }
  0x6c   : > { %p8809_p4 = pnand %p8807_p9, %p9146_p8  ;;  %p8816_p1 = por %p8815_p12, %p8814_p11 }
  0x6e   : > { %p8810_p10 = pneg %p8809_p4 }
  0x70   : > { %p8817_p3 = pnand %p8816_p1, %p8810_p10 }
  0x72   : > { %8820 = shalt.err (!%p8817_p3)
}
  0x73   : > { %s9025_s18 = smov 256   ;;  %s9026_s8 = smov 16  }
  0x74   : > { %8616 = dma.hbm_to_vmem [thread:$0]  (!%p9130_p6), %s9979_s3, 73728, %s305_s27, [#allocation6], %s9025_s18, %s9025_s18, %s9026_s8  }
  0x75   : > { %s9027_s29 = smov [#allocation10]   ;;  %s9028_s12 = smov [#allocation13]  }
  0x76   : > { %s330_s30 = sshll.u32 %s9027_s29, 4  ;;  %s356_s17 = sshll.u32 %s9028_s12, 4  ;;  %s331_s30 = int_to_ptr.vmem [resolvable:$true] %s330_s30  ;;  %s9240_s17 = int_to_ptr.vmem [resolvable:$true] %s356_s17 }
  0x77   : > { %s8821_s25 = scalar_lea.hbm %s9958_s5, 2048 }
  0x78   : > { %p8822_p1 = scmp.ne.s32.totalorder %s9958_s5, %s8821_s25  ;;  %p8828_p0 = scmp.lt.u32.totalorder %s8821_s25, %s9958_s5 }
  0x7a   : > { %p8824_p3 = pnand %p8822_p1, %p9146_p8 }
  0x7c   : > { %p8825_p13 = pneg %p8824_p3 }
  0x7e   : > { %p8830_p2 = pnand %p8828_p0, %p8825_p13 }
  0x80   : > { %8833 = shalt.err (!%p8830_p2)
}
  0x81   : > { %s8834_s28 = scalar_lea.vmem %s331_s30, 2048  ;;  %p8842_p4 = scmp.lt.s32.totalorder %s331_s30, %s331_s30 }
  0x82   : > { %p8835_p5 = scmp.ne.s32.totalorder %s331_s30, %s8834_s28  ;;  %p8843_p10 = scmp.lt.s32.totalorder %s8834_s28, %s8834_s28 }
  0x84   : > { %p8837_p7 = pnand %p8835_p5, %p9146_p8  ;;  %p8844_p11 = por %p8843_p10, %p8842_p4 }
  0x86   : > { %p8838_p9 = pneg %p8837_p7 }
  0x88   : > { %p8845_p12 = pnand %p8844_p11, %p8838_p9 }
  0x8a   : > { %8848 = shalt.err (!%p8845_p12)
}
  0x8b   : > { %8622 = dma.hbm_to_vmem [thread:$0]  (!%p9130_p6), %s9958_s5, 2048, %s331_s30, [#allocation9], %s9025_s18, %s9025_s18, %s9026_s8  }
  0x8c   : > { %s8849_s21 = scalar_lea.hbm %s9960_s7, 2304 }
  0x8d   : > { %p8850_p1 = scmp.ne.s32.totalorder %s9960_s7, %s8849_s21  ;;  %p8856_p0 = scmp.lt.u32.totalorder %s8849_s21, %s9960_s7 }
  0x8f   : > { %p8852_p3 = pnand %p8850_p1, %p9146_p8 }
  0x91   : > { %p8853_p13 = pneg %p8852_p3 }
  0x93   : > { %p8858_p2 = pnand %p8856_p0, %p8853_p13 }
  0x95   : > { %8861 = shalt.err (!%p8858_p2)
}
  0x96   : > { %s8862_s18 = scalar_lea.vmem %s9240_s17, 2304  ;;  %p8870_p4 = scmp.lt.s32.totalorder %s9240_s17, %s9240_s17 }
  0x97   : > { %p8863_p5 = scmp.ne.s32.totalorder %s9240_s17, %s8862_s18  ;;  %p8871_p10 = scmp.lt.s32.totalorder %s8862_s18, %s8862_s18 }
  0x99   : > { %p8865_p7 = pnand %p8863_p5, %p9146_p8  ;;  %p8872_p11 = por %p8871_p10, %p8870_p4 }
  0x9b   : > { %p8866_p9 = pneg %p8865_p7 }
  0x9d   : > { %p8873_p12 = pnand %p8872_p11, %p8866_p9 }
  0x9f   : > { %8876 = shalt.err (!%p8873_p12)
}
  0xa0   : > { %s9980_s8 = smov 8   ;;  %s9981_s30 = smov 128  }
  0xa1   : > { %8628 = dma.hbm_to_vmem [thread:$0]  (!%p9130_p6), %s9960_s7, 2304, %s9240_s17, [#allocation12], %s9981_s30, %s9981_s30, %s9980_s8  }
  0xa2   : > { %s9029_s26 = smov [#allocation14]   ;;  %s8877_s22 = scalar_lea.hbm %s9962_s9, 576 }
  0xa3   : > { %s372_s29 = sshll.u32 %s9029_s26, 4  ;;  %p8878_p1 = scmp.ne.s32.totalorder %s9962_s9, %s8877_s22  ;;  %s373_s29 = int_to_ptr.vmem [resolvable:$true] %s372_s29 }
  0xa4   : > { %p8884_p0 = scmp.lt.u32.totalorder %s8877_s22, %s9962_s9 }
  0xa5   : > { %p8880_p3 = pnand %p8878_p1, %p9146_p8 }
  0xa7   : > { %p8881_p13 = pneg %p8880_p3 }
  0xa9   : > { %p8886_p2 = pnand %p8884_p0, %p8881_p13 }
  0xab   : > { %8889 = shalt.err (!%p8886_p2)
}
  0xac   : > { %s8890_s17 = scalar_lea.vmem %s373_s29, 576  ;;  %p8898_p4 = scmp.lt.s32.totalorder %s373_s29, %s373_s29 }
  0xad   : > { %p8891_p5 = scmp.ne.s32.totalorder %s373_s29, %s8890_s17  ;;  %p8899_p10 = scmp.lt.s32.totalorder %s8890_s17, %s8890_s17 }
  0xaf   : > { %p8893_p7 = pnand %p8891_p5, %p9146_p8  ;;  %p8900_p11 = por %p8899_p10, %p8898_p4 }
  0xb1   : > { %p8894_p9 = pneg %p8893_p7 }
  0xb3   : > { %p8901_p12 = pnand %p8900_p11, %p8894_p9 }
  0xb5   : > { %8904 = shalt.err (!%p8901_p12)
}
  0xb6   : > { %s9030_s8 = smov 64   ;;  %s9031_s11 = smov 4  }
  0xb7   : > { %8631 = dma.hbm_to_vmem [thread:$0]  (!%p9130_p6), %s9962_s9, 576, %s373_s29, [#allocation15], %s9030_s8, %s9030_s8, %s9031_s11  }
  0xb8   : > { %s6712_s24 = sadd.s32 4294967294, %s9017_s16   ;;  %s9306_s26 = sadd.s32 1, %s9017_s16  }
  0xb9   : > { %s37_s12 = sadd.s32 1, %s9013_s15  ;;  %s34_s21 = ssub.s32 %s9017_s16, %s9306_s26 }
  0xba   : > { %p44_p8 = scmp.ne.s32.totalorder %s9013_s15, %s9009_s14  ;;  %p35_p1 = scmp.eq.s32.totalorder %s34_s21, 0 }
  0xbb   : > { %p45_p3 = scmp.eq.s32.totalorder %s9017_s16, 0  ;;  %p50_p13 = scmp.ne.s32.totalorder %s9009_s14, %s9005_s13 }
  0xbc   : > { %p263_p0 = scmp.eq.s32.totalorder %s9114_s19, 1  ;;  %p9982_p5 = scmp.eq.s32.totalorder %s9114_s19, 0 }
  0xbd   : > { %s9318_s22 = scalar_select %p35_p1, %s9013_s15, %s37_s12  }
  0xbe   : > { %p46_p2 = por %p45_p3, %p44_p8  ;;  %p9322_p7 = por %p9982_p5, %p50_p13 }
  0xbf   : > { %p9326_p6 = por %p263_p0, %p44_p8  ;;  %p269_p9 = scmp.eq.s32.totalorder %s6712_s24, 1 }
  0xc0   : > { %p8647_p4 = scmp.lt.s32.totalorder %s9017_s16, 2  ;;  %s386_s25 = sand.u32 1, %s9013_s15  }
  0xc1   : > { %s9984_s29 = scalar_select %p9326_p6, 1, 0 }
  0xc2   : > { %p9332_p10 = por %p269_p9, %p50_p13  ;;  %s8575_s27 = smul.u32 40, %s386_s25 }
  0xc3   : > { %p9336_p11 = pnand %p8647_p4, %p46_p2  ;;  %s8576_s17 = smul.u32 640, %s9017_s16 }
  0xc4   : > { %s9985_s10 = scalar_select %p9332_p10, 1, 0 }
  0xc5   : > { %s9344_s30 = scalar_lea.hbm %s9953_s0, %s8576_s17  ;;  %s390_s28 = scalar_lea.vmem [#allocation2], %s8575_s27 }
  0xc6   : > { %s398_s24 = sshll.u32 %s390_s28, 4  ;;  %s387_s12 = scalar_lea.sflag [#allocation3], %s386_s25  ;;  %s9346_s24 = int_to_ptr.vmem [resolvable:$true] %s398_s24 }
  0xc7   : > { %s8905_s21 = scalar_lea.hbm %s9344_s30, 640  ;;  %p8907_p8 = pneg %p9336_p11 }
  0xc8   : > { %p8906_p12 = scmp.ne.s32.totalorder %s9344_s30, %s8905_s21  ;;  %s8910_s11 = scalar_lea.hbm %s9953_s0, 1280 }
  0xc9   : > { %p8911_p13 = scmp.lt.u32.totalorder %s9344_s30, %s9953_s0  ;;  %p8912_p0 = scmp.lt.u32.totalorder %s8910_s11, %s8905_s21 }
  0xca   : > { %p8908_p1 = pnand %p8907_p8, %p8906_p12  ;;  %p8914_p5 = scmp.lt.u32.totalorder %s8905_s21, %s9344_s30 }
  0xcb   : > { %p8913_p2 = por %p8912_p0, %p8911_p13 }
  0xcc   : > { %p8909_p3 = pneg %p8908_p1 }
  0xcd   : > { %p8915_p9 = por %p8914_p5, %p8913_p2 }
  0xcf   : > { %p8916_p4 = pnand %p8915_p9, %p8909_p3 }
  0xd1   : > { %8919 = shalt.err (!%p8916_p4)
}
  0xd2   : > { %s8920_s25 = scalar_lea.vmem %s9346_s24, 640  ;;  %s9032_s27 = smov [#allocation2]  }
  0xd3   : > { %p8921_p12 = scmp.ne.s32.totalorder %s9346_s24, %s8920_s25  ;;  %s8925_s28 = sshll.u32 %s9032_s27, 4  ;;  %s8926_s28 = int_to_ptr.vmem [resolvable:$false] %s8925_s28 }
  0xd4   : > { %s8927_s1 = scalar_lea.vmem %s8926_s28, 1280  ;;  %p8928_p6 = scmp.lt.s32.totalorder %s9346_s24, %s8926_s28 }
  0xd5   : > { %p8923_p1 = pnand %p8921_p12, %p8907_p8  ;;  %p8929_p13 = scmp.lt.s32.totalorder %s8927_s1, %s8920_s25 }
  0xd7   : > { %p8924_p10 = pneg %p8923_p1  ;;  %p8930_p0 = por %p8929_p13, %p8928_p6 }
  0xd9   : > { %p8931_p2 = pnand %p8930_p0, %p8924_p10 }
  0xdb   : > { %8934 = shalt.err (!%p8931_p2)
}
  0xdc   : > { %8635 = dma.hbm_to_vmem [thread:$0]  (!%p9336_p11), %s9344_s30, 640, %s9346_s24, %s387_s12  }
  0xdd   : > { %p9987_p3 = scmp.ne.s32.totalorder %s9975_s20, 0 }
  0xde   : > { %s9376_s3 = sand.u32 (!%p9987_p3), 1, %s9009_s14  }
  0xdf   : > { %407 = sbr.rel (%p9987_p3) target bundleno = 3789 (0xecd), region = 60  ;;  %s410_s8 = scalar_lea.sflag (!%p9987_p3), [#allocation3], %s9376_s3 }
  0xe0   : > { %s8577_s21 = smul.u32 (!%p9987_p3), 40, %s9376_s3 }
  0xe2   : > { %s9380_s17 = scalar_lea.vmem (!%p9987_p3), [#allocation2], %s8577_s21 }
  0xe6   : > { %8980 = dma.done.wait (%p9322_p7), %s410_s8, 640  }
  0xe7   : > { %8982 = vsyncadd (%p9322_p7), %s410_s8, 4294966656  ;;  %p9988_p6 = scmp.eq.s32.totalorder %s9114_s19, 0 }
  0xe9   : > { %8984 = dma.done.wait (%p9988_p6), [#allocation6], 74624   ;;  %p9989_p10 = pmov %p9988_p6 }
  0xea   : > { %p9990_p11 = pmov %p9988_p6 }
  0xeb   : > { %8986 = vsyncadd (%p9989_p10), [#allocation6], 4294892672 }
  0xec   : > { %8988 = dma.done.wait (%p9990_p11), [#allocation9], 11264   ;;  %p9991_p8 = pmov %p9988_p6 }
  0xed   : > { %p9992_p5 = pmov %p9988_p6 }
  0xee   : > { %8990 = vsyncadd (%p9991_p8), [#allocation9], 4294956032 }
  0xef   : > { %8992 = dma.done.wait (%p9992_p5), [#allocation12], 4608   ;;  %p9993_p9 = pmov %p9992_p5 }
  0xf0   : > { %p9994_p7 = pmov %p9992_p5 }
  0xf1   : > { %8994 = vsyncadd (%p9993_p9), [#allocation12], 4294962688 }
  0xf2   : > { %8996 = dma.done.wait (%p9994_p7), [#allocation15], 576   ;;  %p9995_p4 = pmov %p9992_p5 }
  0xf3   : > { %v481_v0 = vld [vmem:[#allocation7 + $0x8] sm:$0xff]  ;;  %v483_v1 = vld [vmem:[#allocation7 + $0x18] sm:$0xff]  ;;  %v480_v5 = vld [vmem:[#allocation7] sm:$0xff]  ;;  %vm9035_vm0 = vmmov 0   ;;  %vm1798_vm1 = vcmask 523264   ;;  %vm1710_vm2 = vcmask 588800  }
  0xf4   : > { %8998 = vsyncadd (%p9995_p4), [#allocation15], 4294966720  ;;  %v617_v2 = vld [vmem:[#allocation7 + $0x208] sm:$0xff]  ;;  %v7668_v3 = vpack.c.bf16 %v483_v1, %v481_v0  ;;  %v619_v4 = vld [vmem:[#allocation7 + $0x218] sm:$0xff]  ;;  %vm2682_vm3 = vcmask 130048   ;;  %s9996_s30 = sld [smem:[#allocation25_spill]] }
  0xf5   : > { %v482_v6 = vld [vmem:[#allocation7 + $0x10] sm:$0xff]  ;;  %v7732_v7 = vpack.c.bf16 %v619_v4, %v617_v2  ;;  %v616_v9 = vld [vmem:[#allocation7 + $0x200] sm:$0xff]  ;;  %v485_v11 = vld [vmem:[#allocation7 + $0x28] sm:$0xff]  ;;  %vm4247_vm4 = vcmask 1043456   ;;  %vm4243_vm5 = vcmask 31744   ;;  %s6731_s11 = sshll.u32 %s9376_s3, 4 }
  0xf6   : > { %v7670_v8 = vpack.c.bf16 %v482_v6, %v480_v5  ;;  %v618_v10 = vld [vmem:[#allocation7 + $0x210] sm:$0xff]  ;;  %7669 = vmatprep.subr.bf16.mxu0 %v7668_v3  ;;  %v487_v13 = vld [vmem:[#allocation7 + $0x38] sm:$0xff]  ;;  %v621_v14 = vld [vmem:[#allocation7 + $0x228] sm:$0xff]  ;;  %s6833_s25 = sshll.u32 %s9114_s19, 8  ;;  %s477_s27 = scalar_lea.vmem [#allocation16], %s6731_s11 }
  0xf7   : > { %v7734_v12 = vpack.c.bf16 %v618_v10, %v616_v9  ;;  %v623_v15 = vld [vmem:[#allocation7 + $0x238] sm:$0xff]  ;;  %7733 = vmatprep.subr.bf16.mxu1 %v7732_v7  ;;  %v7672_v16 = vpack.c.bf16 %v487_v13, %v485_v11  ;;  %v484_v18 = vld [vmem:[#allocation7 + $0x20] sm:$0xff]  ;;  %v486_v19 = vld [vmem:[#allocation7 + $0x30] sm:$0xff]  ;;  %s6575_s28 = sshll.u32 %s477_s27, 4  ;;  %s9997_s8 = sld [smem:[#allocation26_spill]]  ;;  %s9911_s28 = int_to_ptr.vmem [resolvable:$true] %s6575_s28 }
  0xf8   : > { %7671 = vmatpush1.bf16.msra.mxu0 %v7670_v8  ;;  %v7736_v17 = vpack.c.bf16 %v623_v15, %v621_v14  ;;  %v620_v20 = vld [vmem:[#allocation7 + $0x220] sm:$0xff]  ;;  %v7674_v21 = vpack.c.bf16 %v486_v19, %v484_v18  ;;  %v622_v22 = vld [vmem:[#allocation7 + $0x230] sm:$0xff]  ;;  %v489_v23 = vld [vmem:[#allocation7 + $0x48] sm:$0xff]  ;;  %s6561_s23 = scalar_lea.sflag [#allocation4], %s9376_s3  ;;  %s8935_s18 = scalar_lea.vmem %s9911_s28, 256 }
  0xf9   : > { %7735 = vmatpush1.bf16.msra.mxu1 %v7734_v12  ;;  %v491_v24 = vld [vmem:[#allocation7 + $0x58] sm:$0xff]  ;;  %7673 = vmatprep.subr.bf16.mxu0 %v7672_v16  ;;  %v7738_v25 = vpack.c.bf16 %v622_v22, %v620_v20  ;;  %v625_v27 = vld [vmem:[#allocation7 + $0x248] sm:$0xff]  ;;  %v488_v29 = vld [vmem:[#allocation7 + $0x40] sm:$0xff]  ;;  %p8936_p12 = scmp.ne.s32.totalorder %s9911_s28, %s8935_s18  ;;  %p9998_p1 = scmp.ne.s32.totalorder %s9984_s29, 0 }
  0xfa   : > { %7737 = vmatprep.subr.bf16.mxu1 %v7736_v17  ;;  %v7676_v26 = vpack.c.bf16 %v491_v24, %v489_v23  ;;  %v627_v28 = vld [vmem:[#allocation7 + $0x258] sm:$0xff]  ;;  %v490_v31 = vld [vmem:[#allocation7 + $0x50] sm:$0xff]  ;;  %v624_v32 = vld [vmem:[#allocation7 + $0x240] sm:$0xff]  ;;  %s9037_s19 = smov [#allocation16]  }
  0xfb   : > { %v7740_v30 = vpack.c.bf16 %v627_v28, %v625_v27  ;;  %v626_v33 = vld [vmem:[#allocation7 + $0x250] sm:$0xff]  ;;  %v7678_v34 = vpack.c.bf16 %v490_v31, %v488_v29  ;;  %v493_v35 = vld [vmem:[#allocation7 + $0x68] sm:$0xff]  ;;  %v495_v36 = vld [vmem:[#allocation7 + $0x78] sm:$0xff]  ;;  %p8937_p13 = pnand %p8936_p12, %p9998_p1  ;;  %s8939_s24 = sshll.u32 %s9037_s19, 4  ;;  %s8940_s24 = int_to_ptr.vmem [resolvable:$false] %s8939_s24 }
  0xfc   : > { %7675 = vmatpush1.bf16.msra.mxu0 %v7674_v21  ;;  %v629_v37 = vld [vmem:[#allocation7 + $0x268] sm:$0xff]  ;;  %v7742_v38 = vpack.c.bf16 %v626_v33, %v624_v32  ;;  %v7680_v39 = vpack.c.bf16 %v495_v36, %v493_v35  ;;  %v631_v40 = vld [vmem:[#allocation7 + $0x278] sm:$0xff]  ;;  %v492_v41 = vld [vmem:[#allocation7 + $0x60] sm:$0xff]  ;;  %s8941_s12 = scalar_lea.vmem %s8940_s24, 512  ;;  %p8942_p2 = scmp.lt.s32.totalorder %s9911_s28, %s8940_s24 }
  0xfd   : > { %7739 = vmatpush1.bf16.msra.mxu1 %v7738_v25  ;;  %7677 = vmatprep.subr.bf16.mxu0 %v7676_v26  ;;  %v494_v42 = vld [vmem:[#allocation7 + $0x70] sm:$0xff]  ;;  %v7744_v43 = vpack.c.bf16 %v631_v40, %v629_v37  ;;  %v628_v44 = vld [vmem:[#allocation7 + $0x260] sm:$0xff]  ;;  %v497_v46 = vld [vmem:[#allocation7 + $0x88] sm:$0xff]  ;;  %s9909_s20 = scalar_lea.hbm %s9997_s8, %s6833_s25  ;;  %p8938_p0 = pneg %p8937_p13 }
  0xfe   : > { %7741 = vmatprep.subr.bf16.mxu1 %v7740_v30  ;;  %v630_v45 = vld [vmem:[#allocation7 + $0x270] sm:$0xff]  ;;  %v499_v47 = vld [vmem:[#allocation7 + $0x98] sm:$0xff]  ;;  %v633_v48 = vld [vmem:[#allocation7 + $0x288] sm:$0xff]  ;;  %v7682_v50 = vpack.c.bf16 %v494_v42, %v492_v41  ;;  %p8943_p3 = scmp.lt.s32.totalorder %s8941_s12, %s8935_s18 }
  0xff   : > { %v635_v49 = vld [vmem:[#allocation7 + $0x298] sm:$0xff]  ;;  %v7746_v51 = vpack.c.bf16 %v630_v45, %v628_v44  ;;  %v7684_v52 = vpack.c.bf16 %v499_v47, %v497_v46  ;;  %v496_v53 = vld [vmem:[#allocation7 + $0x80] sm:$0xff]  ;;  %v498_v54 = vld [vmem:[#allocation7 + $0x90] sm:$0xff] }
 0x100   : > { %7679 = vmatpush1.bf16.msra.mxu0 %v7678_v34  ;;  %v632_v55 = vld [vmem:[#allocation7 + $0x280] sm:$0xff]  ;;  %v7748_v56 = vpack.c.bf16 %v635_v49, %v633_v48  ;;  %v634_v57 = vld [vmem:[#allocation7 + $0x290] sm:$0xff]  ;;  %v501_v58 = vld [vmem:[#allocation7 + $0xa8] sm:$0xff]  ;;  %v7686_v62 = vpack.c.bf16 %v498_v54, %v496_v53  ;;  %p8944_p6 = por %p8943_p3, %p8942_p2 }
 0x101   : > { %7743 = vmatpush1.bf16.msra.mxu1 %v7742_v38  ;;  %7681 = vmatprep.subr.bf16.mxu0 %v7680_v39  ;;  %v503_v59 = vld [vmem:[#allocation7 + $0xb8] sm:$0xff]  ;;  %v637_v60 = vld [vmem:[#allocation7 + $0x2a8] sm:$0xff]  ;;  %v7750_v63 = vpack.c.bf16 %v634_v57, %v632_v55  ;;  %v500_v1 = vld [vmem:[#allocation7 + $0xa0] sm:$0xff] }
 0x102   : > { %7745 = vmatprep.subr.bf16.mxu1 %v7744_v43  ;;  %v639_v61 = vld [vmem:[#allocation7 + $0x2b8] sm:$0xff]  ;;  %v7688_v0 = vpack.c.bf16 %v503_v59, %v501_v58  ;;  %v502_v2 = vld [vmem:[#allocation7 + $0xb0] sm:$0xff]  ;;  %v636_v3 = vld [vmem:[#allocation7 + $0x2a0] sm:$0xff]  ;;  %p8945_p10 = pnand %p8944_p6, %p8938_p0 }
 0x103   : > { %v7752_v4 = vpack.c.bf16 %v639_v61, %v637_v60  ;;  %v638_v5 = vld [vmem:[#allocation7 + $0x2b0] sm:$0xff]  ;;  %v505_v6 = vld [vmem:[#allocation7 + $0xc8] sm:$0xff]  ;;  %v507_v7 = vld [vmem:[#allocation7 + $0xd8] sm:$0xff]  ;;  %v7690_v10 = vpack.c.bf16 %v502_v2, %v500_v1 }
 0x104   : > { %7683 = vmatpush1.bf16.msra.mxu0 %v7682_v50  ;;  %v641_v8 = vld [vmem:[#allocation7 + $0x2c8] sm:$0xff]  ;;  %v643_v9 = vld [vmem:[#allocation7 + $0x2d8] sm:$0xff]  ;;  %v7754_v11 = vpack.c.bf16 %v638_v5, %v636_v3  ;;  %v7692_v12 = vpack.c.bf16 %v507_v7, %v505_v6  ;;  %v504_v13 = vld [vmem:[#allocation7 + $0xc0] sm:$0xff] }
 0x105   : > { %7747 = vmatpush1.bf16.msra.mxu1 %v7746_v51  ;;  %7685 = vmatprep.subr.bf16.mxu0 %v7684_v52  ;;  %v506_v14 = vld [vmem:[#allocation7 + $0xd0] sm:$0xff]  ;;  %v640_v15 = vld [vmem:[#allocation7 + $0x2c0] sm:$0xff]  ;;  %v7756_v16 = vpack.c.bf16 %v643_v9, %v641_v8  ;;  %v509_v18 = vld [vmem:[#allocation7 + $0xe8] sm:$0xff] }
 0x106   : > { %7749 = vmatprep.subr.bf16.mxu1 %v7748_v56  ;;  %v642_v17 = vld [vmem:[#allocation7 + $0x2d0] sm:$0xff]  ;;  %v511_v19 = vld [vmem:[#allocation7 + $0xf8] sm:$0xff]  ;;  %v645_v20 = vld [vmem:[#allocation7 + $0x2e8] sm:$0xff]  ;;  %v7694_v22 = vpack.c.bf16 %v506_v14, %v504_v13 }
 0x107   : > { %v647_v21 = vld [vmem:[#allocation7 + $0x2f8] sm:$0xff]  ;;  %v7758_v23 = vpack.c.bf16 %v642_v17, %v640_v15  ;;  %v7696_v24 = vpack.c.bf16 %v511_v19, %v509_v18  ;;  %v508_v25 = vld [vmem:[#allocation7 + $0xe0] sm:$0xff]  ;;  %v510_v26 = vld [vmem:[#allocation7 + $0xf0] sm:$0xff] }
 0x108   : > { %7687 = vmatpush1.bf16.msra.mxu0 %v7686_v62  ;;  %v644_v27 = vld [vmem:[#allocation7 + $0x2e0] sm:$0xff]  ;;  %v7760_v28 = vpack.c.bf16 %v647_v21, %v645_v20  ;;  %v646_v29 = vld [vmem:[#allocation7 + $0x2f0] sm:$0xff]  ;;  %v513_v30 = vld [vmem:[#allocation7 + $0x108] sm:$0xff]  ;;  %v7698_v34 = vpack.c.bf16 %v510_v26, %v508_v25 }
 0x109   : > { %7751 = vmatpush1.bf16.msra.mxu1 %v7750_v63  ;;  %7689 = vmatprep.subr.bf16.mxu0 %v7688_v0  ;;  %v515_v31 = vld [vmem:[#allocation7 + $0x118] sm:$0xff]  ;;  %v649_v32 = vld [vmem:[#allocation7 + $0x308] sm:$0xff]  ;;  %v7762_v35 = vpack.c.bf16 %v646_v29, %v644_v27  ;;  %v512_v37 = vld [vmem:[#allocation7 + $0x100] sm:$0xff] }
 0x10a   : > { %7753 = vmatprep.subr.bf16.mxu1 %v7752_v4  ;;  %v651_v33 = vld [vmem:[#allocation7 + $0x318] sm:$0xff]  ;;  %v7700_v36 = vpack.c.bf16 %v515_v31, %v513_v30  ;;  %v514_v38 = vld [vmem:[#allocation7 + $0x110] sm:$0xff]  ;;  %v648_v39 = vld [vmem:[#allocation7 + $0x300] sm:$0xff] }
 0x10b   : > { %v7764_v40 = vpack.c.bf16 %v651_v33, %v649_v32  ;;  %v650_v41 = vld [vmem:[#allocation7 + $0x310] sm:$0xff]  ;;  %v517_v42 = vld [vmem:[#allocation7 + $0x128] sm:$0xff]  ;;  %v519_v43 = vld [vmem:[#allocation7 + $0x138] sm:$0xff]  ;;  %v7702_v46 = vpack.c.bf16 %v514_v38, %v512_v37 }
 0x10c   : > { %7691 = vmatpush1.bf16.msra.mxu0 %v7690_v10  ;;  %v653_v44 = vld [vmem:[#allocation7 + $0x328] sm:$0xff]  ;;  %v655_v45 = vld [vmem:[#allocation7 + $0x338] sm:$0xff]  ;;  %v7766_v47 = vpack.c.bf16 %v650_v41, %v648_v39  ;;  %v7704_v48 = vpack.c.bf16 %v519_v43, %v517_v42  ;;  %v516_v49 = vld [vmem:[#allocation7 + $0x120] sm:$0xff] }
 0x10d   : > { %7755 = vmatpush1.bf16.msra.mxu1 %v7754_v11  ;;  %7693 = vmatprep.subr.bf16.mxu0 %v7692_v12  ;;  %v518_v50 = vld [vmem:[#allocation7 + $0x130] sm:$0xff]  ;;  %v652_v51 = vld [vmem:[#allocation7 + $0x320] sm:$0xff]  ;;  %v7768_v52 = vpack.c.bf16 %v655_v45, %v653_v44  ;;  %v521_v54 = vld [vmem:[#allocation7 + $0x148] sm:$0xff] }
 0x10e   : > { %7757 = vmatprep.subr.bf16.mxu1 %v7756_v16  ;;  %v654_v53 = vld [vmem:[#allocation7 + $0x330] sm:$0xff]  ;;  %v523_v55 = vld [vmem:[#allocation7 + $0x158] sm:$0xff]  ;;  %v657_v56 = vld [vmem:[#allocation7 + $0x348] sm:$0xff]  ;;  %v7706_v58 = vpack.c.bf16 %v518_v50, %v516_v49 }
 0x10f   : > { %v659_v57 = vld [vmem:[#allocation7 + $0x358] sm:$0xff]  ;;  %v7770_v59 = vpack.c.bf16 %v654_v53, %v652_v51  ;;  %v7708_v60 = vpack.c.bf16 %v523_v55, %v521_v54  ;;  %v520_v61 = vld [vmem:[#allocation7 + $0x140] sm:$0xff]  ;;  %v522_v62 = vld [vmem:[#allocation7 + $0x150] sm:$0xff] }
 0x110   : > { %7695 = vmatpush1.bf16.msra.mxu0 %v7694_v22  ;;  %v656_v63 = vld [vmem:[#allocation7 + $0x340] sm:$0xff]  ;;  %v7772_v0 = vpack.c.bf16 %v659_v57, %v657_v56  ;;  %v658_v1 = vld [vmem:[#allocation7 + $0x350] sm:$0xff]  ;;  %v525_v2 = vld [vmem:[#allocation7 + $0x168] sm:$0xff]  ;;  %v7710_v6 = vpack.c.bf16 %v522_v62, %v520_v61 }
 0x111   : > { %7759 = vmatpush1.bf16.msra.mxu1 %v7758_v23  ;;  %7697 = vmatprep.subr.bf16.mxu0 %v7696_v24  ;;  %v527_v3 = vld [vmem:[#allocation7 + $0x178] sm:$0xff]  ;;  %v661_v4 = vld [vmem:[#allocation7 + $0x368] sm:$0xff]  ;;  %v524_v7 = vld [vmem:[#allocation7 + $0x160] sm:$0xff]  ;;  %v7774_v8 = vpack.c.bf16 %v658_v1, %v656_v63 }
 0x112   : > { %7761 = vmatprep.subr.bf16.mxu1 %v7760_v28  ;;  %v663_v5 = vld [vmem:[#allocation7 + $0x378] sm:$0xff]  ;;  %v7712_v9 = vpack.c.bf16 %v527_v3, %v525_v2  ;;  %v526_v10 = vld [vmem:[#allocation7 + $0x170] sm:$0xff]  ;;  %v660_v11 = vld [vmem:[#allocation7 + $0x360] sm:$0xff] }
 0x113   : > { %v662_v12 = vld [vmem:[#allocation7 + $0x370] sm:$0xff]  ;;  %v7776_v13 = vpack.c.bf16 %v663_v5, %v661_v4  ;;  %v529_v14 = vld [vmem:[#allocation7 + $0x188] sm:$0xff]  ;;  %v531_v15 = vld [vmem:[#allocation7 + $0x198] sm:$0xff]  ;;  %v7714_v19 = vpack.c.bf16 %v526_v10, %v524_v7 }
 0x114   : > { %7699 = vmatpush1.bf16.msra.mxu0 %v7698_v34  ;;  %v9403_v16 = vld [vmem:[%s9380_s17 + $0x8] sm:$0xff]  ;;  %v667_v18 = vld [vmem:[#allocation7 + $0x398] sm:$0xff]  ;;  %v7778_v20 = vpack.c.bf16 %v662_v12, %v660_v11  ;;  %v7716_v21 = vpack.c.bf16 %v531_v15, %v529_v14  ;;  %v530_v23 = vld [vmem:[#allocation7 + $0x190] sm:$0xff] }
 0x115   : > { %7763 = vmatpush1.bf16.msra.mxu1 %v7762_v35  ;;  %7701 = vmatprep.subr.bf16.mxu0 %v7700_v36  ;;  %v665_v17 = vld [vmem:[#allocation7 + $0x388] sm:$0xff]  ;;  %v528_v22 = vld [vmem:[#allocation7 + $0x180] sm:$0xff]  ;;  %v666_v26 = vld [vmem:[#allocation7 + $0x390] sm:$0xff] }
 0x116   : > { %7765 = vmatprep.subr.bf16.mxu1 %v7764_v40  ;;  %608 = vmatprep.mubr.f32.mxu0 %v9403_v16  ;;  %v664_v24 = vld [vmem:[#allocation7 + $0x380] sm:$0xff]  ;;  %v7780_v25 = vpack.c.bf16 %v667_v18, %v665_v17  ;;  %v533_v27 = vld [vmem:[#allocation7 + $0x1a8] sm:$0xff]  ;;  %v535_v28 = vld [vmem:[#allocation7 + $0x1b8] sm:$0xff]  ;;  %v7718_v31 = vpack.c.bf16 %v530_v23, %v528_v22 }
 0x117   : > { %744 = vmatprep.mubr.f32.mxu1 %v9403_v16  ;;  %v669_v29 = vld [vmem:[#allocation7 + $0x3a8] sm:$0xff]  ;;  %v671_v30 = vld [vmem:[#allocation7 + $0x3b8] sm:$0xff]  ;;  %v7782_v32 = vpack.c.bf16 %v666_v26, %v664_v24  ;;  %v7720_v33 = vpack.c.bf16 %v535_v28, %v533_v27  ;;  %v532_v34 = vld [vmem:[#allocation7 + $0x1a0] sm:$0xff] }
 0x118   : > { %7703 = vmatpush1.bf16.msra.mxu0 %v7702_v46  ;;  %v534_v35 = vld [vmem:[#allocation7 + $0x1b0] sm:$0xff]  ;;  %v668_v36 = vld [vmem:[#allocation7 + $0x3a0] sm:$0xff]  ;;  %v7784_v37 = vpack.c.bf16 %v671_v30, %v669_v29  ;;  %v537_v39 = vld [vmem:[#allocation7 + $0x1c8] sm:$0xff] }
 0x119   : > { %7767 = vmatpush1.bf16.msra.mxu1 %v7766_v47  ;;  %7705 = vmatprep.subr.bf16.mxu0 %v7704_v48  ;;  %v670_v38 = vld [vmem:[#allocation7 + $0x3b0] sm:$0xff]  ;;  %v539_v40 = vld [vmem:[#allocation7 + $0x1d8] sm:$0xff]  ;;  %v673_v41 = vld [vmem:[#allocation7 + $0x3c8] sm:$0xff]  ;;  %v7722_v43 = vpack.c.bf16 %v534_v35, %v532_v34 }
 0x11a   : > { %7769 = vmatprep.subr.bf16.mxu1 %v7768_v52  ;;  %v675_v42 = vld [vmem:[#allocation7 + $0x3d8] sm:$0xff]  ;;  %v7786_v44 = vpack.c.bf16 %v670_v38, %v668_v36  ;;  %v7724_v45 = vpack.c.bf16 %v539_v40, %v537_v39  ;;  %v536_v46 = vld [vmem:[#allocation7 + $0x1c0] sm:$0xff]  ;;  %v538_v47 = vld [vmem:[#allocation7 + $0x1d0] sm:$0xff] }
 0x11b   : > { %v672_v48 = vld [vmem:[#allocation7 + $0x3c0] sm:$0xff]  ;;  %v7788_v49 = vpack.c.bf16 %v675_v42, %v673_v41  ;;  %v674_v50 = vld [vmem:[#allocation7 + $0x3d0] sm:$0xff]  ;;  %v541_v51 = vld [vmem:[#allocation7 + $0x1e8] sm:$0xff]  ;;  %v7726_v55 = vpack.c.bf16 %v538_v47, %v536_v46 }
 0x11c   : > { %7707 = vmatpush1.bf16.msra.mxu0 %v7706_v58  ;;  %v543_v52 = vld [vmem:[#allocation7 + $0x1f8] sm:$0xff]  ;;  %v677_v53 = vld [vmem:[#allocation7 + $0x3e8] sm:$0xff]  ;;  %v7790_v56 = vpack.c.bf16 %v674_v50, %v672_v48  ;;  %v540_v58 = vld [vmem:[#allocation7 + $0x1e0] sm:$0xff] }
 0x11d   : > { %7771 = vmatpush1.bf16.msra.mxu1 %v7770_v59  ;;  %7709 = vmatprep.subr.bf16.mxu0 %v7708_v60  ;;  %v679_v54 = vld [vmem:[#allocation7 + $0x3f8] sm:$0xff]  ;;  %v7728_v57 = vpack.c.bf16 %v543_v52, %v541_v51  ;;  %v542_v59 = vld [vmem:[#allocation7 + $0x1f0] sm:$0xff]  ;;  %v676_v60 = vld [vmem:[#allocation7 + $0x3e0] sm:$0xff] }
 0x11e   : > { %7773 = vmatprep.subr.bf16.mxu1 %v7772_v0  ;;  %v7792_v61 = vpack.c.bf16 %v679_v54, %v677_v53  ;;  %v678_v62 = vld [vmem:[#allocation7 + $0x3f0] sm:$0xff]  ;;  %v753_v63 = vld [vmem:[#allocation7 + $0x408] sm:$0xff]  ;;  %v755_v0 = vld [vmem:[#allocation7 + $0x418] sm:$0xff]  ;;  %v7730_v3 = vpack.c.bf16 %v542_v59, %v540_v58 }
 0x11f   : > { %v889_v1 = vld [vmem:[#allocation7 + $0x608] sm:$0xff]  ;;  %v891_v2 = vld [vmem:[#allocation7 + $0x618] sm:$0xff]  ;;  %v7794_v4 = vpack.c.bf16 %v678_v62, %v676_v60  ;;  %v7796_v5 = vpack.c.bf16 %v755_v0, %v753_v63  ;;  %v754_v7 = vld [vmem:[#allocation7 + $0x410] sm:$0xff] }
 0x120   : > { %7711 = vmatpush1.bf16.msra.mxu0 %v7710_v6  ;;  %v752_v6 = vld [vmem:[#allocation7 + $0x400] sm:$0xff]  ;;  %v890_v10 = vld [vmem:[#allocation7 + $0x610] sm:$0xff]  ;;  %v757_v11 = vld [vmem:[#allocation7 + $0x428] sm:$0xff] }
 0x121   : > { %7775 = vmatpush1.bf16.msra.mxu1 %v7774_v8  ;;  %7713 = vmatprep.subr.bf16.mxu0 %v7712_v9  ;;  %v888_v8 = vld [vmem:[#allocation7 + $0x600] sm:$0xff]  ;;  %v7860_v9 = vpack.c.bf16 %v891_v2, %v889_v1  ;;  %v759_v12 = vld [vmem:[#allocation7 + $0x438] sm:$0xff]  ;;  %v7798_v17 = vpack.c.bf16 %v754_v7, %v752_v6  ;;  %v894_v24 = vld [vmem:[#allocation7 + $0x630] sm:$0xff] }
 0x122   : > { %7777 = vmatprep.subr.bf16.mxu1 %v7776_v13  ;;  %v893_v13 = vld [vmem:[#allocation7 + $0x628] sm:$0xff]  ;;  %v895_v14 = vld [vmem:[#allocation7 + $0x638] sm:$0xff]  ;;  %v7862_v18 = vpack.c.bf16 %v890_v10, %v888_v8  ;;  %v892_v22 = vld [vmem:[#allocation7 + $0x620] sm:$0xff] }
 0x123   : > { %v9408_v15 = vld [vmem:[%s9380_s17] sm:$0xff]  ;;  %v7864_v23 = vpack.c.bf16 %v895_v14, %v893_v13  ;;  %v897_v27 = vld [vmem:[#allocation7 + $0x648] sm:$0xff]  ;;  %v7866_v30 = vpack.c.bf16 %v894_v24, %v892_v22  ;;  %v898_v36 = vld [vmem:[#allocation7 + $0x650] sm:$0xff] }
 0x124   : > { %7715 = vmatpush1.bf16.msra.mxu0 %v7714_v19  ;;  %v7800_v19 = vpack.c.bf16 %v759_v12, %v757_v11  ;;  %v763_v26 = vld [vmem:[#allocation7 + $0x458] sm:$0xff]  ;;  %v896_v34 = vld [vmem:[#allocation7 + $0x640] sm:$0xff]  ;;  %v901_v39 = vld [vmem:[#allocation7 + $0x668] sm:$0xff] }
 0x125   : > { %7779 = vmatpush1.bf16.msra.mxu1 %v7778_v20  ;;  %7717 = vmatprep.subr.bf16.mxu0 %v7716_v21  ;;  %v756_v20 = vld [vmem:[#allocation7 + $0x420] sm:$0xff]  ;;  %v758_v21 = vld [vmem:[#allocation7 + $0x430] sm:$0xff]  ;;  %v899_v28 = vld [vmem:[#allocation7 + $0x658] sm:$0xff]  ;;  %v7870_v42 = vpack.c.bf16 %v898_v36, %v896_v34 }
 0x126   : > { %7781 = vmatprep.subr.bf16.mxu1 %v7780_v25  ;;  %v761_v25 = vld [vmem:[#allocation7 + $0x448] sm:$0xff]  ;;  %v7802_v29 = vpack.c.bf16 %v758_v21, %v756_v20  ;;  %v7868_v35 = vpack.c.bf16 %v899_v28, %v897_v27  ;;  %v767_v38 = vld [vmem:[#allocation7 + $0x478] sm:$0xff]  ;;  %v900_v46 = vld [vmem:[#allocation7 + $0x660] sm:$0xff] }
 0x127   : > { %v903_v40 = vld [vmem:[#allocation7 + $0x678] sm:$0xff]  ;;  %v902_v48 = vld [vmem:[#allocation7 + $0x670] sm:$0xff]  ;;  %v905_v51 = vld [vmem:[#allocation7 + $0x688] sm:$0xff] }
 0x128   : > { %7719 = vmatpush1.bf16.msra.mxu0 %v7718_v31  ;;  %v7804_v31 = vpack.c.bf16 %v763_v26, %v761_v25  ;;  %v7872_v47 = vpack.c.bf16 %v903_v40, %v901_v39  ;;  %v771_v50 = vld [vmem:[#allocation7 + $0x498] sm:$0xff]  ;;  %v7874_v54 = vpack.c.bf16 %v902_v48, %v900_v46  ;;  %v904_v58 = vld [vmem:[#allocation7 + $0x680] sm:$0xff]  ;;  %v906_v60 = vld [vmem:[#allocation7 + $0x690] sm:$0xff] }
 0x129   : > { %7783 = vmatpush1.bf16.msra.mxu1 %v7782_v32  ;;  %7721 = vmatprep.subr.bf16.mxu0 %v7720_v33  ;;  %v760_v32 = vld [vmem:[#allocation7 + $0x440] sm:$0xff]  ;;  %v762_v33 = vld [vmem:[#allocation7 + $0x450] sm:$0xff]  ;;  %v907_v52 = vld [vmem:[#allocation7 + $0x698] sm:$0xff]  ;;  %v7878_v2 = vpack.c.bf16 %v906_v60, %v904_v58 }
 0x12a   : > { %7785 = vmatprep.subr.bf16.mxu1 %v7784_v37  ;;  %v765_v37 = vld [vmem:[#allocation7 + $0x468] sm:$0xff]  ;;  %v7806_v41 = vpack.c.bf16 %v762_v33, %v760_v32  ;;  %v7876_v59 = vpack.c.bf16 %v907_v52, %v905_v51  ;;  %v775_v62 = vld [vmem:[#allocation7 + $0x4b8] sm:$0xff]  ;;  %v908_v6 = vld [vmem:[#allocation7 + $0x6a0] sm:$0xff] }
 0x12b   : > { %v909_v63 = vld [vmem:[#allocation7 + $0x6a8] sm:$0xff]  ;;  %v911_v0 = vld [vmem:[#allocation7 + $0x6b8] sm:$0xff]  ;;  %v910_v8 = vld [vmem:[#allocation7 + $0x6b0] sm:$0xff] }
 0x12c   : > { %7723 = vmatpush1.bf16.msra.mxu0 %v7722_v43  ;;  %v7808_v43 = vpack.c.bf16 %v767_v38, %v765_v37  ;;  %v7880_v7 = vpack.c.bf16 %v911_v0, %v909_v63  ;;  %v779_v10 = vld [vmem:[#allocation7 + $0x4d8] sm:$0xff]  ;;  %v913_v11 = vld [vmem:[#allocation7 + $0x6c8] sm:$0xff]  ;;  %v7882_v14 = vpack.c.bf16 %v910_v8, %v908_v6  ;;  %v912_v20 = vld [vmem:[#allocation7 + $0x6c0] sm:$0xff] }
 0x12d   : > { %7787 = vmatpush1.bf16.msra.mxu1 %v7786_v44  ;;  %7725 = vmatprep.subr.bf16.mxu0 %v7724_v45  ;;  %v764_v44 = vld [vmem:[#allocation7 + $0x460] sm:$0xff]  ;;  %v766_v45 = vld [vmem:[#allocation7 + $0x470] sm:$0xff]  ;;  %v915_v12 = vld [vmem:[#allocation7 + $0x6d8] sm:$0xff] }
 0x12e   : > { %7789 = vmatprep.subr.bf16.mxu1 %v7788_v49  ;;  %v769_v49 = vld [vmem:[#allocation7 + $0x488] sm:$0xff]  ;;  %v7810_v53 = vpack.c.bf16 %v766_v45, %v764_v44  ;;  %v7884_v21 = vpack.c.bf16 %v915_v12, %v913_v11  ;;  %v914_v22 = vld [vmem:[#allocation7 + $0x6d0] sm:$0xff]  ;;  %v783_v24 = vld [vmem:[#allocation7 + $0x4f8] sm:$0xff] }
 0x12f   : > { %v917_v25 = vld [vmem:[#allocation7 + $0x6e8] sm:$0xff]  ;;  %v919_v26 = vld [vmem:[#allocation7 + $0x6f8] sm:$0xff]  ;;  %v7886_v28 = vpack.c.bf16 %v914_v22, %v912_v20  ;;  %v916_v32 = vld [vmem:[#allocation7 + $0x6e0] sm:$0xff] }
 0x130   : > { %7727 = vmatpush1.bf16.msra.mxu0 %v7726_v55  ;;  %v7812_v55 = vpack.c.bf16 %v771_v50, %v769_v49  ;;  %v7888_v33 = vpack.c.bf16 %v919_v26, %v917_v25  ;;  %v918_v34 = vld [vmem:[#allocation7 + $0x6f0] sm:$0xff]  ;;  %v787_v36 = vld [vmem:[#allocation7 + $0x518] sm:$0xff]  ;;  %v921_v37 = vld [vmem:[#allocation7 + $0x708] sm:$0xff] }
 0x131   : > { %7791 = vmatpush1.bf16.msra.mxu1 %v7790_v56  ;;  %7729 = vmatprep.subr.bf16.mxu0 %v7728_v57  ;;  %v768_v56 = vld [vmem:[#allocation7 + $0x480] sm:$0xff]  ;;  %v770_v57 = vld [vmem:[#allocation7 + $0x490] sm:$0xff]  ;;  %v923_v38 = vld [vmem:[#allocation7 + $0x718] sm:$0xff]  ;;  %v7890_v40 = vpack.c.bf16 %v918_v34, %v916_v32 }
 0x132   : > { %7793 = vmatprep.subr.bf16.mxu1 %v7792_v61  ;;  %v773_v61 = vld [vmem:[#allocation7 + $0x4a8] sm:$0xff]  ;;  %v7814_v1 = vpack.c.bf16 %v770_v57, %v768_v56  ;;  %v920_v44 = vld [vmem:[#allocation7 + $0x700] sm:$0xff]  ;;  %v7892_v45 = vpack.c.bf16 %v923_v38, %v921_v37  ;;  %v922_v46 = vld [vmem:[#allocation7 + $0x710] sm:$0xff] }
 0x133   : > { %v791_v48 = vld [vmem:[#allocation7 + $0x538] sm:$0xff]  ;;  %v925_v49 = vld [vmem:[#allocation7 + $0x728] sm:$0xff]  ;;  %v7894_v52 = vpack.c.bf16 %v922_v46, %v920_v44  ;;  %v924_v56 = vld [vmem:[#allocation7 + $0x720] sm:$0xff] }
 0x134   : > { %7731 = vmatpush1.bf16.msra.mxu0 %v7730_v3  ;;  %v7816_v3 = vpack.c.bf16 %v775_v62, %v773_v61  ;;  %v927_v50 = vld [vmem:[#allocation7 + $0x738] sm:$0xff]  ;;  %v926_v58 = vld [vmem:[#allocation7 + $0x730] sm:$0xff]  ;;  %v929_v61 = vld [vmem:[#allocation7 + $0x748] sm:$0xff] }
 0x135   : > { %7795 = vmatpush1.bf16.msra.mxu1 %v7794_v4  ;;  %7797 = vmatprep.subr.bf16.mxu0 %v7796_v5  ;;  %v772_v4 = vld [vmem:[#allocation7 + $0x4a0] sm:$0xff]  ;;  %v774_v5 = vld [vmem:[#allocation7 + $0x4b0] sm:$0xff]  ;;  %v7896_v57 = vpack.c.bf16 %v927_v50, %v925_v49  ;;  %v795_v60 = vld [vmem:[#allocation7 + $0x558] sm:$0xff]  ;;  %v7898_v0 = vpack.c.bf16 %v926_v58, %v924_v56 }
 0x136   : > { %7861 = vmatprep.subr.bf16.mxu1 %v7860_v9  ;;  %v777_v9 = vld [vmem:[#allocation7 + $0x4c8] sm:$0xff]  ;;  %v7818_v13 = vpack.c.bf16 %v774_v5, %v772_v4  ;;  %v931_v62 = vld [vmem:[#allocation7 + $0x758] sm:$0xff]  ;;  %v928_v4 = vld [vmem:[#allocation7 + $0x740] sm:$0xff] }
 0x137   : > { %609 = vmatmul.mubr.f32.vlgmr.msra.gmra.mrb[0].mxu0 %v9408_v15  ;;  %v7900_v5 = vpack.c.bf16 %v931_v62, %v929_v61  ;;  %v930_v6 = vld [vmem:[#allocation7 + $0x750] sm:$0xff]  ;;  %v799_v8 = vld [vmem:[#allocation7 + $0x578] sm:$0xff] }
 0x138   : > { %745 = vmatmul.mubr.f32.vlgmr.msra.gmra.mrb[0].mxu1 %v9408_v15  ;;  %7799 = vmatpush1.bf16.msra.mxu0 %v7798_v17  ;;  %v7820_v17 = vpack.c.bf16 %v779_v10, %v777_v9  ;;  %v933_v9 = vld [vmem:[#allocation7 + $0x768] sm:$0xff]  ;;  %v935_v10 = vld [vmem:[#allocation7 + $0x778] sm:$0xff]  ;;  %v7902_v12 = vpack.c.bf16 %v930_v6, %v928_v4  ;;  %v934_v20 = vld [vmem:[#allocation7 + $0x770] sm:$0xff] }
 0x139   : > { %7863 = vmatpush1.bf16.msra.mxu1 %v7862_v18  ;;  %7801 = vmatprep.subr.bf16.mxu0 %v7800_v19  ;;  %v776_v18 = vld [vmem:[#allocation7 + $0x4c0] sm:$0xff]  ;;  %v778_v19 = vld [vmem:[#allocation7 + $0x4d0] sm:$0xff]  ;;  %v803_v22 = vld [vmem:[#allocation7 + $0x598] sm:$0xff] }
 0x13a   : > { %7865 = vmatprep.subr.bf16.mxu1 %v7864_v23  ;;  %880 = vmatprep.mubr.f32.mxu0 %v9403_v16  ;;  %v781_v23 = vld [vmem:[#allocation7 + $0x4e8] sm:$0xff]  ;;  %v7822_v27 = vpack.c.bf16 %v778_v19, %v776_v18  ;;  %v932_v18 = vld [vmem:[#allocation7 + $0x760] sm:$0xff]  ;;  %v7904_v19 = vpack.c.bf16 %v935_v10, %v933_v9  ;;  %v938_v32 = vld [vmem:[#allocation7 + $0x790] sm:$0xff] }
 0x13b   : > { %1016 = vmatprep.mubr.f32.mxu1 %v9403_v16  ;;  %v7906_v26 = vpack.c.bf16 %v934_v20, %v932_v18  ;;  %v807_v34 = vld [vmem:[#allocation7 + $0x5b8] sm:$0xff]  ;;  %v942_v44 = vld [vmem:[#allocation7 + $0x7b0] sm:$0xff] }
 0x13c   : > { %7803 = vmatpush1.bf16.msra.mxu0 %v7802_v29  ;;  %v7824_v29 = vpack.c.bf16 %v783_v24, %v781_v23  ;;  %v937_v23 = vld [vmem:[#allocation7 + $0x788] sm:$0xff]  ;;  %v939_v24 = vld [vmem:[#allocation7 + $0x798] sm:$0xff]  ;;  %v946_v56 = vld [vmem:[#allocation7 + $0x7d0] sm:$0xff] }
 0x13d   : > { %7867 = vmatpush1.bf16.msra.mxu1 %v7866_v30  ;;  %7805 = vmatprep.subr.bf16.mxu0 %v7804_v31  ;;  %v780_v30 = vld [vmem:[#allocation7 + $0x4e0] sm:$0xff]  ;;  %v782_v31 = vld [vmem:[#allocation7 + $0x4f0] sm:$0xff]  ;;  %v811_v46 = vld [vmem:[#allocation7 + $0x5d8] sm:$0xff] }
 0x13e   : > { %7869 = vmatprep.subr.bf16.mxu1 %v7868_v35  ;;  %v785_v35 = vld [vmem:[#allocation7 + $0x508] sm:$0xff]  ;;  %v7826_v39 = vpack.c.bf16 %v782_v31, %v780_v30  ;;  %v936_v30 = vld [vmem:[#allocation7 + $0x780] sm:$0xff]  ;;  %v7908_v31 = vpack.c.bf16 %v939_v24, %v937_v23  ;;  %v815_v58 = vld [vmem:[#allocation7 + $0x5f8] sm:$0xff] }
 0x13f   : > { %v7910_v38 = vpack.c.bf16 %v938_v32, %v936_v30  ;;  %v950_v4 = vld [vmem:[#allocation7 + $0x7f0] sm:$0xff]  ;;  %v1027_v6 = vld [vmem:[#allocation7 + $0x818] sm:$0xff] }
 0x140   : > { %7807 = vmatpush1.bf16.msra.mxu0 %v7806_v41  ;;  %v7828_v41 = vpack.c.bf16 %v787_v36, %v785_v35  ;;  %v941_v35 = vld [vmem:[#allocation7 + $0x7a8] sm:$0xff]  ;;  %v943_v36 = vld [vmem:[#allocation7 + $0x7b8] sm:$0xff]  ;;  %v1162_v18 = vld [vmem:[#allocation7 + $0xa10] sm:$0xff] }
 0x141   : > { %7871 = vmatpush1.bf16.msra.mxu1 %v7870_v42  ;;  %7809 = vmatprep.subr.bf16.mxu0 %v7808_v43  ;;  %v784_v42 = vld [vmem:[#allocation7 + $0x500] sm:$0xff]  ;;  %v786_v43 = vld [vmem:[#allocation7 + $0x510] sm:$0xff]  ;;  %v1031_v20 = vld [vmem:[#allocation7 + $0x838] sm:$0xff] }
 0x142   : > { %7873 = vmatprep.subr.bf16.mxu1 %v7872_v47  ;;  %v789_v47 = vld [vmem:[#allocation7 + $0x528] sm:$0xff]  ;;  %v7830_v51 = vpack.c.bf16 %v786_v43, %v784_v42  ;;  %v940_v42 = vld [vmem:[#allocation7 + $0x7a0] sm:$0xff]  ;;  %v7912_v43 = vpack.c.bf16 %v943_v36, %v941_v35  ;;  %v1166_v30 = vld [vmem:[#allocation7 + $0xa30] sm:$0xff] }
 0x143   : > { %v7914_v50 = vpack.c.bf16 %v942_v44, %v940_v42  ;;  %v1035_v32 = vld [vmem:[#allocation7 + $0x858] sm:$0xff]  ;;  %v1170_v42 = vld [vmem:[#allocation7 + $0xa50] sm:$0xff] }
 0x144   : > { %7811 = vmatpush1.bf16.msra.mxu0 %v7810_v53  ;;  %v7832_v53 = vpack.c.bf16 %v791_v48, %v789_v47  ;;  %v945_v47 = vld [vmem:[#allocation7 + $0x7c8] sm:$0xff]  ;;  %v947_v48 = vld [vmem:[#allocation7 + $0x7d8] sm:$0xff] }
 0x145   : > { %7875 = vmatpush1.bf16.msra.mxu1 %v7874_v54  ;;  %7813 = vmatprep.subr.bf16.mxu0 %v7812_v55  ;;  %v788_v54 = vld [vmem:[#allocation7 + $0x520] sm:$0xff]  ;;  %v790_v55 = vld [vmem:[#allocation7 + $0x530] sm:$0xff]  ;;  %v1039_v44 = vld [vmem:[#allocation7 + $0x878] sm:$0xff] }
 0x146   : > { %7877 = vmatprep.subr.bf16.mxu1 %v7876_v59  ;;  %v793_v59 = vld [vmem:[#allocation7 + $0x548] sm:$0xff]  ;;  %v7834_v63 = vpack.c.bf16 %v790_v55, %v788_v54  ;;  %v944_v54 = vld [vmem:[#allocation7 + $0x7c0] sm:$0xff]  ;;  %v7916_v55 = vpack.c.bf16 %v947_v48, %v945_v47 }
 0x147   : > { %v7918_v62 = vpack.c.bf16 %v946_v56, %v944_v54  ;;  %v1041_v54 = vld [vmem:[#allocation7 + $0x888] sm:$0xff] }
 0x148   : > { %7815 = vmatpush1.bf16.msra.mxu0 %v7814_v1  ;;  %v7836_v1 = vpack.c.bf16 %v795_v60, %v793_v59  ;;  %v949_v59 = vld [vmem:[#allocation7 + $0x7e8] sm:$0xff]  ;;  %v951_v60 = vld [vmem:[#allocation7 + $0x7f8] sm:$0xff] }
 0x149   : > { %7879 = vmatpush1.bf16.msra.mxu1 %v7878_v2  ;;  %7817 = vmatprep.subr.bf16.mxu0 %v7816_v3  ;;  %v792_v2 = vld [vmem:[#allocation7 + $0x540] sm:$0xff]  ;;  %v794_v3 = vld [vmem:[#allocation7 + $0x550] sm:$0xff]  ;;  %v1177_v56 = vld [vmem:[#allocation7 + $0xa88] sm:$0xff] }
 0x14a   : > { %7881 = vmatprep.subr.bf16.mxu1 %v7880_v7  ;;  %v797_v7 = vld [vmem:[#allocation7 + $0x568] sm:$0xff]  ;;  %v7838_v11 = vpack.c.bf16 %v794_v3, %v792_v2  ;;  %v948_v2 = vld [vmem:[#allocation7 + $0x7e0] sm:$0xff]  ;;  %v7920_v3 = vpack.c.bf16 %v951_v60, %v949_v59 }
 0x14b   : > { %v7922_v10 = vpack.c.bf16 %v950_v4, %v948_v2  ;;  %v1040_v60 = vld [vmem:[#allocation7 + $0x880] sm:$0xff]  ;;  %v1047_v2 = vld [vmem:[#allocation7 + $0x8b8] sm:$0xff] }
 0x14c   : > { %7819 = vmatpush1.bf16.msra.mxu0 %v7818_v13  ;;  %v7840_v13 = vpack.c.bf16 %v799_v8, %v797_v7  ;;  %v1161_v7 = vld [vmem:[#allocation7 + $0xa08] sm:$0xff]  ;;  %v1163_v8 = vld [vmem:[#allocation7 + $0xa18] sm:$0xff] }
 0x14d   : > { %7883 = vmatpush1.bf16.msra.mxu1 %v7882_v14  ;;  %7821 = vmatprep.subr.bf16.mxu0 %v7820_v17  ;;  %v796_v14 = vld [vmem:[#allocation7 + $0x560] sm:$0xff]  ;;  %v798_v17 = vld [vmem:[#allocation7 + $0x570] sm:$0xff]  ;;  %v1183_v4 = vld [vmem:[#allocation7 + $0xab8] sm:$0xff] }
 0x14e   : > { %7885 = vmatprep.subr.bf16.mxu1 %v7884_v21  ;;  %v801_v21 = vld [vmem:[#allocation7 + $0x588] sm:$0xff]  ;;  %v7842_v25 = vpack.c.bf16 %v798_v17, %v796_v14  ;;  %v1160_v14 = vld [vmem:[#allocation7 + $0xa00] sm:$0xff]  ;;  %v7988_v17 = vpack.c.bf16 %v1163_v8, %v1161_v7 }
 0x14f   : > { %v7990_v24 = vpack.c.bf16 %v1162_v18, %v1160_v14  ;;  %v1044_v8 = vld [vmem:[#allocation7 + $0x8a0] sm:$0xff]  ;;  %v1051_v14 = vld [vmem:[#allocation7 + $0x8d8] sm:$0xff] }
 0x150   : > { %7823 = vmatpush1.bf16.msra.mxu0 %v7822_v27  ;;  %v7844_v27 = vpack.c.bf16 %v803_v22, %v801_v21  ;;  %v1165_v21 = vld [vmem:[#allocation7 + $0xa28] sm:$0xff]  ;;  %v1167_v22 = vld [vmem:[#allocation7 + $0xa38] sm:$0xff] }
 0x151   : > { %7887 = vmatpush1.bf16.msra.mxu1 %v7886_v28  ;;  %7825 = vmatprep.subr.bf16.mxu0 %v7824_v29  ;;  %v800_v28 = vld [vmem:[#allocation7 + $0x580] sm:$0xff]  ;;  %v802_v29 = vld [vmem:[#allocation7 + $0x590] sm:$0xff]  ;;  %v1187_v18 = vld [vmem:[#allocation7 + $0xad8] sm:$0xff] }
 0x152   : > { %7889 = vmatprep.subr.bf16.mxu1 %v7888_v33  ;;  %v805_v33 = vld [vmem:[#allocation7 + $0x5a8] sm:$0xff]  ;;  %v7846_v37 = vpack.c.bf16 %v802_v29, %v800_v28  ;;  %v1164_v28 = vld [vmem:[#allocation7 + $0xa20] sm:$0xff]  ;;  %v7992_v29 = vpack.c.bf16 %v1167_v22, %v1165_v21 }
 0x153   : > { %v7994_v36 = vpack.c.bf16 %v1166_v30, %v1164_v28  ;;  %v1048_v22 = vld [vmem:[#allocation7 + $0x8c0] sm:$0xff]  ;;  %v1055_v28 = vld [vmem:[#allocation7 + $0x8f8] sm:$0xff] }
 0x154   : > { %7827 = vmatpush1.bf16.msra.mxu0 %v7826_v39  ;;  %v7848_v39 = vpack.c.bf16 %v807_v34, %v805_v33  ;;  %v1169_v33 = vld [vmem:[#allocation7 + $0xa48] sm:$0xff]  ;;  %v1171_v34 = vld [vmem:[#allocation7 + $0xa58] sm:$0xff] }
 0x155   : > { %7891 = vmatpush1.bf16.msra.mxu1 %v7890_v40  ;;  %7829 = vmatprep.subr.bf16.mxu0 %v7828_v41  ;;  %v804_v40 = vld [vmem:[#allocation7 + $0x5a0] sm:$0xff]  ;;  %v806_v41 = vld [vmem:[#allocation7 + $0x5b0] sm:$0xff]  ;;  %v1191_v30 = vld [vmem:[#allocation7 + $0xaf8] sm:$0xff] }
 0x156   : > { %7893 = vmatprep.subr.bf16.mxu1 %v7892_v45  ;;  %v809_v45 = vld [vmem:[#allocation7 + $0x5c8] sm:$0xff]  ;;  %v7850_v49 = vpack.c.bf16 %v806_v41, %v804_v40  ;;  %v1168_v40 = vld [vmem:[#allocation7 + $0xa40] sm:$0xff]  ;;  %v7996_v41 = vpack.c.bf16 %v1171_v34, %v1169_v33 }
 0x157   : > { %v7998_v47 = vpack.c.bf16 %v1170_v42, %v1168_v40  ;;  %v1052_v34 = vld [vmem:[#allocation7 + $0x8e0] sm:$0xff]  ;;  %v1059_v40 = vld [vmem:[#allocation7 + $0x918] sm:$0xff] }
 0x158   : > { %7831 = vmatpush1.bf16.msra.mxu0 %v7830_v51  ;;  %v7852_v51 = vpack.c.bf16 %v811_v46, %v809_v45  ;;  %v1173_v45 = vld [vmem:[#allocation7 + $0xa68] sm:$0xff]  ;;  %v1175_v46 = vld [vmem:[#allocation7 + $0xa78] sm:$0xff] }
 0x159   : > { %7895 = vmatpush1.bf16.msra.mxu1 %v7894_v52  ;;  %7833 = vmatprep.subr.bf16.mxu0 %v7832_v53  ;;  %v808_v52 = vld [vmem:[#allocation7 + $0x5c0] sm:$0xff]  ;;  %v810_v53 = vld [vmem:[#allocation7 + $0x5d0] sm:$0xff]  ;;  %v1195_v42 = vld [vmem:[#allocation7 + $0xb18] sm:$0xff] }
 0x15a   : > { %7897 = vmatprep.subr.bf16.mxu1 %v7896_v57  ;;  %v813_v57 = vld [vmem:[#allocation7 + $0x5e8] sm:$0xff]  ;;  %v7854_v61 = vpack.c.bf16 %v810_v53, %v808_v52  ;;  %v8000_v52 = vpack.c.bf16 %v1175_v46, %v1173_v45  ;;  %v1174_v53 = vld [vmem:[#allocation7 + $0xa70] sm:$0xff]  ;;  %v1056_v46 = vld [vmem:[#allocation7 + $0x900] sm:$0xff] }
 0x15c   : > { %7835 = vmatpush1.bf16.msra.mxu0 %v7834_v63  ;;  %v7856_v63 = vpack.c.bf16 %v815_v58, %v813_v57  ;;  %v1179_v57 = vld [vmem:[#allocation7 + $0xa98] sm:$0xff] }
 0x15d   : > { %7899 = vmatpush1.bf16.msra.mxu1 %v7898_v0  ;;  %7837 = vmatprep.subr.bf16.mxu0 %v7836_v1  ;;  %v812_v0 = vld [vmem:[#allocation7 + $0x5e0] sm:$0xff]  ;;  %v814_v1 = vld [vmem:[#allocation7 + $0x5f0] sm:$0xff] }
 0x15e   : > { %7901 = vmatprep.subr.bf16.mxu1 %v7900_v5  ;;  %v1025_v5 = vld [vmem:[#allocation7 + $0x808] sm:$0xff]  ;;  %v7858_v9 = vpack.c.bf16 %v814_v1, %v812_v0  ;;  %v1178_v0 = vld [vmem:[#allocation7 + $0xa90] sm:$0xff] }
 0x15f   : > { %v1045_v1 = vld [vmem:[#allocation7 + $0x8a8] sm:$0xff] }
 0x160   : > { %7839 = vmatpush1.bf16.msra.mxu0 %v7838_v11  ;;  %v7924_v11 = vpack.c.bf16 %v1027_v6, %v1025_v5  ;;  %v7944_v7 = vpack.c.bf16 %v1047_v2, %v1045_v1 }
 0x161   : > { %7903 = vmatpush1.bf16.msra.mxu1 %v7902_v12  ;;  %7841 = vmatprep.subr.bf16.mxu0 %v7840_v13  ;;  %v1024_v12 = vld [vmem:[#allocation7 + $0x800] sm:$0xff]  ;;  %v1026_v13 = vld [vmem:[#allocation7 + $0x810] sm:$0xff] }
 0x162   : > { %7905 = vmatprep.subr.bf16.mxu1 %v7904_v19  ;;  %v1029_v19 = vld [vmem:[#allocation7 + $0x828] sm:$0xff]  ;;  %v7926_v23 = vpack.c.bf16 %v1026_v13, %v1024_v12  ;;  %v1182_v12 = vld [vmem:[#allocation7 + $0xab0] sm:$0xff] }
 0x163   : > { %v1049_v13 = vld [vmem:[#allocation7 + $0x8c8] sm:$0xff] }
 0x164   : > { %7843 = vmatpush1.bf16.msra.mxu0 %v7842_v25  ;;  %v7928_v25 = vpack.c.bf16 %v1031_v20, %v1029_v19  ;;  %v7948_v21 = vpack.c.bf16 %v1051_v14, %v1049_v13 }
 0x165   : > { %7907 = vmatpush1.bf16.msra.mxu1 %v7906_v26  ;;  %7845 = vmatprep.subr.bf16.mxu0 %v7844_v27  ;;  %v1028_v26 = vld [vmem:[#allocation7 + $0x820] sm:$0xff]  ;;  %v1030_v27 = vld [vmem:[#allocation7 + $0x830] sm:$0xff] }
 0x166   : > { %7909 = vmatprep.subr.bf16.mxu1 %v7908_v31  ;;  %v1033_v31 = vld [vmem:[#allocation7 + $0x848] sm:$0xff]  ;;  %v7930_v35 = vpack.c.bf16 %v1030_v27, %v1028_v26  ;;  %v1186_v26 = vld [vmem:[#allocation7 + $0xad0] sm:$0xff] }
 0x167   : > { %v1053_v27 = vld [vmem:[#allocation7 + $0x8e8] sm:$0xff] }
 0x168   : > { %7847 = vmatpush1.bf16.msra.mxu0 %v7846_v37  ;;  %v7932_v37 = vpack.c.bf16 %v1035_v32, %v1033_v31  ;;  %v7952_v33 = vpack.c.bf16 %v1055_v28, %v1053_v27 }
 0x169   : > { %7911 = vmatpush1.bf16.msra.mxu1 %v7910_v38  ;;  %7849 = vmatprep.subr.bf16.mxu0 %v7848_v39  ;;  %v1032_v38 = vld [vmem:[#allocation7 + $0x840] sm:$0xff]  ;;  %v1034_v39 = vld [vmem:[#allocation7 + $0x850] sm:$0xff] }
 0x16a   : > { %7913 = vmatprep.subr.bf16.mxu1 %v7912_v43  ;;  %v1037_v43 = vld [vmem:[#allocation7 + $0x868] sm:$0xff] }
 0x16b   : > { %v7936_v48 = vpack.c.bf16 %v1039_v44, %v1037_v43 }
 0x16c   : > { %7851 = vmatpush1.bf16.msra.mxu0 %v7850_v49  ;;  %v1036_v49 = vld [vmem:[#allocation7 + $0x860] sm:$0xff] }
 0x16d   : > { %7915 = vmatpush1.bf16.msra.mxu1 %v7914_v50  ;;  %7853 = vmatprep.subr.bf16.mxu0 %v7852_v51  ;;  %v1038_v50 = vld [vmem:[#allocation7 + $0x870] sm:$0xff]  ;;  %v1172_v51 = vld [vmem:[#allocation7 + $0xa60] sm:$0xff] }
 0x16e   : > { %7917 = vmatprep.subr.bf16.mxu1 %v7916_v55  ;;  %v1043_v55 = vld [vmem:[#allocation7 + $0x898] sm:$0xff]  ;;  %v7938_v58 = vpack.c.bf16 %v1038_v50, %v1036_v49  ;;  %v1194_v49 = vld [vmem:[#allocation7 + $0xb10] sm:$0xff]  ;;  %v1061_v50 = vld [vmem:[#allocation7 + $0x928] sm:$0xff] }
 0x16f   : > { %v7940_v59 = vpack.c.bf16 %v1043_v55, %v1041_v54 }
 0x170   : > { %7855 = vmatpush1.bf16.msra.mxu0 %v7854_v61  ;;  %v1042_v61 = vld [vmem:[#allocation7 + $0x890] sm:$0xff] }
 0x171   : > { %7919 = vmatpush1.bf16.msra.mxu1 %v7918_v62  ;;  %7857 = vmatprep.subr.bf16.mxu0 %v7856_v63  ;;  %v1176_v62 = vld [vmem:[#allocation7 + $0xa80] sm:$0xff]  ;;  %v8004_v63 = vpack.c.bf16 %v1179_v57, %v1177_v56  ;;  %v7942_v5 = vpack.c.bf16 %v1042_v61, %v1040_v60  ;;  %v1198_v60 = vld [vmem:[#allocation7 + $0xb30] sm:$0xff]  ;;  %v1065_v61 = vld [vmem:[#allocation7 + $0x948] sm:$0xff] }
 0x172   : > { %7921 = vmatprep.subr.bf16.mxu1 %v7920_v3  ;;  %v1181_v3 = vld [vmem:[#allocation7 + $0xaa8] sm:$0xff]  ;;  %v8006_v6 = vpack.c.bf16 %v1178_v0, %v1176_v62  ;;  %v1060_v57 = vld [vmem:[#allocation7 + $0x920] sm:$0xff]  ;;  %v1067_v62 = vld [vmem:[#allocation7 + $0x958] sm:$0xff] }
 0x173   : > { %v1203_v0 = vld [vmem:[#allocation7 + $0xb58] sm:$0xff] }
 0x174   : > { %7859 = vmatpush1.bf16.msra.mxu0 %v7858_v9  ;;  %v1046_v9 = vld [vmem:[#allocation7 + $0x8b0] sm:$0xff] }
 0x175   : > { %7923 = vmatpush1.bf16.msra.mxu1 %v7922_v10  ;;  %7925 = vmatprep.subr.bf16.mxu0 %v7924_v11  ;;  %v1180_v10 = vld [vmem:[#allocation7 + $0xaa0] sm:$0xff]  ;;  %v8008_v11 = vpack.c.bf16 %v1183_v4, %v1181_v3  ;;  %v7946_v19 = vpack.c.bf16 %v1046_v9, %v1044_v8  ;;  %v7964_v3 = vpack.c.bf16 %v1067_v62, %v1065_v61  ;;  %v1202_v8 = vld [vmem:[#allocation7 + $0xb50] sm:$0xff]  ;;  %v1069_v9 = vld [vmem:[#allocation7 + $0x968] sm:$0xff] }
 0x176   : > { %7989 = vmatprep.subr.bf16.mxu1 %v7988_v17  ;;  %v1185_v17 = vld [vmem:[#allocation7 + $0xac8] sm:$0xff]  ;;  %v8010_v20 = vpack.c.bf16 %v1182_v12, %v1180_v10  ;;  %v1064_v4 = vld [vmem:[#allocation7 + $0x940] sm:$0xff]  ;;  %v1071_v10 = vld [vmem:[#allocation7 + $0x978] sm:$0xff] }
 0x177   : > { %881 = vmatmul.mubr.f32.vlgmr.msra.gmra.mrb[2].mxu0 %v9408_v15  ;;  %v1207_v12 = vld [vmem:[#allocation7 + $0xb78] sm:$0xff] }
 0x178   : > { %1017 = vmatmul.mubr.f32.vlgmr.msra.gmra.mrb[2].mxu1 %v9408_v15  ;;  %7927 = vmatpush1.bf16.msra.mxu0 %v7926_v23  ;;  %v7934_v15 = vpack.c.bf16 %v1034_v39, %v1032_v38  ;;  %v1050_v23 = vld [vmem:[#allocation7 + $0x8d0] sm:$0xff]  ;;  %v1057_v39 = vld [vmem:[#allocation7 + $0x908] sm:$0xff] }
 0x179   : > { %7991 = vmatpush1.bf16.msra.mxu1 %v7990_v24  ;;  %7929 = vmatprep.subr.bf16.mxu0 %v7928_v25  ;;  %v1184_v24 = vld [vmem:[#allocation7 + $0xac0] sm:$0xff]  ;;  %v8012_v25 = vpack.c.bf16 %v1187_v18, %v1185_v17  ;;  %v7950_v31 = vpack.c.bf16 %v1050_v23, %v1048_v22  ;;  %v1190_v38 = vld [vmem:[#allocation7 + $0xaf0] sm:$0xff]  ;;  %v7956_v45 = vpack.c.bf16 %v1059_v40, %v1057_v39  ;;  %v1073_v23 = vld [vmem:[#allocation7 + $0x988] sm:$0xff] }
 0x17a   : > { %7993 = vmatprep.subr.bf16.mxu1 %v7992_v29  ;;  %1152 = vmatprep.mubr.f32.mxu0 %v9403_v16  ;;  %v1189_v29 = vld [vmem:[#allocation7 + $0xae8] sm:$0xff]  ;;  %v8014_v32 = vpack.c.bf16 %v1186_v26, %v1184_v24  ;;  %v7968_v17 = vpack.c.bf16 %v1071_v10, %v1069_v9  ;;  %v1068_v18 = vld [vmem:[#allocation7 + $0x960] sm:$0xff]  ;;  %v1206_v22 = vld [vmem:[#allocation7 + $0xb70] sm:$0xff] }
 0x17b   : > { %1288 = vmatprep.mubr.f32.mxu1 %v9403_v16  ;;  %v8002_v16 = vpack.c.bf16 %v1174_v53, %v1172_v51  ;;  %v1063_v51 = vld [vmem:[#allocation7 + $0x938] sm:$0xff] }
 0x17c   : > { %7931 = vmatpush1.bf16.msra.mxu0 %v7930_v35  ;;  %v1054_v35 = vld [vmem:[#allocation7 + $0x8f0] sm:$0xff]  ;;  %v1199_v53 = vld [vmem:[#allocation7 + $0xb38] sm:$0xff]  ;;  %v7960_v56 = vpack.c.bf16 %v1063_v51, %v1061_v50 }
 0x17d   : > { %7995 = vmatpush1.bf16.msra.mxu1 %v7994_v36  ;;  %7933 = vmatprep.subr.bf16.mxu0 %v7932_v37  ;;  %v1188_v36 = vld [vmem:[#allocation7 + $0xae0] sm:$0xff]  ;;  %v8016_v37 = vpack.c.bf16 %v1191_v30, %v1189_v29  ;;  %v7954_v43 = vpack.c.bf16 %v1054_v35, %v1052_v34  ;;  %v1075_v24 = vld [vmem:[#allocation7 + $0x998] sm:$0xff]  ;;  %v1210_v34 = vld [vmem:[#allocation7 + $0xb90] sm:$0xff] }
 0x17e   : > { %7997 = vmatprep.subr.bf16.mxu1 %v7996_v41  ;;  %v1193_v41 = vld [vmem:[#allocation7 + $0xb08] sm:$0xff]  ;;  %v8018_v44 = vpack.c.bf16 %v1190_v38, %v1188_v36  ;;  %v1211_v26 = vld [vmem:[#allocation7 + $0xb98] sm:$0xff]  ;;  %v7972_v29 = vpack.c.bf16 %v1075_v24, %v1073_v23  ;;  %v1072_v30 = vld [vmem:[#allocation7 + $0x980] sm:$0xff] }
 0x17f   : > { %v1077_v35 = vld [vmem:[#allocation7 + $0x9a8] sm:$0xff]  ;;  %v1079_v36 = vld [vmem:[#allocation7 + $0x9b8] sm:$0xff] }
 0x180   : > { %7935 = vmatpush1.bf16.msra.mxu0 %v7934_v15  ;;  %v1058_v15 = vld [vmem:[#allocation7 + $0x910] sm:$0xff]  ;;  %v1215_v38 = vld [vmem:[#allocation7 + $0xbb8] sm:$0xff] }
 0x181   : > { %7999 = vmatpush1.bf16.msra.mxu1 %v7998_v47  ;;  %7937 = vmatprep.subr.bf16.mxu0 %v7936_v48  ;;  %v1192_v47 = vld [vmem:[#allocation7 + $0xb00] sm:$0xff]  ;;  %v8020_v48 = vpack.c.bf16 %v1195_v42, %v1193_v41  ;;  %v7958_v54 = vpack.c.bf16 %v1058_v15, %v1056_v46  ;;  %v7976_v41 = vpack.c.bf16 %v1079_v36, %v1077_v35  ;;  %v1214_v46 = vld [vmem:[#allocation7 + $0xbb0] sm:$0xff]  ;;  %v1081_v15 = vld [vmem:[#allocation7 + $0x9c8] sm:$0xff] }
 0x182   : > { %8001 = vmatprep.subr.bf16.mxu1 %v8000_v52  ;;  %v1197_v52 = vld [vmem:[#allocation7 + $0xb28] sm:$0xff]  ;;  %v8022_v55 = vpack.c.bf16 %v1194_v49, %v1192_v47  ;;  %v1076_v42 = vld [vmem:[#allocation7 + $0x9a0] sm:$0xff]  ;;  %v1083_v47 = vld [vmem:[#allocation7 + $0x9d8] sm:$0xff] }
 0x183   : > { %v1219_v49 = vld [vmem:[#allocation7 + $0xbd8] sm:$0xff] }
 0x184   : > { %7939 = vmatpush1.bf16.msra.mxu0 %v7938_v58  ;;  %v1062_v58 = vld [vmem:[#allocation7 + $0x930] sm:$0xff]  ;;  %v1443_v35 = vld [vmem:[#allocation7 + $0xe58] sm:$0xff] }
 0x185   : > { %8003 = vmatpush1.bf16.msra.mxu1 %v8002_v16  ;;  %7941 = vmatprep.subr.bf16.mxu0 %v7940_v59  ;;  %v1196_v16 = vld [vmem:[#allocation7 + $0xb20] sm:$0xff]  ;;  %v8024_v59 = vpack.c.bf16 %v1199_v53, %v1197_v52  ;;  %v7962_v1 = vpack.c.bf16 %v1062_v58, %v1060_v57  ;;  %v7980_v52 = vpack.c.bf16 %v1083_v47, %v1081_v15  ;;  %v1218_v57 = vld [vmem:[#allocation7 + $0xbd0] sm:$0xff]  ;;  %v1085_v58 = vld [vmem:[#allocation7 + $0x9e8] sm:$0xff] }
 0x186   : > { %8005 = vmatprep.subr.bf16.mxu1 %v8004_v63  ;;  %v1201_v63 = vld [vmem:[#allocation7 + $0xb48] sm:$0xff]  ;;  %v8026_v2 = vpack.c.bf16 %v1198_v60, %v1196_v16  ;;  %v1080_v53 = vld [vmem:[#allocation7 + $0x9c0] sm:$0xff]  ;;  %v1087_v16 = vld [vmem:[#allocation7 + $0x9f8] sm:$0xff] }
 0x187   : > { %v1223_v60 = vld [vmem:[#allocation7 + $0xbf8] sm:$0xff]  ;;  %v1445_v15 = vld [vmem:[#allocation7 + $0xe68] sm:$0xff] }
 0x188   : > { %7943 = vmatpush1.bf16.msra.mxu0 %v7942_v5  ;;  %v1066_v5 = vld [vmem:[#allocation7 + $0x950] sm:$0xff]  ;;  %v1447_v47 = vld [vmem:[#allocation7 + $0xe78] sm:$0xff] }
 0x189   : > { %8007 = vmatpush1.bf16.msra.mxu1 %v8006_v6  ;;  %7945 = vmatprep.subr.bf16.mxu0 %v7944_v7  ;;  %v1200_v6 = vld [vmem:[#allocation7 + $0xb40] sm:$0xff]  ;;  %v8028_v7 = vpack.c.bf16 %v1203_v0, %v1201_v63  ;;  %v7966_v13 = vpack.c.bf16 %v1066_v5, %v1064_v4  ;;  %v7984_v63 = vpack.c.bf16 %v1087_v16, %v1085_v58  ;;  %v1222_v4 = vld [vmem:[#allocation7 + $0xbf0] sm:$0xff]  ;;  %v1297_v5 = vld [vmem:[#allocation7 + $0xc08] sm:$0xff] }
 0x18a   : > { %8009 = vmatprep.subr.bf16.mxu1 %v8008_v11  ;;  %v1205_v11 = vld [vmem:[#allocation7 + $0xb68] sm:$0xff]  ;;  %v8030_v14 = vpack.c.bf16 %v1202_v8, %v1200_v6  ;;  %v1084_v0 = vld [vmem:[#allocation7 + $0x9e0] sm:$0xff]  ;;  %v1299_v6 = vld [vmem:[#allocation7 + $0xc18] sm:$0xff] }
 0x18b   : > { %v1435_v8 = vld [vmem:[#allocation7 + $0xe18] sm:$0xff]  ;;  %v1449_v58 = vld [vmem:[#allocation7 + $0xe88] sm:$0xff] }
 0x18c   : > { %7947 = vmatpush1.bf16.msra.mxu0 %v7946_v19  ;;  %v1070_v19 = vld [vmem:[#allocation7 + $0x970] sm:$0xff]  ;;  %v1451_v16 = vld [vmem:[#allocation7 + $0xe98] sm:$0xff] }
 0x18d   : > { %8011 = vmatpush1.bf16.msra.mxu1 %v8010_v20  ;;  %7949 = vmatprep.subr.bf16.mxu0 %v7948_v21  ;;  %v1204_v20 = vld [vmem:[#allocation7 + $0xb60] sm:$0xff]  ;;  %v8032_v21 = vpack.c.bf16 %v1207_v12, %v1205_v11  ;;  %v7970_v27 = vpack.c.bf16 %v1070_v19, %v1068_v18  ;;  %v8052_v11 = vpack.c.bf16 %v1299_v6, %v1297_v5  ;;  %v1434_v18 = vld [vmem:[#allocation7 + $0xe10] sm:$0xff]  ;;  %v1301_v19 = vld [vmem:[#allocation7 + $0xc28] sm:$0xff] }
 0x18e   : > { %8013 = vmatprep.subr.bf16.mxu1 %v8012_v25  ;;  %v1209_v25 = vld [vmem:[#allocation7 + $0xb88] sm:$0xff]  ;;  %v8034_v28 = vpack.c.bf16 %v1206_v22, %v1204_v20  ;;  %v1296_v12 = vld [vmem:[#allocation7 + $0xc00] sm:$0xff]  ;;  %v1303_v20 = vld [vmem:[#allocation7 + $0xc38] sm:$0xff] }
 0x18f   : > { %v1439_v22 = vld [vmem:[#allocation7 + $0xe38] sm:$0xff]  ;;  %v1453_v5 = vld [vmem:[#allocation7 + $0xea8] sm:$0xff] }
 0x190   : > { %7951 = vmatpush1.bf16.msra.mxu0 %v7950_v31  ;;  %v1074_v31 = vld [vmem:[#allocation7 + $0x990] sm:$0xff]  ;;  %v1455_v6 = vld [vmem:[#allocation7 + $0xeb8] sm:$0xff] }
 0x191   : > { %8015 = vmatpush1.bf16.msra.mxu1 %v8014_v32  ;;  %7953 = vmatprep.subr.bf16.mxu0 %v7952_v33  ;;  %v1208_v32 = vld [vmem:[#allocation7 + $0xb80] sm:$0xff]  ;;  %v8036_v33 = vpack.c.bf16 %v1211_v26, %v1209_v25  ;;  %v7974_v39 = vpack.c.bf16 %v1074_v31, %v1072_v30  ;;  %v8056_v25 = vpack.c.bf16 %v1303_v20, %v1301_v19  ;;  %v1438_v30 = vld [vmem:[#allocation7 + $0xe30] sm:$0xff]  ;;  %v1305_v31 = vld [vmem:[#allocation7 + $0xc48] sm:$0xff] }
 0x192   : > { %8017 = vmatprep.subr.bf16.mxu1 %v8016_v37  ;;  %v1213_v37 = vld [vmem:[#allocation7 + $0xba8] sm:$0xff]  ;;  %v8038_v40 = vpack.c.bf16 %v1210_v34, %v1208_v32  ;;  %v1300_v26 = vld [vmem:[#allocation7 + $0xc20] sm:$0xff]  ;;  %v1307_v32 = vld [vmem:[#allocation7 + $0xc58] sm:$0xff] }
 0x193   : > { %v1441_v34 = vld [vmem:[#allocation7 + $0xe48] sm:$0xff]  ;;  %v1459_v20 = vld [vmem:[#allocation7 + $0xed8] sm:$0xff] }
 0x194   : > { %7955 = vmatpush1.bf16.msra.mxu0 %v7954_v43  ;;  %v1078_v43 = vld [vmem:[#allocation7 + $0x9b0] sm:$0xff]  ;;  %v1457_v19 = vld [vmem:[#allocation7 + $0xec8] sm:$0xff] }
 0x195   : > { %8019 = vmatpush1.bf16.msra.mxu1 %v8018_v44  ;;  %7957 = vmatprep.subr.bf16.mxu0 %v7956_v45  ;;  %v1212_v44 = vld [vmem:[#allocation7 + $0xba0] sm:$0xff]  ;;  %v8040_v45 = vpack.c.bf16 %v1215_v38, %v1213_v37  ;;  %v7978_v50 = vpack.c.bf16 %v1078_v43, %v1076_v42  ;;  %v8060_v38 = vpack.c.bf16 %v1307_v32, %v1305_v31  ;;  %v1442_v43 = vld [vmem:[#allocation7 + $0xe50] sm:$0xff]  ;;  %v1461_v31 = vld [vmem:[#allocation7 + $0xee8] sm:$0xff] }
 0x196   : > { %8021 = vmatprep.subr.bf16.mxu1 %v8020_v48  ;;  %v1217_v48 = vld [vmem:[#allocation7 + $0xbc8] sm:$0xff]  ;;  %v8042_v51 = vpack.c.bf16 %v1214_v46, %v1212_v44  ;;  %v8124_v42 = vpack.c.bf16 %v1443_v35, %v1441_v34  ;;  %v1463_v32 = vld [vmem:[#allocation7 + $0xef8] sm:$0xff] }
 0x197   : > { %v1309_v44 = vld [vmem:[#allocation7 + $0xc68] sm:$0xff] }
 0x198   : > { %7959 = vmatpush1.bf16.msra.mxu0 %v7958_v54  ;;  %v1082_v54 = vld [vmem:[#allocation7 + $0x9d0] sm:$0xff]  ;;  %v9424_v46 = vld [vmem:[%s9380_s17 + $0x8] sm:$0xff] }
 0x199   : > { %8023 = vmatpush1.bf16.msra.mxu1 %v8022_v55  ;;  %7961 = vmatprep.subr.bf16.mxu0 %v7960_v56  ;;  %v1216_v55 = vld [vmem:[#allocation7 + $0xbc0] sm:$0xff]  ;;  %v8044_v56 = vpack.c.bf16 %v1219_v49, %v1217_v48  ;;  %v7982_v61 = vpack.c.bf16 %v1082_v54, %v1080_v53  ;;  %v8128_v54 = vpack.c.bf16 %v1447_v47, %v1445_v15 }
 0x19a   : > { %8025 = vmatprep.subr.bf16.mxu1 %v8024_v59  ;;  %v1221_v59 = vld [vmem:[#allocation7 + $0xbe8] sm:$0xff]  ;;  %v8046_v62 = vpack.c.bf16 %v1218_v57, %v1216_v55  ;;  %v1444_v53 = vld [vmem:[#allocation7 + $0xe60] sm:$0xff]  ;;  %v1446_v55 = vld [vmem:[#allocation7 + $0xe70] sm:$0xff] }
 0x19b   : > { %v1315_v57 = vld [vmem:[#allocation7 + $0xc98] sm:$0xff] }
 0x19c   : > { %7963 = vmatpush1.bf16.msra.mxu0 %v7962_v1  ;;  %v1086_v1 = vld [vmem:[#allocation7 + $0x9f0] sm:$0xff] }
 0x19d   : > { %8027 = vmatpush1.bf16.msra.mxu1 %v8026_v2  ;;  %7965 = vmatprep.subr.bf16.mxu0 %v7964_v3  ;;  %v1220_v2 = vld [vmem:[#allocation7 + $0xbe0] sm:$0xff]  ;;  %v8048_v3 = vpack.c.bf16 %v1223_v60, %v1221_v59  ;;  %v7986_v9 = vpack.c.bf16 %v1086_v1, %v1084_v0  ;;  %v8130_v60 = vpack.c.bf16 %v1446_v55, %v1444_v53  ;;  %v1466_v53 = vld [vmem:[#allocation7 + $0xf10] sm:$0xff]  ;;  %v1335_v55 = vld [vmem:[#allocation7 + $0xd38] sm:$0xff] }
 0x19e   : > { %8029 = vmatprep.subr.bf16.mxu1 %v8028_v7  ;;  %v1433_v7 = vld [vmem:[#allocation7 + $0xe08] sm:$0xff]  ;;  %v8050_v10 = vpack.c.bf16 %v1222_v4, %v1220_v2  ;;  %v1448_v0 = vld [vmem:[#allocation7 + $0xe80] sm:$0xff]  ;;  %v8132_v1 = vpack.c.bf16 %v1451_v16, %v1449_v58  ;;  %v1450_v2 = vld [vmem:[#allocation7 + $0xe90] sm:$0xff] }
 0x19f   : > { %v1319_v4 = vld [vmem:[#allocation7 + $0xcb8] sm:$0xff] }
 0x1a0   : > { %7967 = vmatpush1.bf16.msra.mxu0 %v7966_v13  ;;  %v1298_v13 = vld [vmem:[#allocation7 + $0xc10] sm:$0xff] }
 0x1a1   : > { %8031 = vmatpush1.bf16.msra.mxu1 %v8030_v14  ;;  %7969 = vmatprep.subr.bf16.mxu0 %v7968_v17  ;;  %v1432_v14 = vld [vmem:[#allocation7 + $0xe00] sm:$0xff]  ;;  %v8116_v17 = vpack.c.bf16 %v1435_v8, %v1433_v7  ;;  %v8054_v23 = vpack.c.bf16 %v1298_v13, %v1296_v12  ;;  %v8134_v8 = vpack.c.bf16 %v1450_v2, %v1448_v0  ;;  %v1470_v0 = vld [vmem:[#allocation7 + $0xf30] sm:$0xff]  ;;  %v1339_v2 = vld [vmem:[#allocation7 + $0xd58] sm:$0xff] }
 0x1a2   : > { %8033 = vmatprep.subr.bf16.mxu1 %v8032_v21  ;;  %v1437_v21 = vld [vmem:[#allocation7 + $0xe28] sm:$0xff]  ;;  %v8118_v24 = vpack.c.bf16 %v1434_v18, %v1432_v14  ;;  %v1452_v12 = vld [vmem:[#allocation7 + $0xea0] sm:$0xff]  ;;  %v8136_v13 = vpack.c.bf16 %v1455_v6, %v1453_v5  ;;  %v1454_v14 = vld [vmem:[#allocation7 + $0xeb0] sm:$0xff] }
 0x1a3   : > { %v1323_v18 = vld [vmem:[#allocation7 + $0xcd8] sm:$0xff] }
 0x1a4   : > { %7971 = vmatpush1.bf16.msra.mxu0 %v7970_v27  ;;  %v1302_v27 = vld [vmem:[#allocation7 + $0xc30] sm:$0xff] }
 0x1a5   : > { %8035 = vmatpush1.bf16.msra.mxu1 %v8034_v28  ;;  %7973 = vmatprep.subr.bf16.mxu0 %v7972_v29  ;;  %v1436_v28 = vld [vmem:[#allocation7 + $0xe20] sm:$0xff]  ;;  %v8120_v29 = vpack.c.bf16 %v1439_v22, %v1437_v21  ;;  %v8058_v36 = vpack.c.bf16 %v1302_v27, %v1300_v26  ;;  %v8138_v22 = vpack.c.bf16 %v1454_v14, %v1452_v12  ;;  %v1474_v12 = vld [vmem:[#allocation7 + $0xf50] sm:$0xff]  ;;  %v1343_v14 = vld [vmem:[#allocation7 + $0xd78] sm:$0xff] }
 0x1a6   : > { %8037 = vmatprep.subr.bf16.mxu1 %v8036_v33  ;;  %v9419_v33 = vld [vmem:[%s9380_s17] sm:$0xff]  ;;  %v8122_v37 = vpack.c.bf16 %v1438_v30, %v1436_v28  ;;  %v8140_v27 = vpack.c.bf16 %v1459_v20, %v1457_v19  ;;  %v1458_v28 = vld [vmem:[#allocation7 + $0xed0] sm:$0xff] }
 0x1a7   : > { %v1456_v26 = vld [vmem:[#allocation7 + $0xec0] sm:$0xff]  ;;  %v1327_v30 = vld [vmem:[#allocation7 + $0xcf8] sm:$0xff] }
 0x1a8   : > { %7975 = vmatpush1.bf16.msra.mxu0 %v7974_v39  ;;  %v1304_v39 = vld [vmem:[#allocation7 + $0xc40] sm:$0xff]  ;;  %v8142_v35 = vpack.c.bf16 %v1458_v28, %v1456_v26  ;;  %v1478_v26 = vld [vmem:[#allocation7 + $0xf70] sm:$0xff]  ;;  %v1347_v28 = vld [vmem:[#allocation7 + $0xd98] sm:$0xff] }
 0x1a9   : > { %8039 = vmatpush1.bf16.msra.mxu1 %v8038_v40  ;;  %7977 = vmatprep.subr.bf16.mxu0 %v7976_v41  ;;  %v1306_v40 = vld [vmem:[#allocation7 + $0xc50] sm:$0xff]  ;;  %v1440_v41 = vld [vmem:[#allocation7 + $0xe40] sm:$0xff] }
 0x1aa   : > { %8041 = vmatprep.subr.bf16.mxu1 %v8040_v45  ;;  %v1311_v45 = vld [vmem:[#allocation7 + $0xc78] sm:$0xff]  ;;  %v8062_v48 = vpack.c.bf16 %v1306_v40, %v1304_v39  ;;  %v8126_v49 = vpack.c.bf16 %v1442_v43, %v1440_v41  ;;  %v1460_v39 = vld [vmem:[#allocation7 + $0xee0] sm:$0xff]  ;;  %v8144_v40 = vpack.c.bf16 %v1463_v32, %v1461_v31  ;;  %v1462_v41 = vld [vmem:[#allocation7 + $0xef0] sm:$0xff] }
 0x1ab   : > { %v1331_v43 = vld [vmem:[#allocation7 + $0xd18] sm:$0xff]  ;;  %v8146_v47 = vpack.c.bf16 %v1462_v41, %v1460_v39  ;;  %v1482_v39 = vld [vmem:[#allocation7 + $0xf90] sm:$0xff] }
 0x1ac   : > { %7979 = vmatpush1.bf16.msra.mxu0 %v7978_v50  ;;  %v8064_v50 = vpack.c.bf16 %v1311_v45, %v1309_v44  ;;  %v1465_v44 = vld [vmem:[#allocation7 + $0xf08] sm:$0xff]  ;;  %v1467_v45 = vld [vmem:[#allocation7 + $0xf18] sm:$0xff] }
 0x1ad   : > { %8043 = vmatpush1.bf16.msra.mxu1 %v8042_v51  ;;  %7981 = vmatprep.subr.bf16.mxu0 %v7980_v52  ;;  %v1308_v51 = vld [vmem:[#allocation7 + $0xc60] sm:$0xff]  ;;  %v1310_v52 = vld [vmem:[#allocation7 + $0xc70] sm:$0xff]  ;;  %v1351_v41 = vld [vmem:[#allocation7 + $0xdb8] sm:$0xff] }
 0x1ae   : > { %8045 = vmatprep.subr.bf16.mxu1 %v8044_v56  ;;  %v1313_v56 = vld [vmem:[#allocation7 + $0xc88] sm:$0xff]  ;;  %v8066_v59 = vpack.c.bf16 %v1310_v52, %v1308_v51  ;;  %v1464_v51 = vld [vmem:[#allocation7 + $0xf00] sm:$0xff]  ;;  %v8148_v52 = vpack.c.bf16 %v1467_v45, %v1465_v44 }
 0x1af   : > { %v8150_v16 = vpack.c.bf16 %v1466_v53, %v1464_v51  ;;  %v1486_v51 = vld [vmem:[#allocation7 + $0xfb0] sm:$0xff]  ;;  %v1355_v53 = vld [vmem:[#allocation7 + $0xdd8] sm:$0xff] }
 0x1b0   : > { %7983 = vmatpush1.bf16.msra.mxu0 %v7982_v61  ;;  %v8068_v61 = vpack.c.bf16 %v1315_v57, %v1313_v56  ;;  %v1469_v56 = vld [vmem:[#allocation7 + $0xf28] sm:$0xff]  ;;  %v1471_v57 = vld [vmem:[#allocation7 + $0xf38] sm:$0xff] }
 0x1b1   : > { %8047 = vmatpush1.bf16.msra.mxu1 %v8046_v62  ;;  %7985 = vmatprep.subr.bf16.mxu0 %v7984_v63  ;;  %v1312_v62 = vld [vmem:[#allocation7 + $0xc80] sm:$0xff]  ;;  %v1314_v63 = vld [vmem:[#allocation7 + $0xc90] sm:$0xff] }
 0x1b2   : > { %8049 = vmatprep.subr.bf16.mxu1 %v8048_v3  ;;  %v1317_v3 = vld [vmem:[#allocation7 + $0xca8] sm:$0xff]  ;;  %v8070_v7 = vpack.c.bf16 %v1314_v63, %v1312_v62  ;;  %v1468_v62 = vld [vmem:[#allocation7 + $0xf20] sm:$0xff]  ;;  %v8152_v63 = vpack.c.bf16 %v1471_v57, %v1469_v56 }
 0x1b3   : > { %v8154_v6 = vpack.c.bf16 %v1470_v0, %v1468_v62  ;;  %v1490_v62 = vld [vmem:[#allocation7 + $0xfd0] sm:$0xff]  ;;  %v1359_v0 = vld [vmem:[#allocation7 + $0xdf8] sm:$0xff] }
 0x1b4   : > { %7987 = vmatpush1.bf16.msra.mxu0 %v7986_v9  ;;  %v8072_v9 = vpack.c.bf16 %v1319_v4, %v1317_v3  ;;  %v1473_v3 = vld [vmem:[#allocation7 + $0xf48] sm:$0xff]  ;;  %v1475_v4 = vld [vmem:[#allocation7 + $0xf58] sm:$0xff] }
 0x1b5   : > { %8051 = vmatpush1.bf16.msra.mxu1 %v8050_v10  ;;  %8053 = vmatprep.subr.bf16.mxu0 %v8052_v11  ;;  %v1316_v10 = vld [vmem:[#allocation7 + $0xca0] sm:$0xff]  ;;  %v1318_v11 = vld [vmem:[#allocation7 + $0xcb0] sm:$0xff] }
 0x1b6   : > { %8117 = vmatprep.subr.bf16.mxu1 %v8116_v17  ;;  %v1321_v17 = vld [vmem:[#allocation7 + $0xcc8] sm:$0xff]  ;;  %v8074_v21 = vpack.c.bf16 %v1318_v11, %v1316_v10  ;;  %v1472_v10 = vld [vmem:[#allocation7 + $0xf40] sm:$0xff]  ;;  %v8156_v11 = vpack.c.bf16 %v1475_v4, %v1473_v3 }
 0x1b7   : > { %1153 = vmatmul.mubr.f32.vlgmr.msra.gmra.mrb[4].mxu0 %v9419_v33  ;;  %v8158_v20 = vpack.c.bf16 %v1474_v12, %v1472_v10  ;;  %v1494_v10 = vld [vmem:[#allocation7 + $0xff0] sm:$0xff]  ;;  %v1571_v12 = vld [vmem:[#allocation7 + $0x1018] sm:$0xff] }
 0x1b8   : > { %1289 = vmatmul.mubr.f32.vlgmr.msra.gmra.mrb[4].mxu1 %v9419_v33  ;;  %8055 = vmatpush1.bf16.msra.mxu0 %v8054_v23  ;;  %v8076_v23 = vpack.c.bf16 %v1323_v18, %v1321_v17  ;;  %v1477_v17 = vld [vmem:[#allocation7 + $0xf68] sm:$0xff]  ;;  %v1479_v18 = vld [vmem:[#allocation7 + $0xf78] sm:$0xff] }
 0x1b9   : > { %8119 = vmatpush1.bf16.msra.mxu1 %v8118_v24  ;;  %8057 = vmatprep.subr.bf16.mxu0 %v8056_v25  ;;  %v1320_v24 = vld [vmem:[#allocation7 + $0xcc0] sm:$0xff]  ;;  %v1322_v25 = vld [vmem:[#allocation7 + $0xcd0] sm:$0xff] }
 0x1ba   : > { %8121 = vmatprep.subr.bf16.mxu1 %v8120_v29  ;;  %1424 = vmatprep.mubr.f32.mxu0 %v9424_v46  ;;  %v1325_v29 = vld [vmem:[#allocation7 + $0xce8] sm:$0xff]  ;;  %v8078_v34 = vpack.c.bf16 %v1322_v25, %v1320_v24  ;;  %v1476_v24 = vld [vmem:[#allocation7 + $0xf60] sm:$0xff]  ;;  %v8160_v25 = vpack.c.bf16 %v1479_v18, %v1477_v17 }
 0x1bb   : > { %1560 = vmatprep.mubr.f32.mxu1 %v9424_v46  ;;  %v8162_v32 = vpack.c.bf16 %v1478_v26, %v1476_v24  ;;  %v1568_v18 = vld [vmem:[#allocation7 + $0x1000] sm:$0xff]  ;;  %v1577_v26 = vld [vmem:[#allocation7 + $0x1048] sm:$0xff] }
 0x1bc   : > { %8059 = vmatpush1.bf16.msra.mxu0 %v8058_v36  ;;  %v8080_v36 = vpack.c.bf16 %v1327_v30, %v1325_v29  ;;  %v1481_v29 = vld [vmem:[#allocation7 + $0xf88] sm:$0xff]  ;;  %v1483_v30 = vld [vmem:[#allocation7 + $0xf98] sm:$0xff]  ;;  %v1572_v24 = vld [vmem:[#allocation7 + $0x1020] sm:$0xff] }
 0x1bd   : > { %8123 = vmatpush1.bf16.msra.mxu1 %v8122_v37  ;;  %8061 = vmatprep.subr.bf16.mxu0 %v8060_v38  ;;  %v1324_v37 = vld [vmem:[#allocation7 + $0xce0] sm:$0xff]  ;;  %v1326_v38 = vld [vmem:[#allocation7 + $0xcf0] sm:$0xff] }
 0x1be   : > { %8125 = vmatprep.subr.bf16.mxu1 %v8124_v42  ;;  %v1329_v42 = vld [vmem:[#allocation7 + $0xd08] sm:$0xff]  ;;  %v8082_v15 = vpack.c.bf16 %v1326_v38, %v1324_v37  ;;  %v1480_v37 = vld [vmem:[#allocation7 + $0xf80] sm:$0xff]  ;;  %v8164_v38 = vpack.c.bf16 %v1483_v30, %v1481_v29 }
 0x1bf   : > { %v8166_v45 = vpack.c.bf16 %v1482_v39, %v1480_v37  ;;  %v1576_v30 = vld [vmem:[#allocation7 + $0x1040] sm:$0xff]  ;;  %v1585_v39 = vld [vmem:[#allocation7 + $0x1088] sm:$0xff] }
 0x1c0   : > { %8063 = vmatpush1.bf16.msra.mxu0 %v8062_v48  ;;  %v8084_v48 = vpack.c.bf16 %v1331_v43, %v1329_v42  ;;  %v1485_v42 = vld [vmem:[#allocation7 + $0xfa8] sm:$0xff]  ;;  %v1487_v43 = vld [vmem:[#allocation7 + $0xfb8] sm:$0xff]  ;;  %v1580_v37 = vld [vmem:[#allocation7 + $0x1060] sm:$0xff] }
 0x1c1   : > { %8127 = vmatpush1.bf16.msra.mxu1 %v8126_v49  ;;  %8065 = vmatprep.subr.bf16.mxu0 %v8064_v50  ;;  %v1328_v49 = vld [vmem:[#allocation7 + $0xd00] sm:$0xff]  ;;  %v1330_v50 = vld [vmem:[#allocation7 + $0xd10] sm:$0xff] }
 0x1c2   : > { %8129 = vmatprep.subr.bf16.mxu1 %v8128_v54  ;;  %v1333_v54 = vld [vmem:[#allocation7 + $0xd28] sm:$0xff]  ;;  %v8086_v58 = vpack.c.bf16 %v1330_v50, %v1328_v49  ;;  %v1484_v49 = vld [vmem:[#allocation7 + $0xfa0] sm:$0xff]  ;;  %v8168_v50 = vpack.c.bf16 %v1487_v43, %v1485_v42 }
 0x1c3   : > { %v8170_v57 = vpack.c.bf16 %v1486_v51, %v1484_v49  ;;  %v1584_v43 = vld [vmem:[#allocation7 + $0x1080] sm:$0xff]  ;;  %v1590_v49 = vld [vmem:[#allocation7 + $0x10b0] sm:$0xff]  ;;  %v1595_v51 = vld [vmem:[#allocation7 + $0x10d8] sm:$0xff] }
 0x1c4   : > { %8067 = vmatpush1.bf16.msra.mxu0 %v8066_v59  ;;  %v8088_v59 = vpack.c.bf16 %v1335_v55, %v1333_v54  ;;  %v1489_v54 = vld [vmem:[#allocation7 + $0xfc8] sm:$0xff]  ;;  %v1491_v55 = vld [vmem:[#allocation7 + $0xfd8] sm:$0xff] }
 0x1c5   : > { %8131 = vmatpush1.bf16.msra.mxu1 %v8130_v60  ;;  %8069 = vmatprep.subr.bf16.mxu0 %v8068_v61  ;;  %v1332_v60 = vld [vmem:[#allocation7 + $0xd20] sm:$0xff]  ;;  %v1334_v61 = vld [vmem:[#allocation7 + $0xd30] sm:$0xff] }
 0x1c6   : > { %8133 = vmatprep.subr.bf16.mxu1 %v8132_v1  ;;  %v1337_v1 = vld [vmem:[#allocation7 + $0xd48] sm:$0xff]  ;;  %v8090_v5 = vpack.c.bf16 %v1334_v61, %v1332_v60  ;;  %v1488_v60 = vld [vmem:[#allocation7 + $0xfc0] sm:$0xff]  ;;  %v8172_v61 = vpack.c.bf16 %v1491_v55, %v1489_v54  ;;  %v1594_v55 = vld [vmem:[#allocation7 + $0x10d0] sm:$0xff] }
 0x1c7   : > { %v8174_v4 = vpack.c.bf16 %v1490_v62, %v1488_v60  ;;  %v1592_v54 = vld [vmem:[#allocation7 + $0x10c0] sm:$0xff] }
 0x1c8   : > { %8071 = vmatpush1.bf16.msra.mxu0 %v8070_v7  ;;  %v8092_v7 = vpack.c.bf16 %v1339_v2, %v1337_v1  ;;  %v1493_v1 = vld [vmem:[#allocation7 + $0xfe8] sm:$0xff]  ;;  %v1495_v2 = vld [vmem:[#allocation7 + $0xff8] sm:$0xff]  ;;  %v8206_v62 = vpack.c.bf16 %v1594_v55, %v1592_v54 }
 0x1c9   : > { %8135 = vmatpush1.bf16.msra.mxu1 %v8134_v8  ;;  %8073 = vmatprep.subr.bf16.mxu0 %v8072_v9  ;;  %v1336_v8 = vld [vmem:[#allocation7 + $0xd40] sm:$0xff]  ;;  %v1338_v9 = vld [vmem:[#allocation7 + $0xd50] sm:$0xff] }
 0x1ca   : > { %8137 = vmatprep.subr.bf16.mxu1 %v8136_v13  ;;  %v1341_v13 = vld [vmem:[#allocation7 + $0xd68] sm:$0xff]  ;;  %v8094_v19 = vpack.c.bf16 %v1338_v9, %v1336_v8  ;;  %v1492_v8 = vld [vmem:[#allocation7 + $0xfe0] sm:$0xff]  ;;  %v8176_v9 = vpack.c.bf16 %v1495_v2, %v1493_v1  ;;  %v1598_v2 = vld [vmem:[#allocation7 + $0x10f0] sm:$0xff] }
 0x1cb   : > { %v1596_v1 = vld [vmem:[#allocation7 + $0x10e0] sm:$0xff] }
 0x1cc   : > { %8075 = vmatpush1.bf16.msra.mxu0 %v8074_v21  ;;  %v8096_v21 = vpack.c.bf16 %v1343_v14, %v1341_v13  ;;  %v8178_v14 = vpack.c.bf16 %v1494_v10, %v1492_v8  ;;  %v1602_v8 = vld [vmem:[#allocation7 + $0x1110] sm:$0xff]  ;;  %v1607_v10 = vld [vmem:[#allocation7 + $0x1138] sm:$0xff] }
 0x1cd   : > { %8139 = vmatpush1.bf16.msra.mxu1 %v8138_v22  ;;  %8077 = vmatprep.subr.bf16.mxu0 %v8076_v23  ;;  %v1340_v22 = vld [vmem:[#allocation7 + $0xd60] sm:$0xff]  ;;  %v1342_v23 = vld [vmem:[#allocation7 + $0xd70] sm:$0xff] }
 0x1ce   : > { %8141 = vmatprep.subr.bf16.mxu1 %v8140_v27  ;;  %v1345_v27 = vld [vmem:[#allocation7 + $0xd88] sm:$0xff]  ;;  %v8098_v31 = vpack.c.bf16 %v1342_v23, %v1340_v22 }
 0x1d0   : > { %8079 = vmatpush1.bf16.msra.mxu0 %v8078_v34  ;;  %v8100_v34 = vpack.c.bf16 %v1347_v28, %v1345_v27  ;;  %v1579_v27 = vld [vmem:[#allocation7 + $0x1058] sm:$0xff] }
 0x1d1   : > { %8143 = vmatpush1.bf16.msra.mxu1 %v8142_v35  ;;  %8081 = vmatprep.subr.bf16.mxu0 %v8080_v36  ;;  %v1344_v35 = vld [vmem:[#allocation7 + $0xd80] sm:$0xff]  ;;  %v1346_v36 = vld [vmem:[#allocation7 + $0xd90] sm:$0xff]  ;;  %v8188_v29 = vpack.c.bf16 %v1579_v27, %v1577_v26 }
 0x1d2   : > { %8145 = vmatprep.subr.bf16.mxu1 %v8144_v40  ;;  %v1349_v40 = vld [vmem:[#allocation7 + $0xda8] sm:$0xff]  ;;  %v8102_v44 = vpack.c.bf16 %v1346_v36, %v1344_v35  ;;  %v1612_v27 = vld [vmem:[#allocation7 + $0x1160] sm:$0xff] }
 0x1d4   : > { %8083 = vmatpush1.bf16.msra.mxu0 %v8082_v15  ;;  %v8104_v15 = vpack.c.bf16 %v1351_v41, %v1349_v40  ;;  %v1587_v40 = vld [vmem:[#allocation7 + $0x1098] sm:$0xff] }
 0x1d5   : > { %8147 = vmatpush1.bf16.msra.mxu1 %v8146_v47  ;;  %8085 = vmatprep.subr.bf16.mxu0 %v8084_v48  ;;  %v1348_v47 = vld [vmem:[#allocation7 + $0xda0] sm:$0xff]  ;;  %v1350_v48 = vld [vmem:[#allocation7 + $0xdb0] sm:$0xff]  ;;  %v8196_v42 = vpack.c.bf16 %v1587_v40, %v1585_v39 }
 0x1d6   : > { %8149 = vmatprep.subr.bf16.mxu1 %v8148_v52  ;;  %v1353_v52 = vld [vmem:[#allocation7 + $0xdc8] sm:$0xff]  ;;  %v8106_v56 = vpack.c.bf16 %v1350_v48, %v1348_v47  ;;  %v1588_v48 = vld [vmem:[#allocation7 + $0x10a0] sm:$0xff] }
 0x1d7   : > { %v1620_v40 = vld [vmem:[#allocation7 + $0x11a0] sm:$0xff] }
 0x1d8   : > { %8087 = vmatpush1.bf16.msra.mxu0 %v8086_v58  ;;  %v8108_v58 = vpack.c.bf16 %v1355_v53, %v1353_v52  ;;  %v8202_v52 = vpack.c.bf16 %v1590_v49, %v1588_v48  ;;  %v1631_v48 = vld [vmem:[#allocation7 + $0x11f8] sm:$0xff] }
 0x1d9   : > { %8151 = vmatpush1.bf16.msra.mxu1 %v8150_v16  ;;  %8089 = vmatprep.subr.bf16.mxu0 %v8088_v59  ;;  %v1352_v16 = vld [vmem:[#allocation7 + $0xdc0] sm:$0xff]  ;;  %v1354_v59 = vld [vmem:[#allocation7 + $0xdd0] sm:$0xff] }
 0x1da   : > { %8153 = vmatprep.subr.bf16.mxu1 %v8152_v63  ;;  %v1357_v63 = vld [vmem:[#allocation7 + $0xde8] sm:$0xff]  ;;  %v8110_v3 = vpack.c.bf16 %v1354_v59, %v1352_v16 }
 0x1dc   : > { %8091 = vmatpush1.bf16.msra.mxu0 %v8090_v5  ;;  %v8112_v5 = vpack.c.bf16 %v1359_v0, %v1357_v63 }
 0x1dd   : > { %8155 = vmatpush1.bf16.msra.mxu1 %v8154_v6  ;;  %8093 = vmatprep.subr.bf16.mxu0 %v8092_v7  ;;  %v1356_v6 = vld [vmem:[#allocation7 + $0xde0] sm:$0xff]  ;;  %v1358_v7 = vld [vmem:[#allocation7 + $0xdf0] sm:$0xff] }
 0x1de   : > { %8157 = vmatprep.subr.bf16.mxu1 %v8156_v11  ;;  %v1569_v11 = vld [vmem:[#allocation7 + $0x1008] sm:$0xff]  ;;  %v8114_v13 = vpack.c.bf16 %v1358_v7, %v1356_v6  ;;  %v1600_v7 = vld [vmem:[#allocation7 + $0x1100] sm:$0xff] }
 0x1df   : > { %v8180_v17 = vpack.c.bf16 %v1571_v12, %v1569_v11  ;;  %v8214_v11 = vpack.c.bf16 %v1602_v8, %v1600_v7  ;;  %v1794_v8 = vld [vmem:[#allocation8 + $0x20] sm:$0xff] }
 0x1e0   : > { %8095 = vmatpush1.bf16.msra.mxu0 %v8094_v19  ;;  %v1570_v19 = vld [vmem:[#allocation7 + $0x1010] sm:$0xff] }
 0x1e1   : > { %8159 = vmatpush1.bf16.msra.mxu1 %v8158_v20  ;;  %8097 = vmatprep.subr.bf16.mxu0 %v8096_v21  ;;  %v1573_v20 = vld [vmem:[#allocation7 + $0x1028] sm:$0xff]  ;;  %v1575_v21 = vld [vmem:[#allocation7 + $0x1038] sm:$0xff]  ;;  %v8182_v22 = vpack.c.bf16 %v1570_v19, %v1568_v18 }
 0x1e2   : > { %8161 = vmatprep.subr.bf16.mxu1 %v8160_v25  ;;  %v8184_v23 = vpack.c.bf16 %v1575_v21, %v1573_v20  ;;  %v1574_v25 = vld [vmem:[#allocation7 + $0x1030] sm:$0xff]  ;;  %v1611_v18 = vld [vmem:[#allocation7 + $0x1158] sm:$0xff]  ;;  %v1608_v21 = vld [vmem:[#allocation7 + $0x1140] sm:$0xff] }
 0x1e3   : > { %v8186_v28 = vpack.c.bf16 %v1574_v25, %v1572_v24  ;;  %v1615_v24 = vld [vmem:[#allocation7 + $0x1178] sm:$0xff] }
 0x1e4   : > { %8099 = vmatpush1.bf16.msra.mxu0 %v8098_v31  ;;  %v1578_v31 = vld [vmem:[#allocation7 + $0x1050] sm:$0xff] }
 0x1e5   : > { %8163 = vmatpush1.bf16.msra.mxu1 %v8162_v32  ;;  %8101 = vmatprep.subr.bf16.mxu0 %v8100_v34  ;;  %v1581_v32 = vld [vmem:[#allocation7 + $0x1068] sm:$0xff]  ;;  %v1583_v34 = vld [vmem:[#allocation7 + $0x1078] sm:$0xff]  ;;  %v8190_v35 = vpack.c.bf16 %v1578_v31, %v1576_v30 }
 0x1e6   : > { %8165 = vmatprep.subr.bf16.mxu1 %v8164_v38  ;;  %v8192_v36 = vpack.c.bf16 %v1583_v34, %v1581_v32  ;;  %v1582_v38 = vld [vmem:[#allocation7 + $0x1070] sm:$0xff]  ;;  %v1619_v30 = vld [vmem:[#allocation7 + $0x1198] sm:$0xff]  ;;  %v1616_v34 = vld [vmem:[#allocation7 + $0x1180] sm:$0xff] }
 0x1e7   : > { %v8194_v41 = vpack.c.bf16 %v1582_v38, %v1580_v37  ;;  %v1623_v37 = vld [vmem:[#allocation7 + $0x11b8] sm:$0xff] }
 0x1e8   : > { %8103 = vmatpush1.bf16.msra.mxu0 %v8102_v44  ;;  %v1586_v44 = vld [vmem:[#allocation7 + $0x1090] sm:$0xff] }
 0x1e9   : > { %8167 = vmatpush1.bf16.msra.mxu1 %v8166_v45  ;;  %8105 = vmatprep.subr.bf16.mxu0 %v8104_v15  ;;  %v1589_v45 = vld [vmem:[#allocation7 + $0x10a8] sm:$0xff]  ;;  %v1591_v15 = vld [vmem:[#allocation7 + $0x10b8] sm:$0xff] }
 0x1ea   : > { %8169 = vmatprep.subr.bf16.mxu1 %v8168_v50  ;;  %v8200_v47 = vpack.c.bf16 %v1591_v15, %v1589_v45  ;;  %v1593_v50 = vld [vmem:[#allocation7 + $0x10c8] sm:$0xff]  ;;  %v1624_v15 = vld [vmem:[#allocation7 + $0x11c0] sm:$0xff] }
 0x1eb   : > { %v8204_v53 = vpack.c.bf16 %v1595_v51, %v1593_v50  ;;  %v1628_v51 = vld [vmem:[#allocation7 + $0x11e0] sm:$0xff] }
 0x1ec   : > { %8107 = vmatpush1.bf16.msra.mxu0 %v8106_v56 }
 0x1ed   : > { %8171 = vmatpush1.bf16.msra.mxu1 %v8170_v57  ;;  %8109 = vmatprep.subr.bf16.mxu0 %v8108_v58  ;;  %v1597_v57 = vld [vmem:[#allocation7 + $0x10e8] sm:$0xff]  ;;  %v1599_v58 = vld [vmem:[#allocation7 + $0x10f8] sm:$0xff] }
 0x1ee   : > { %8173 = vmatprep.subr.bf16.mxu1 %v8172_v61  ;;  %v8208_v0 = vpack.c.bf16 %v1599_v58, %v1597_v57 }
 0x1f0   : > { %8111 = vmatpush1.bf16.msra.mxu0 %v8110_v3  ;;  %v1601_v3 = vld [vmem:[#allocation7 + $0x1108] sm:$0xff] }
 0x1f1   : > { %8175 = vmatpush1.bf16.msra.mxu1 %v8174_v4  ;;  %8113 = vmatprep.subr.bf16.mxu0 %v8112_v5  ;;  %v1603_v4 = vld [vmem:[#allocation7 + $0x1118] sm:$0xff]  ;;  %v8210_v5 = vpack.c.bf16 %v1598_v2, %v1596_v1  ;;  %v9033_v1 = vmov 0.0   ;;  %v1790_v2 = vld [vmem:[#allocation8] sm:$0xff] }
 0x1f2   : > { %8177 = vmatprep.subr.bf16.mxu1 %v8176_v9  ;;  %v8212_v6 = vpack.c.bf16 %v1603_v4, %v1601_v3  ;;  %v1605_v9 = vld [vmem:[#allocation7 + $0x1128] sm:$0xff] }
 0x1f3   : > { %v8216_v12 = vpack.c.bf16 %v1607_v10, %v1605_v9  ;;  %v1791_v3 = vld [vmem:[#allocation8 + $0x8] sm:$0xff] }
 0x1f4   : > { %8115 = vmatpush1.bf16.msra.mxu0 %v8114_v13  ;;  %v1604_v13 = vld [vmem:[#allocation7 + $0x1120] sm:$0xff]  ;;  %v8261_v4 = vpack.c.bf16 %v1791_v3, %v1790_v2  ;;  %v1795_v9 = vld [vmem:[#allocation8 + $0x28] sm:$0xff] }
 0x1f5   : > { %8179 = vmatpush1.bf16.msra.mxu1 %v8178_v14  ;;  %8181 = vmatprep.subr.bf16.mxu0 %v8180_v17  ;;  %v1606_v14 = vld [vmem:[#allocation7 + $0x1130] sm:$0xff]  ;;  %v1609_v17 = vld [vmem:[#allocation7 + $0x1148] sm:$0xff]  ;;  %v8267_v10 = vpack.c.bf16 %v1795_v9, %v1794_v8  ;;  %v1877_v9 = vld [vmem:[#allocation8 + $0x60] sm:$0xff] }
 0x1f6   : > { %v8218_v19 = vpack.c.bf16 %v1606_v14, %v1604_v13  ;;  %v8220_v20 = vpack.c.bf16 %v1611_v18, %v1609_v17  ;;  %v9440_v14 = vld [vmem:[%s9380_s17 + $0x10] sm:$0xff]  ;;  %v2031_v17 = vld [vmem:[#allocation8 + $0xc0] sm:$0xff] }
 0x1f7   : > { %1425 = vmatmul.mubr.f32.vlgmr.msra.gmra.mrb[6].mxu0 %v9419_v33  ;;  %v2032_v18 = vld [vmem:[#allocation8 + $0xc8] sm:$0xff] }
 0x1f8   : > { %1561 = vmatmul.mubr.f32.vlgmr.msra.gmra.mrb[6].mxu1 %v9419_v33  ;;  %8183 = vmatpush1.bf16.msra.mxu0 %v8182_v22  ;;  %v1610_v22 = vld [vmem:[#allocation7 + $0x1150] sm:$0xff] }
 0x1f9   : > { %8185 = vmatprep.subr.bf16.mxu0 %v8184_v23  ;;  %1696 = vmatprep.mubr.f32.mxu0 %v9424_v46  ;;  %v8198_v46 = vpack.c.bf16 %v1586_v44, %v1584_v43  ;;  %v1613_v23 = vld [vmem:[#allocation7 + $0x1168] sm:$0xff]  ;;  %v8222_v25 = vpack.c.bf16 %v1610_v22, %v1608_v21  ;;  %v1627_v43 = vld [vmem:[#allocation7 + $0x11d8] sm:$0xff] }
 0x1fa   : > { %v8224_v26 = vpack.c.bf16 %v1615_v24, %v1613_v23  ;;  %1778 = vmatprep.mubr.f32.mxu1 %v9033_v1  ;;  %v2034_v21 = vld [vmem:[#allocation8 + $0xd8] sm:$0xff]  ;;  %v2035_v23 = vld [vmem:[#allocation8 + $0xe0] sm:$0xff]  ;;  %v2036_v24 = vld [vmem:[#allocation8 + $0xe8] sm:$0xff] }
 0x1fc   : > { %8187 = vmatpush1.bf16.msra.mxu0 %v8186_v28  ;;  %v1614_v28 = vld [vmem:[#allocation7 + $0x1170] sm:$0xff] }
 0x1fd   : > { %8189 = vmatprep.subr.bf16.mxu0 %v8188_v29  ;;  %v1617_v29 = vld [vmem:[#allocation7 + $0x1188] sm:$0xff]  ;;  %v8226_v31 = vpack.c.bf16 %v1614_v28, %v1612_v27  ;;  %v2038_v27 = vld [vmem:[#allocation8 + $0xf8] sm:$0xff] }
 0x1fe   : > { %v8228_v32 = vpack.c.bf16 %v1619_v30, %v1617_v29  ;;  %v2189_v29 = vld [vmem:[#allocation8 + $0x140] sm:$0xff]  ;;  %v2190_v30 = vld [vmem:[#allocation8 + $0x148] sm:$0xff] }
 0x200   : > { %8191 = vmatpush1.bf16.msra.mxu0 %v8190_v35  ;;  %v1618_v35 = vld [vmem:[#allocation7 + $0x1190] sm:$0xff] }
 0x201   : > { %8193 = vmatprep.subr.bf16.mxu0 %v8192_v36  ;;  %v1621_v36 = vld [vmem:[#allocation7 + $0x11a8] sm:$0xff]  ;;  %v8230_v38 = vpack.c.bf16 %v1618_v35, %v1616_v34  ;;  %v2192_v34 = vld [vmem:[#allocation8 + $0x158] sm:$0xff] }
 0x202   : > { %v8232_v39 = vpack.c.bf16 %v1623_v37, %v1621_v36  ;;  %v2193_v36 = vld [vmem:[#allocation8 + $0x160] sm:$0xff]  ;;  %v2194_v37 = vld [vmem:[#allocation8 + $0x168] sm:$0xff] }
 0x204   : > { %8195 = vmatpush1.bf16.msra.mxu0 %v8194_v41  ;;  %v1622_v41 = vld [vmem:[#allocation7 + $0x11b0] sm:$0xff] }
 0x205   : > { %8197 = vmatprep.subr.bf16.mxu0 %v8196_v42  ;;  %v1625_v42 = vld [vmem:[#allocation7 + $0x11c8] sm:$0xff]  ;;  %v8234_v44 = vpack.c.bf16 %v1622_v41, %v1620_v40  ;;  %v2196_v40 = vld [vmem:[#allocation8 + $0x178] sm:$0xff] }
 0x206   : > { %v8236_v45 = vpack.c.bf16 %v1627_v43, %v1625_v42  ;;  %v2347_v42 = vld [vmem:[#allocation8 + $0x1c0] sm:$0xff]  ;;  %v2348_v43 = vld [vmem:[#allocation8 + $0x1c8] sm:$0xff] }
 0x208   : > { %8199 = vmatpush1.bf16.msra.mxu0 %v8198_v46  ;;  %v1626_v46 = vld [vmem:[#allocation7 + $0x11d0] sm:$0xff] }
 0x209   : > { %8201 = vmatprep.subr.bf16.mxu0 %v8200_v47  ;;  %v1629_v47 = vld [vmem:[#allocation7 + $0x11e8] sm:$0xff]  ;;  %v8238_v49 = vpack.c.bf16 %v1626_v46, %v1624_v15  ;;  %v2350_v15 = vld [vmem:[#allocation8 + $0x1d8] sm:$0xff] }
 0x20a   : > { %v610_v56 = vpop.f32.mrb[0].mxu0  ;;  %v8240_v50 = vpack.c.bf16 %v1631_v48, %v1629_v47  ;;  %v2351_v47 = vld [vmem:[#allocation8 + $0x1e0] sm:$0xff]  ;;  %v2352_v48 = vld [vmem:[#allocation8 + $0x1e8] sm:$0xff] }
 0x20b   : > { %v746_v16 = vpop.f32.mrb[0].mxu1  ;;  %v612_v59 = vpop.f32.mrb[1].mxu0 }
 0x20c   : > { %v8246_v60 = vpack.c.bf16 %v746_v16, %v610_v56  ;;  %v748_v61 = vpop.f32.mrb[1].mxu1  ;;  %8203 = vmatpush1.bf16.msra.mxu0 %v8202_v52  ;;  %v1630_v52 = vld [vmem:[#allocation7 + $0x11f0] sm:$0xff] }
 0x20d   : > { %v8244_v63 = vpack.c.bf16 %v748_v61, %v612_v59  ;;  %8205 = vmatprep.subr.bf16.mxu0 %v8204_v53  ;;  %v8242_v53 = vpack.c.bf16 %v1630_v52, %v1628_v51  ;;  %v2353_v51 = vld [vmem:[#allocation8 + $0x1f0] sm:$0xff]  ;;  %v2354_v52 = vld [vmem:[#allocation8 + $0x1f8] sm:$0xff] }
 0x20f   : > { %8245 = vmatprep.subr.bf16.mxu1 %v8244_v63 }
 0x210   : > { %8247 = vmatpush1.bf16.msra.mxu1 %v8246_v60  ;;  %8207 = vmatpush1.bf16.msra.mxu0 %v8206_v62 }
 0x211   : > { %8209 = vmatprep.subr.bf16.mxu0 %v8208_v0 }
 0x214   : > { %8211 = vmatpush1.bf16.msra.mxu0 %v8210_v5  ;;  %v1792_v5 = vld [vmem:[#allocation8 + $0x10] sm:$0xff] }
 0x215   : > { %8213 = vmatprep.subr.bf16.mxu0 %v8212_v6  ;;  %v1793_v6 = vld [vmem:[#allocation8 + $0x18] sm:$0xff] }
 0x216   : > { %v8264_v7 = vpack.c.bf16 %v1793_v6, %v1792_v5  ;;  %v1875_v6 = vld [vmem:[#allocation8 + $0x50] sm:$0xff] }
 0x218   : > { %8215 = vmatpush1.bf16.msra.mxu0 %v8214_v11  ;;  %v1796_v11 = vld [vmem:[#allocation8 + $0x30] sm:$0xff] }
 0x219   : > { %8217 = vmatprep.subr.bf16.mxu0 %v8216_v12  ;;  %v1797_v12 = vld [vmem:[#allocation8 + $0x38] sm:$0xff] }
 0x21a   : > { %v8270_v13 = vpack.c.bf16 %v1797_v12, %v1796_v11  ;;  %v1879_v12 = vld [vmem:[#allocation8 + $0x70] sm:$0xff] }
 0x21c   : > { %8219 = vmatpush1.bf16.msra.mxu0 %v8218_v19  ;;  %v8297_v19 = vpack.c.bf16 %v2032_v18, %v2031_v17  ;;  %v1952_v18 = vld [vmem:[#allocation8 + $0x80] sm:$0xff] }
 0x21d   : > { %8221 = vmatprep.subr.bf16.mxu0 %v8220_v20  ;;  %v2033_v20 = vld [vmem:[#allocation8 + $0xd0] sm:$0xff] }
 0x21e   : > { %v8300_v22 = vpack.c.bf16 %v2034_v21, %v2033_v20  ;;  %v1954_v21 = vld [vmem:[#allocation8 + $0x90] sm:$0xff] }
 0x220   : > { %8223 = vmatpush1.bf16.msra.mxu0 %v8222_v25  ;;  %v8303_v25 = vpack.c.bf16 %v2036_v24, %v2035_v23  ;;  %v1956_v24 = vld [vmem:[#allocation8 + $0xa0] sm:$0xff] }
 0x221   : > { %8225 = vmatprep.subr.bf16.mxu0 %v8224_v26  ;;  %v2037_v26 = vld [vmem:[#allocation8 + $0xf0] sm:$0xff] }
 0x222   : > { %v8306_v28 = vpack.c.bf16 %v2038_v27, %v2037_v26  ;;  %v1958_v27 = vld [vmem:[#allocation8 + $0xb0] sm:$0xff] }
 0x224   : > { %8227 = vmatpush1.bf16.msra.mxu0 %v8226_v31  ;;  %v8321_v31 = vpack.c.bf16 %v2190_v30, %v2189_v29  ;;  %v2110_v30 = vld [vmem:[#allocation8 + $0x100] sm:$0xff] }
 0x225   : > { %8229 = vmatprep.subr.bf16.mxu0 %v8228_v32  ;;  %v2191_v32 = vld [vmem:[#allocation8 + $0x150] sm:$0xff] }
 0x226   : > { %v8324_v35 = vpack.c.bf16 %v2192_v34, %v2191_v32  ;;  %v2112_v34 = vld [vmem:[#allocation8 + $0x110] sm:$0xff] }
 0x228   : > { %8231 = vmatpush1.bf16.msra.mxu0 %v8230_v38  ;;  %v8327_v38 = vpack.c.bf16 %v2194_v37, %v2193_v36  ;;  %v2114_v37 = vld [vmem:[#allocation8 + $0x120] sm:$0xff] }
 0x229   : > { %8233 = vmatprep.subr.bf16.mxu0 %v8232_v39  ;;  %v2195_v39 = vld [vmem:[#allocation8 + $0x170] sm:$0xff] }
 0x22a   : > { %v8330_v41 = vpack.c.bf16 %v2196_v40, %v2195_v39  ;;  %v2116_v40 = vld [vmem:[#allocation8 + $0x130] sm:$0xff] }
 0x22c   : > { %8235 = vmatpush1.bf16.msra.mxu0 %v8234_v44  ;;  %v8345_v44 = vpack.c.bf16 %v2348_v43, %v2347_v42  ;;  %v2268_v43 = vld [vmem:[#allocation8 + $0x180] sm:$0xff] }
 0x22d   : > { %8237 = vmatprep.subr.bf16.mxu0 %v8236_v45  ;;  %v2349_v45 = vld [vmem:[#allocation8 + $0x1d0] sm:$0xff] }
 0x22e   : > { %v8348_v46 = vpack.c.bf16 %v2350_v15, %v2349_v45  ;;  %v2270_v15 = vld [vmem:[#allocation8 + $0x190] sm:$0xff] }
 0x230   : > { %8239 = vmatpush1.bf16.msra.mxu0 %v8238_v49  ;;  %v8351_v49 = vpack.c.bf16 %v2352_v48, %v2351_v47  ;;  %v2272_v48 = vld [vmem:[#allocation8 + $0x1a0] sm:$0xff] }
 0x231   : > { %8241 = vmatprep.subr.bf16.mxu0 %v8240_v50 }
 0x234   : > { %8243 = vmatpush1.bf16.msra.mxu0 %v8242_v53 }
 0x237   : > { %1697 = vmatmul.mubr.f32.vlgmr.msra.gmra.mrb[8].mxu0 %v9419_v33  ;;  %v9034_v33 = vmov 0.0|0.0  }
 0x238   : > { %8260 = vmatprep.subr.bf16.mxu0 %v9034_v33  ;;  %7108 = vmatprep.mubr.msk.f32.mxu0 %vm9035_vm0, %v9033_v1 }
 0x239   : > { %8262 = vmatpush3.bf16.msra.mxu0 %v8261_v4  ;;  %v1703_v4 = vld [vmem:[#allocation5] sm:$0xff] }
 0x23a   : > { %8263 = vmatprep.subr.bf16.mxu0 %v9034_v33 }
 0x23d   : > { %8265 = vmatpush3.bf16.msra.mxu0 %v8264_v7  ;;  %v1876_v7 = vld [vmem:[#allocation8 + $0x58] sm:$0xff] }
 0x23e   : > { %8266 = vmatprep.subr.bf16.mxu0 %v9034_v33  ;;  %v8276_v8 = vpack.c.bf16 %v1876_v7, %v1875_v6 }
 0x241   : > { %8268 = vmatpush3.bf16.msra.mxu0 %v8267_v10  ;;  %v1878_v10 = vld [vmem:[#allocation8 + $0x68] sm:$0xff] }
 0x242   : > { %8269 = vmatprep.subr.bf16.mxu0 %v9034_v33  ;;  %v8279_v11 = vpack.c.bf16 %v1878_v10, %v1877_v9  ;;  %v2588_v10 = vld [vmem:[#allocation10 + $0x8] sm:$0xff] }
 0x245   : > { %8271 = vmatpush3.bf16.msra.mxu0 %v8270_v13  ;;  %v1880_v13 = vld [vmem:[#allocation8 + $0x78] sm:$0xff] }
 0x246   : > { %8296 = vmatprep.subr.bf16.mxu0 %v9034_v33  ;;  %v8282_v17 = vpack.c.bf16 %v1880_v13, %v1879_v12  ;;  %v2587_v12 = vld [vmem:[#allocation10] sm:$0xff] }
 0x248   : > { %7109 = vmatmul.mubr.msk.f32.vlgmr.msra.gmra.mrb[10].mxu0 %vm1798_vm1, %v9440_v14 }
 0x249   : > { %8298 = vmatpush3.bf16.msra.mxu0 %v8297_v19  ;;  %7165 = vmatprep.mubr.msk.f32.mxu0 %vm9035_vm0, %v9033_v1  ;;  %v1953_v19 = vld [vmem:[#allocation8 + $0x88] sm:$0xff] }
 0x24a   : > { %v882_v54 = vpop.f32.mrb[2].mxu0  ;;  %8299 = vmatprep.subr.bf16.mxu0 %v9034_v33  ;;  %v8285_v20 = vpack.c.bf16 %v1953_v19, %v1952_v18  ;;  %v2592_v18 = vld [vmem:[#allocation10 + $0x28] sm:$0xff]  ;;  %v2594_v19 = vld [vmem:[#allocation10 + $0x38] sm:$0xff] }
 0x24b   : > { %v1018_v55 = vpop.f32.mrb[2].mxu1  ;;  %v884_v56 = vpop.f32.mrb[3].mxu0 }
 0x24c   : > { %v8250_v57 = vpack.c.bf16 %v1018_v55, %v882_v54  ;;  %v1020_v58 = vpop.f32.mrb[3].mxu1  ;;  %v8354_v55 = vpack.c.bf16 %v2354_v52, %v2353_v51  ;;  %v2274_v51 = vld [vmem:[#allocation8 + $0x1b0] sm:$0xff]  ;;  %v2275_v52 = vld [vmem:[#allocation8 + $0x1b8] sm:$0xff] }
 0x24d   : > { %v8248_v16 = vpack.c.bf16 %v1020_v58, %v884_v56  ;;  %8301 = vmatpush3.bf16.msra.mxu0 %v8300_v22  ;;  %v1955_v22 = vld [vmem:[#allocation8 + $0x98] sm:$0xff] }
 0x24e   : > { %8302 = vmatprep.subr.bf16.mxu0 %v9034_v33  ;;  %v8288_v23 = vpack.c.bf16 %v1955_v22, %v1954_v21  ;;  %v2591_v21 = vld [vmem:[#allocation10 + $0x20] sm:$0xff]  ;;  %v2593_v22 = vld [vmem:[#allocation10 + $0x30] sm:$0xff] }
 0x24f   : > { %8249 = vmatprep.subr.bf16.mxu1 %v8248_v16  ;;  %v9036_v16 = vmov 0  }
 0x250   : > { %8251 = vmatpush1.bf16.msra.mxu1 %v8250_v57  ;;  %8705 = vset.pattern.permute.xlu0 %v9036_v16 }
 0x251   : > { %8304 = vmatpush3.bf16.msra.mxu0 %v8303_v25  ;;  %8706 = vset.pattern.permute.xlu1 %v9036_v16  ;;  %v1957_v25 = vld [vmem:[#allocation8 + $0xa8] sm:$0xff] }
 0x252   : > { %8305 = vmatprep.subr.bf16.mxu0 %v9034_v33  ;;  %v8291_v26 = vpack.c.bf16 %v1957_v25, %v1956_v24  ;;  %v2598_v24 = vld [vmem:[#allocation10 + $0x58] sm:$0xff]  ;;  %v9533_v25 = vpack.c.bf16 %v2593_v22, %v2591_v21  ;;  %v3049_v21 = vld [vmem:[#allocation11 + $0x50] sm:$0xff] }
 0x253   : > { %v3050_v22 = vld [vmem:[#allocation11 + $0x58] sm:$0xff] }
 0x255   : > { %8307 = vmatpush3.bf16.msra.mxu0 %v8306_v28  ;;  %v1959_v28 = vld [vmem:[#allocation8 + $0xb8] sm:$0xff] }
 0x256   : > { %8320 = vmatprep.subr.bf16.mxu0 %v9034_v33  ;;  %v8294_v29 = vpack.c.bf16 %v1959_v28, %v1958_v27  ;;  %v2595_v27 = vld [vmem:[#allocation10 + $0x40] sm:$0xff]  ;;  %v2597_v28 = vld [vmem:[#allocation10 + $0x50] sm:$0xff] }
 0x258   : > { %7166 = vmatmul.mubr.msk.f32.vlgmr.msra.gmra.mrb[12].mxu0 %vm1798_vm1, %v9440_v14 }
 0x259   : > { %8322 = vmatpush3.bf16.msra.mxu0 %v8321_v31  ;;  %7203 = vmatprep.mubr.msk.f32.mxu0 %vm9035_vm0, %v9033_v1  ;;  %v2111_v31 = vld [vmem:[#allocation8 + $0x108] sm:$0xff] }
 0x25a   : > { %8323 = vmatprep.subr.bf16.mxu0 %v9034_v33  ;;  %v8309_v32 = vpack.c.bf16 %v2111_v31, %v2110_v30 }
 0x25d   : > { %8325 = vmatpush3.bf16.msra.mxu0 %v8324_v35  ;;  %v2113_v35 = vld [vmem:[#allocation8 + $0x118] sm:$0xff] }
 0x25e   : > { %8326 = vmatprep.subr.bf16.mxu0 %v9034_v33  ;;  %v8312_v36 = vpack.c.bf16 %v2113_v35, %v2112_v34 }
 0x261   : > { %8328 = vmatpush3.bf16.msra.mxu0 %v8327_v38  ;;  %v2115_v38 = vld [vmem:[#allocation8 + $0x128] sm:$0xff] }
 0x262   : > { %8329 = vmatprep.subr.bf16.mxu0 %v9034_v33  ;;  %v8315_v39 = vpack.c.bf16 %v2115_v38, %v2114_v37 }
 0x265   : > { %8331 = vmatpush3.bf16.msra.mxu0 %v8330_v41  ;;  %v2117_v41 = vld [vmem:[#allocation8 + $0x138] sm:$0xff] }
 0x266   : > { %8344 = vmatprep.subr.bf16.mxu0 %v9034_v33  ;;  %v8318_v42 = vpack.c.bf16 %v2117_v41, %v2116_v40 }
 0x268   : > { %7204 = vmatmul.mubr.msk.f32.vlgmr.msra.gmra.mrb[14].mxu0 %vm1798_vm1, %v9440_v14 }
 0x269   : > { %8346 = vmatpush3.bf16.msra.mxu0 %v8345_v44  ;;  %7241 = vmatprep.mubr.msk.f32.mxu0 %vm9035_vm0, %v9033_v1  ;;  %v2269_v44 = vld [vmem:[#allocation8 + $0x188] sm:$0xff] }
 0x26a   : > { %8347 = vmatprep.subr.bf16.mxu0 %v9034_v33  ;;  %v8333_v45 = vpack.c.bf16 %v2269_v44, %v2268_v43 }
 0x26d   : > { %8349 = vmatpush3.bf16.msra.mxu0 %v8348_v46  ;;  %v2271_v46 = vld [vmem:[#allocation8 + $0x198] sm:$0xff] }
 0x26e   : > { %8350 = vmatprep.subr.bf16.mxu0 %v9034_v33  ;;  %v8336_v47 = vpack.c.bf16 %v2271_v46, %v2270_v15 }
 0x271   : > { %8352 = vmatpush3.bf16.msra.mxu0 %v8351_v49  ;;  %v2273_v49 = vld [vmem:[#allocation8 + $0x1a8] sm:$0xff] }
 0x272   : > { %8353 = vmatprep.subr.bf16.mxu0 %v9034_v33 }
 0x275   : > { %8355 = vmatpush3.bf16.msra.mxu0 %v8354_v55  ;;  %v2427_v55 = vld [vmem:[#allocation8 + $0x208] sm:$0xff] }
 0x276   : > { %8368 = vmatprep.subr.bf16.mxu0 %v9034_v33 }
 0x278   : > { %7242 = vmatmul.mubr.msk.f32.vlgmr.msra.gmra.mrb[16].mxu0 %vm1798_vm1, %v9440_v14 }
 0x279   : > { %7281 = vmatprep.mubr.msk.f32.mxu0 %vm9035_vm0, %v9033_v1 }
 0x28a   : > { %v1154_v59 = vpop.f32.mrb[4].mxu0 }
 0x28b   : > { %v1290_v60 = vpop.f32.mrb[4].mxu1  ;;  %v1156_v61 = vpop.f32.mrb[5].mxu0 }
 0x28c   : > { %v8254_v62 = vpack.c.bf16 %v1290_v60, %v1154_v59  ;;  %v1292_v63 = vpop.f32.mrb[5].mxu1  ;;  %v6742_v59 = vld [vmem:[%s9955_s2 + $0x8] sm:$0xff]  ;;  %v6754_v60 = vld [vmem:[%s9955_s2 + $0x10] sm:$0xff] }
 0x28d   : > { %v8252_v0 = vpack.c.bf16 %v1292_v63, %v1156_v61  ;;  %2510 = vperm.xlu0 %8705, %v6742_v59   ;;  %v6814_v61 = vld [vmem:[%s9955_s2 + $0x28] sm:$0xff] }
 0x28e   : > { %v1873_v63 = vld [vmem:[#allocation8 + $0x40] sm:$0xff] }
 0x28f   : > { %8253 = vmatprep.subr.bf16.mxu1 %v8252_v0  ;;  %v1874_v0 = vld [vmem:[#allocation8 + $0x48] sm:$0xff]  ;;  %v2430_v59 = vld [vmem:[#allocation8 + $0x220] sm:$0xff] }
 0x290   : > { %8255 = vmatpush1.bf16.msra.mxu1 %v8254_v62  ;;  %v1704_v62 = vld [vmem:[%s9955_s2] sm:$0xff]  ;;  %v8273_v5 = vpack.c.bf16 %v1874_v0, %v1873_v63 }
 0x291   : > { %3346 = vperm.xlu0 %8705, %v6754_v60   ;;  %v2431_v60 = vld [vmem:[#allocation8 + $0x228] sm:$0xff]  ;;  %v2433_v63 = vld [vmem:[#allocation8 + $0x238] sm:$0xff] }
 0x295   : > { %5687 = vperm.xlu0 %8705, %v6814_v61   ;;  %v8363_v61 = vpack.c.bf16 %v2431_v60, %v2430_v59  ;;  %v2976_v59 = vld [vmem:[#allocation11 + $0x40] sm:$0xff]  ;;  %v2977_v60 = vld [vmem:[#allocation11 + $0x48] sm:$0xff] }
 0x299   : > { %1707 = vperm.xlu0 %8705, %v1704_v62   ;;  %v2432_v62 = vld [vmem:[#allocation8 + $0x230] sm:$0xff] }
 0x29a   : > { %v8366_v0 = vpack.c.bf16 %v2433_v63, %v2432_v62  ;;  %v3122_v62 = vld [vmem:[#allocation11 + $0x60] sm:$0xff]  ;;  %v3123_v63 = vld [vmem:[#allocation11 + $0x68] sm:$0xff] }
 0x2ca   : > { %v1426_v50 = vpop.f32.mrb[6].mxu0 }
 0x2cb   : > { %v1562_v53 = vpop.f32.mrb[6].mxu1  ;;  %v1428_v54 = vpop.f32.mrb[7].mxu0 }
 0x2cc   : > { %v8258_v56 = vpack.c.bf16 %v1562_v53, %v1426_v50  ;;  %v1564_v57 = vpop.f32.mrb[7].mxu1  ;;  %v8339_v50 = vpack.c.bf16 %v2273_v49, %v2272_v48  ;;  %v8342_v53 = vpack.c.bf16 %v2275_v52, %v2274_v51  ;;  %v2602_v48 = vld [vmem:[#allocation10 + $0x78] sm:$0xff]  ;;  %v2601_v51 = vld [vmem:[#allocation10 + $0x70] sm:$0xff] }
 0x2cd   : > { %v8256_v58 = vpack.c.bf16 %v1564_v57, %v1428_v54  ;;  %v2426_v54 = vld [vmem:[#allocation8 + $0x200] sm:$0xff]  ;;  %v2428_v57 = vld [vmem:[#allocation8 + $0x210] sm:$0xff] }
 0x2cf   : > { %8257 = vmatprep.subr.bf16.mxu1 %v8256_v58  ;;  %v2429_v58 = vld [vmem:[#allocation8 + $0x218] sm:$0xff] }
 0x2d0   : > { %8259 = vmatpush1.bf16.msra.mxu1 %v8258_v56  ;;  %v8357_v56 = vpack.c.bf16 %v2427_v55, %v2426_v54  ;;  %v8360_v16 = vpack.c.bf16 %v2429_v58, %v2428_v57  ;;  %v2681_v54 = vld [vmem:[#allocation11 + $0x8] sm:$0xff]  ;;  %v2830_v57 = vld [vmem:[#allocation11 + $0x20] sm:$0xff] }
 0x2d1   : > { %v2831_v58 = vld [vmem:[#allocation11 + $0x28] sm:$0xff] }
 0x30a   : > { %v1698_v2 = vpop.f32.mrb[8].mxu0 }
 0x30b   : > { %v1700_v3 = vpop.f32.mrb[9].mxu0 }
 0x30c   : > { %1730 = vmatprep.subr.mxu1 %v1700_v3 }
 0x30d   : > { %1731 = vmatpush1.msra.mxu1 %v1698_v2 }
 0x30e   : > { %6732 = vmatmul.mubr.msk.f32.vlgmr.msra.gmra.mrb[8].mxu1 %vm1710_vm2, %v1703_v4  ;;  %8272 = vmatprep.subr.bf16.mxu1 %v9034_v33 }
 0x30f   : > { %8274 = vmatpush3.bf16.msra.mxu1 %v8273_v5  ;;  %7127 = vmatprep.mubr.msk.f32.mxu1 %vm9035_vm0, %v9033_v1 }
 0x310   : > { %8275 = vmatprep.subr.bf16.mxu1 %v9034_v33 }
 0x313   : > { %8277 = vmatpush3.bf16.msra.mxu1 %v8276_v8 }
 0x314   : > { %8278 = vmatprep.subr.bf16.mxu1 %v9034_v33 }
 0x317   : > { %8280 = vmatpush3.bf16.msra.mxu1 %v8279_v11  ;;  %v2590_v11 = vld [vmem:[#allocation10 + $0x18] sm:$0xff] }
 0x318   : > { %8281 = vmatprep.subr.bf16.mxu1 %v9034_v33  ;;  %v9525_v13 = vpack.c.bf16 %v2590_v11, %v2588_v10 }
 0x31b   : > { %8283 = vmatpush3.bf16.msra.mxu1 %v8282_v17  ;;  %v1868_v2 = vpop.f32.mrb[10].mxu0  ;;  %v2589_v17 = vld [vmem:[#allocation10 + $0x10] sm:$0xff] }
 0x31c   : > { %8284 = vmatprep.subr.bf16.mxu1 %v9034_v33  ;;  %v7110_v3 = vpop.f32.mrb[11].mxu0 }
 0x31d   : > { %v3269_v3 = vld [vmem:[#allocation11 + $0x88] sm:$0xff] }
 0x31e   : > { %7128 = vmatmul.mubr.msk.f32.vlgmr.msra.gmra.mrb[10].mxu1 %vm1798_vm1, %v9440_v14 }
 0x31f   : > { %8286 = vmatpush3.bf16.msra.mxu1 %v8285_v20  ;;  %7146 = vmatprep.mubr.msk.f32.mxu1 %vm9035_vm0, %v9033_v1  ;;  %v9527_v20 = vpack.c.bf16 %v2589_v17, %v2587_v12  ;;  %v2903_v17 = vld [vmem:[#allocation11 + $0x30] sm:$0xff] }
 0x320   : > { %8287 = vmatprep.subr.bf16.mxu1 %v9034_v33 }
 0x323   : > { %8289 = vmatpush3.bf16.msra.mxu1 %v8288_v23  ;;  %v2596_v23 = vld [vmem:[#allocation10 + $0x48] sm:$0xff] }
 0x324   : > { %8290 = vmatprep.subr.bf16.mxu1 %v9034_v33 }
 0x327   : > { %8292 = vmatpush3.bf16.msra.mxu1 %v8291_v26  ;;  %v9536_v26 = vpack.c.bf16 %v2598_v24, %v2596_v23  ;;  %v8412_v23 = vpack.c.bf16 %v3050_v22, %v3049_v21  ;;  %v3195_v24 = vld [vmem:[#allocation11 + $0x70] sm:$0xff]  ;;  %v3645_v21 = vld [vmem:[#allocation13 + $0x30] sm:$0xff]  ;;  %v3646_v22 = vld [vmem:[#allocation13 + $0x38] sm:$0xff] }
 0x328   : > { %8293 = vmatprep.subr.bf16.mxu1 %v9034_v33 }
 0x32b   : > { %8295 = vmatpush3.bf16.msra.mxu1 %v8294_v29  ;;  %v2105_v4 = vpop.f32.mrb[12].mxu0  ;;  %v9539_v29 = vpack.c.bf16 %v2597_v28, %v2595_v27  ;;  %v3196_v27 = vld [vmem:[#allocation11 + $0x78] sm:$0xff] }
 0x32c   : > { %8308 = vmatprep.subr.bf16.mxu1 %v9034_v33  ;;  %v7167_v5 = vpop.f32.mrb[13].mxu0  ;;  %v8418_v28 = vpack.c.bf16 %v3196_v27, %v3195_v24  ;;  %v3791_v24 = vld [vmem:[#allocation13 + $0x50] sm:$0xff]  ;;  %v3792_v27 = vld [vmem:[#allocation13 + $0x58] sm:$0xff] }
 0x32d   : > { %v2757_v5 = vld [vmem:[#allocation11 + $0x10] sm:$0xff] }
 0x32e   : > { %7147 = vmatmul.mubr.msk.f32.vlgmr.msra.gmra.mrb[12].mxu1 %vm1798_vm1, %v9440_v14 }
 0x32f   : > { %8310 = vmatpush3.bf16.msra.mxu1 %v8309_v32  ;;  %7184 = vmatprep.mubr.msk.f32.mxu1 %vm9035_vm0, %v9033_v1 }
 0x330   : > { %8311 = vmatprep.subr.bf16.mxu1 %v9034_v33 }
 0x333   : > { %8313 = vmatpush3.bf16.msra.mxu1 %v8312_v36 }
 0x334   : > { %8314 = vmatprep.subr.bf16.mxu1 %v9034_v33 }
 0x337   : > { %8316 = vmatpush3.bf16.msra.mxu1 %v8315_v39 }
 0x338   : > { %8317 = vmatprep.subr.bf16.mxu1 %v9034_v33 }
 0x33b   : > { %8319 = vmatpush3.bf16.msra.mxu1 %v8318_v42  ;;  %v2263_v6 = vpop.f32.mrb[14].mxu0 }
 0x33c   : > { %8332 = vmatprep.subr.bf16.mxu1 %v9034_v33  ;;  %v7205_v7 = vpop.f32.mrb[15].mxu0 }
 0x33d   : > { %v2511_v7 = vpop.permute.xlu0 %2510 }
 0x33e   : > { %7185 = vmatmul.mubr.msk.f32.vlgmr.msra.gmra.mrb[14].mxu1 %vm1798_vm1, %v9440_v14 }
 0x33f   : > { %8334 = vmatpush3.bf16.msra.mxu1 %v8333_v45  ;;  %7222 = vmatprep.mubr.msk.f32.mxu1 %vm9035_vm0, %v9033_v1  ;;  %v2505_v45 = vld [vmem:[#allocation5 + $0x8] sm:$0xff] }
 0x340   : > { %8335 = vmatprep.subr.bf16.mxu1 %v9034_v33 }
 0x343   : > { %8337 = vmatpush3.bf16.msra.mxu1 %v8336_v47  ;;  %v2600_v47 = vld [vmem:[#allocation10 + $0x68] sm:$0xff] }
 0x344   : > { %8338 = vmatprep.subr.bf16.mxu1 %v9034_v33  ;;  %v9555_v49 = vpack.c.bf16 %v2602_v48, %v2600_v47 }
 0x347   : > { %8340 = vmatpush3.bf16.msra.mxu1 %v8339_v50  ;;  %v2599_v50 = vld [vmem:[#allocation10 + $0x60] sm:$0xff] }
 0x348   : > { %8341 = vmatprep.subr.bf16.mxu1 %v9034_v33  ;;  %v9557_v52 = vpack.c.bf16 %v2601_v51, %v2599_v50 }
 0x34b   : > { %8343 = vmatpush3.bf16.msra.mxu1 %v8342_v53  ;;  %v2421_v8 = vpop.f32.mrb[16].mxu0  ;;  %v2680_v53 = vld [vmem:[#allocation11] sm:$0xff] }
 0x34c   : > { %8356 = vmatprep.subr.bf16.mxu1 %v9034_v33  ;;  %v7243_v9 = vpop.f32.mrb[17].mxu0  ;;  %v8397_v55 = vpack.c.bf16 %v2681_v54, %v2680_v53 }
 0x34e   : > { %7223 = vmatmul.mubr.msk.f32.vlgmr.msra.gmra.mrb[16].mxu1 %vm1798_vm1, %v9440_v14 }
 0x34f   : > { %8358 = vmatpush3.bf16.msra.mxu1 %v8357_v56  ;;  %7260 = vmatprep.mubr.msk.f32.mxu1 %vm9035_vm0, %v9033_v1  ;;  %v9563_v56 = vld [vmem:[%s9380_s17 + $0x18] sm:$0xff] }
 0x350   : > { %8359 = vmatprep.subr.bf16.mxu1 %v9034_v33 }
 0x353   : > { %8361 = vmatpush3.bf16.msra.mxu1 %v8360_v16  ;;  %v8403_v16 = vpack.c.bf16 %v2831_v58, %v2830_v57  ;;  %v3423_v57 = vld [vmem:[#allocation13] sm:$0xff]  ;;  %v3424_v58 = vld [vmem:[#allocation13 + $0x8] sm:$0xff] }
 0x354   : > { %8362 = vmatprep.subr.bf16.mxu1 %v9034_v33 }
 0x357   : > { %8364 = vmatpush3.bf16.msra.mxu1 %v8363_v61  ;;  %v8409_v61 = vpack.c.bf16 %v2977_v60, %v2976_v59  ;;  %v9621_v59 = vpack.c.bf16 %v3424_v58, %v3423_v57  ;;  %v3719_v60 = vld [vmem:[#allocation13 + $0x48] sm:$0xff] }
 0x358   : > { %8365 = vmatprep.subr.bf16.mxu1 %v9034_v33 }
 0x35b   : > { %8367 = vmatpush3.bf16.msra.mxu1 %v8366_v0  ;;  %v8415_v0 = vpack.c.bf16 %v3123_v63, %v3122_v62  ;;  %v3499_v62 = vld [vmem:[#allocation13 + $0x10] sm:$0xff]  ;;  %v3500_v63 = vld [vmem:[#allocation13 + $0x18] sm:$0xff] }
 0x35c   : > { %8381 = vmatprep.subr.bf16.mxu1 %v9525_v13 }
 0x35e   : > { %7261 = vmatmul.mubr.msk.f32.vlgmr.msra.gmra.mrb[18].mxu1 %vm1798_vm1, %v9440_v14  ;;  %v9529_v14 = vpack.c.bf16 %v2594_v19, %v2592_v18  ;;  %v2904_v18 = vld [vmem:[#allocation11 + $0x38] sm:$0xff] }
 0x35f   : > { %2670 = vmatprep.mubr.f32.mxu1 %v9033_v1  ;;  %8383 = vmatpush1.bf16.msra.mxu1 %v9527_v20  ;;  %v8406_v19 = vpack.c.bf16 %v2904_v18, %v2903_v17  ;;  %v4011_v17 = vld [vmem:[#allocation13 + $0x88] sm:$0xff] }
 0x360   : > { %8385 = vmatprep.subr.bf16.mxu1 %v9529_v14 }
 0x363   : > { %8387 = vmatpush1.bf16.msra.mxu1 %v9533_v25 }
 0x364   : > { %8389 = vmatprep.subr.bf16.mxu1 %v9536_v26 }
 0x367   : > { %8391 = vmatpush1.bf16.msra.mxu1 %v9539_v29 }
 0x368   : > { %8393 = vmatprep.subr.bf16.mxu1 %v9555_v49 }
 0x36b   : > { %8395 = vmatpush1.bf16.msra.mxu1 %v9557_v52 }
 0x36c   : > { %8399 = vmatprep.subr.bf16.mxu1 %v9034_v33 }
 0x3e1   : > { %v9543_v30 = vpop.f32.mrb[8].mxu1 }
 0x3e2   : > { %v9545_v31 = vpop.f32.mrb[9].mxu1 }
 0x3f1   : > { %v1947_v32 = vpop.f32.mrb[10].mxu1 }
 0x3f2   : > { %v8369_v34 = vpack.c.bf16 %v1947_v32, %v1868_v2  ;;  %v7129_v35 = vpop.f32.mrb[11].mxu1  ;;  %v3268_v2 = vld [vmem:[#allocation11 + $0x80] sm:$0xff] }
 0x3f4   : > { %8370 = vmatpush3.bf16.msra.mxu0 %v8369_v34 }
 0x3f5   : > { %8371 = vmatprep.subr.bf16.mxu0 %v9034_v33 }
 0x401   : > { %v2026_v36 = vpop.f32.mrb[12].mxu1 }
 0x402   : > { %v7148_v37 = vpop.f32.mrb[13].mxu1  ;;  %v8372_v38 = vpack.c.bf16 %v2105_v4, %v2026_v36  ;;  %v8421_v4 = vpack.c.bf16 %v3269_v3, %v3268_v2  ;;  %v3865_v2 = vld [vmem:[#allocation13 + $0x68] sm:$0xff]  ;;  %v3347_v3 = vpop.permute.xlu0 %3346 }
 0x404   : > { %8373 = vmatpush3.bf16.msra.mxu0 %v8372_v38 }
 0x405   : > { %8374 = vmatprep.subr.bf16.mxu0 %v9034_v33 }
 0x411   : > { %v2184_v39 = vpop.f32.mrb[14].mxu1 }
 0x412   : > { %v7186_v40 = vpop.f32.mrb[15].mxu1  ;;  %v8375_v41 = vpack.c.bf16 %v2263_v6, %v2184_v39  ;;  %v2758_v6 = vld [vmem:[#allocation11 + $0x18] sm:$0xff] }
 0x413   : > { %v8400_v11 = vpack.c.bf16 %v2758_v6, %v2757_v5 }
 0x414   : > { %8376 = vmatpush3.bf16.msra.mxu0 %v8375_v41 }
 0x415   : > { %8377 = vmatprep.subr.bf16.mxu0 %v9034_v33 }
 0x421   : > { %v2342_v42 = vpop.f32.mrb[16].mxu1 }
 0x422   : > { %v7224_v43 = vpop.f32.mrb[17].mxu1  ;;  %v8378_v44 = vpack.c.bf16 %v2421_v8, %v2342_v42 }
 0x424   : > { %8379 = vmatpush3.bf16.msra.mxu0 %v8378_v44 }
 0x425   : > { %7279 = vmatprep.subr.mxu0 %v9033_v1 }
 0x431   : > { %v2500_v15 = vpop.f32.mrb[18].mxu1 }
 0x432   : > { %v7262_v46 = vpop.f32.mrb[19].mxu1  ;;  %7280 = vmatpush3.msra.mxu0 %v2500_v15 }
 0x433   : > { %7282 = vmatmul.mubr.msk.f32.vlgmr.msra.gmra.mrb[18].mxu0 %vm1710_vm2, %v2505_v45  ;;  %8396 = vmatprep.subr.bf16.mxu0 %v9034_v33 }
 0x434   : > { %7288 = vmatprep.mubr.msk.f32.mxu0 %vm9035_vm0, %v9033_v1  ;;  %8398 = vmatpush3.bf16.msra.mxu0 %v8397_v55 }
 0x435   : > { %8402 = vmatprep.subr.bf16.mxu0 %v9034_v33 }
 0x437   : > { %7289 = vmatmul.mubr.msk.f32.vlgmr.msra.gmra.mrb[20].mxu0 %vm2682_vm3, %v9563_v56 }
 0x438   : > { %8404 = vmatpush3.bf16.msra.mxu0 %v8403_v16  ;;  %7302 = vmatprep.mubr.msk.f32.mxu0 %vm9035_vm0, %v9033_v1  ;;  %v3718_v16 = vld [vmem:[#allocation13 + $0x40] sm:$0xff] }
 0x439   : > { %8408 = vmatprep.subr.bf16.mxu0 %v9034_v33 }
 0x43b   : > { %7303 = vmatmul.mubr.msk.f32.vlgmr.msra.gmra.mrb[22].mxu0 %vm2682_vm3, %v9563_v56 }
 0x43c   : > { %8410 = vmatpush3.bf16.msra.mxu0 %v8409_v61  ;;  %7316 = vmatprep.mubr.msk.f32.mxu0 %vm9035_vm0, %v9033_v1  ;;  %v9623_v61 = vpack.c.bf16 %v3719_v60, %v3718_v16 }
 0x43d   : > { %8414 = vmatprep.subr.bf16.mxu0 %v9034_v33 }
 0x43f   : > { %7317 = vmatmul.mubr.msk.f32.vlgmr.msra.gmra.mrb[24].mxu0 %vm2682_vm3, %v9563_v56 }
 0x440   : > { %8416 = vmatpush3.bf16.msra.mxu0 %v8415_v0  ;;  %7330 = vmatprep.mubr.msk.f32.mxu0 %vm9035_vm0, %v9033_v1  ;;  %v3864_v0 = vld [vmem:[#allocation13 + $0x60] sm:$0xff] }
 0x441   : > { %8420 = vmatprep.subr.bf16.mxu0 %v9034_v33 }
 0x443   : > { %7331 = vmatmul.mubr.msk.f32.vlgmr.msra.gmra.mrb[26].mxu0 %vm2682_vm3, %v9563_v56 }
 0x444   : > { %7344 = vmatprep.mubr.msk.f32.mxu0 %vm9035_vm0, %v9033_v1  ;;  %8422 = vmatpush3.bf16.msra.mxu0 %v8421_v4 }
 0x445   : > { %8435 = vmatprep.subr.bf16.mxu0 %v9034_v33 }
 0x447   : > { %7345 = vmatmul.mubr.msk.f32.vlgmr.msra.gmra.mrb[28].mxu0 %vm2682_vm3, %v9563_v56 }
 0x448   : > { %7372 = vmatprep.mubr.msk.f32.mxu0 %vm9035_vm0, %v9033_v1  ;;  %8437 = vmatpush3.bf16.msra.mxu0 %v9621_v59 }
 0x449   : > { %8438 = vmatprep.subr.bf16.mxu0 %v9034_v33 }
 0x506   : > { %v2582_v8 = vpop.f32.mrb[18].mxu0 }
 0x507   : > { %v2583_v9 = vadd.f32 %v2582_v8, %v2511_v7  ;;  %v7283_v10 = vpop.f32.mrb[19].mxu0  ;;  %v9629_v7 = vpack.c.bf16 %v3500_v63, %v3499_v62  ;;  %v9631_v8 = vpack.c.bf16 %v3865_v2, %v3864_v0  ;;  %v4083_v63 = vld [vmem:[#allocation5 + $0x18] sm:$0xff]  ;;  %v4242_v0 = vld [vmem:[%s9996_s30] sm:$0xf] }
 0x508   : > { %v4241_v2 = vld [vmem:[%s9380_s17 + $0x20] sm:$0xff] }
 0x509   : > { %v2586_v12 = vmax.f32 %v2583_v9, 0.0  ;;  %v3572_v9 = vld [vmem:[#allocation13 + $0x20] sm:$0xff] }
 0x50a   : > { %v2752_v32 = vpop.f32.mrb[20].mxu0 }
 0x50b   : > { %6744 = vmatmul.mubr.msk.f32.vlgmr.msra.gmra.mrb[20].mxu1 %vm1798_vm1, %v2586_v12  ;;  %v7290_v34 = vpop.f32.mrb[21].mxu0  ;;  %v4010_v12 = vld [vmem:[#allocation13 + $0x80] sm:$0xff] }
 0x50c   : > { %8401 = vmatpush3.bf16.msra.mxu1 %v8400_v11  ;;  %7295 = vmatprep.mubr.msk.f32.mxu1 %vm9035_vm0, %v9033_v1  ;;  %v3573_v11 = vld [vmem:[#allocation13 + $0x28] sm:$0xff]  ;;  %v3938_v34 = vld [vmem:[#allocation13 + $0x78] sm:$0xff] }
 0x50d   : > { %8405 = vmatprep.subr.bf16.mxu1 %v9034_v33  ;;  %v9637_v18 = vpack.c.bf16 %v3573_v11, %v3572_v9 }
 0x50e   : > { %v2898_v35 = vpop.f32.mrb[22].mxu0 }
 0x50f   : > { %7296 = vmatmul.mubr.msk.f32.vlgmr.msra.gmra.mrb[22].mxu1 %vm2682_vm3, %v9563_v56  ;;  %v7304_v36 = vpop.f32.mrb[23].mxu0 }
 0x510   : > { %8407 = vmatpush3.bf16.msra.mxu1 %v8406_v19  ;;  %7309 = vmatprep.mubr.msk.f32.mxu1 %vm9035_vm0, %v9033_v1  ;;  %v9639_v19 = vpack.c.bf16 %v4011_v17, %v4010_v12  ;;  %v6765_v36 = vld [vmem:[%s9955_s2 + $0x18] sm:$0xff] }
 0x511   : > { %8411 = vmatprep.subr.bf16.mxu1 %v9034_v33  ;;  %4088 = vperm.xlu1 %8706, %v6765_v36  }
 0x512   : > { %v3044_v37 = vpop.f32.mrb[24].mxu0 }
 0x513   : > { %7310 = vmatmul.mubr.msk.f32.vlgmr.msra.gmra.mrb[24].mxu1 %vm2682_vm3, %v9563_v56  ;;  %v7318_v38 = vpop.f32.mrb[25].mxu0 }
 0x514   : > { %8413 = vmatpush3.bf16.msra.mxu1 %v8412_v23  ;;  %7323 = vmatprep.mubr.msk.f32.mxu1 %vm9035_vm0, %v9033_v1  ;;  %v9651_v23 = vpack.c.bf16 %v3646_v22, %v3645_v21  ;;  %v6825_v38 = vld [vmem:[%s9955_s2 + $0x30] sm:$0xff]  ;;  %v6770_v21 = vld [vmem:[%s9996_s30 + $0x4] sm:$0xf]  ;;  %v6776_v22 = vld [vmem:[%s9996_s30 + $0xc] sm:$0xf] }
 0x515   : > { %8417 = vmatprep.subr.bf16.mxu1 %v9034_v33 }
 0x516   : > { %v3190_v39 = vpop.f32.mrb[26].mxu0 }
 0x517   : > { %7324 = vmatmul.mubr.msk.f32.vlgmr.msra.gmra.mrb[26].mxu1 %vm2682_vm3, %v9563_v56  ;;  %v7332_v40 = vpop.f32.mrb[27].mxu0 }
 0x518   : > { %8419 = vmatpush3.bf16.msra.mxu1 %v8418_v28  ;;  %7337 = vmatprep.mubr.msk.f32.mxu1 %vm9035_vm0, %v9033_v1  ;;  %v9664_v28 = vpack.c.bf16 %v3792_v27, %v3791_v24  ;;  %v6782_v24 = vld [vmem:[%s9996_s30 + $0x14] sm:$0xf]  ;;  %v6788_v27 = vld [vmem:[%s9996_s30 + $0x1c] sm:$0xf] }
 0x519   : > { %8423 = vmatprep.subr.bf16.mxu1 %v9034_v33 }
 0x51a   : > { %v3336_v41 = vpop.f32.mrb[28].mxu0 }
 0x51b   : > { %7338 = vmatmul.mubr.msk.f32.vlgmr.msra.gmra.mrb[28].mxu1 %vm2682_vm3, %v9563_v56  ;;  %v7346_v42 = vpop.f32.mrb[29].mxu0  ;;  %v3341_v56 = vld [vmem:[#allocation5 + $0x10] sm:$0xff] }
 0x51c   : > { %7365 = vmatprep.mubr.msk.f32.mxu1 %vm9035_vm0, %v9033_v1 }
 0x590   : > { %v4089_v9 = vpop.permute.xlu1 %4088 }
 0x5e2   : > { %v2825_v43 = vpop.f32.mrb[22].mxu1 }
 0x5e3   : > { %v8424_v44 = vpack.c.bf16 %v2825_v43, %v2752_v32  ;;  %v7297_v45 = vpop.f32.mrb[23].mxu1  ;;  %v3937_v32 = vld [vmem:[#allocation13 + $0x70] sm:$0xff] }
 0x5e5   : > { %8425 = vmatpush3.bf16.msra.mxu1 %v8424_v44 }
 0x5e6   : > { %v2971_v15 = vpop.f32.mrb[24].mxu1  ;;  %8426 = vmatprep.subr.bf16.mxu1 %v9034_v33 }
 0x5e7   : > { %v8427_v46 = vpack.c.bf16 %v2971_v15, %v2898_v35  ;;  %v7311_v47 = vpop.f32.mrb[25].mxu1  ;;  %v9674_v35 = vpack.c.bf16 %v3938_v34, %v3937_v32 }
 0x5e9   : > { %8428 = vmatpush3.bf16.msra.mxu1 %v8427_v46 }
 0x5ea   : > { %v3117_v48 = vpop.f32.mrb[26].mxu1  ;;  %8429 = vmatprep.subr.bf16.mxu1 %v9034_v33 }
 0x5eb   : > { %v8430_v50 = vpack.c.bf16 %v3117_v48, %v3044_v37  ;;  %v7325_v51 = vpop.f32.mrb[27].mxu1  ;;  %v6794_v37 = vld [vmem:[%s9955_s2 + $0x20] sm:$0xff] }
 0x5ec   : > { %4927 = vperm.xlu1 %8706, %v6794_v37  }
 0x5ed   : > { %8431 = vmatpush3.bf16.msra.mxu1 %v8430_v50 }
 0x5ee   : > { %v3263_v53 = vpop.f32.mrb[28].mxu1  ;;  %8432 = vmatprep.subr.bf16.mxu1 %v9034_v33 }
 0x5ef   : > { %v8433_v54 = vpack.c.bf16 %v3263_v53, %v3190_v39  ;;  %v7339_v55 = vpop.f32.mrb[29].mxu1 }
 0x5f0   : > { %6403 = vperm.xlu1 %8706, %v6825_v38  }
 0x5f1   : > { %8434 = vmatpush3.bf16.msra.mxu1 %v8433_v54 }
 0x5f2   : > { %7363 = vmatprep.subr.mxu1 %v9033_v1 }
 0x5f5   : > { %7364 = vmatpush3.msra.mxu1 %v3336_v41 }
 0x5f6   : > { %7366 = vmatmul.mubr.msk.f32.vlgmr.msra.gmra.mrb[30].mxu1 %vm1710_vm2, %v3341_v56  ;;  %8447 = vmatprep.subr.bf16.mxu1 %v9034_v33 }
 0x5f7   : > { %7400 = vmatprep.mubr.msk.f32.mxu1 %vm9035_vm0, %v9033_v1  ;;  %8449 = vmatpush3.bf16.msra.mxu1 %v9623_v61 }
 0x5f8   : > { %8453 = vmatprep.subr.bf16.mxu1 %v9034_v33 }
 0x6c9   : > { %v3418_v4 = vpop.f32.mrb[30].mxu1 }
 0x6ca   : > { %v3419_v5 = vadd.f32 %v3418_v4, %v3347_v3  ;;  %v7367_v6 = vpop.f32.mrb[31].mxu1  ;;  %v6773_v3 = vld [vmem:[%s9996_s30 + $0x8] sm:$0xf]  ;;  %v6779_v4 = vld [vmem:[%s9996_s30 + $0x10] sm:$0xf] }
 0x6cb   : > { %v6791_v6 = vld [vmem:[%s9996_s30 + $0x20] sm:$0xf] }
 0x6cc   : > { %v3422_v10 = vmax.f32 %v3419_v5, 0.0  ;;  %v6785_v5 = vld [vmem:[%s9996_s30 + $0x18] sm:$0xf] }
 0x6ce   : > { %7373 = vmatmul.mubr.msk.f32.vlgmr.msra.gmra.mrb[30].mxu0 %vm2682_vm3, %v3422_v10  ;;  %7401 = vmatmul.mubr.msk.f32.vlgmr.msra.gmra.mrb[32].mxu1 %vm2682_vm3, %v3422_v10 }
 0x6cf   : > { %8440 = vmatpush3.bf16.msra.mxu0 %v9629_v7  ;;  %8455 = vmatpush3.bf16.msra.mxu1 %v9631_v8 }
 0x6d0   : > { %7379 = vmatprep.mubr.msk.f32.mxu0 %vm9035_vm0, %v9033_v1  ;;  %8441 = vmatprep.subr.bf16.mxu0 %v9034_v33 }
 0x6d1   : > { %7414 = vmatprep.mubr.msk.f32.mxu1 %vm9035_vm0, %v9033_v1  ;;  %8459 = vmatprep.subr.bf16.mxu1 %v9034_v33 }
 0x6d2   : > { %7380 = vmatmul.mubr.msk.f32.vlgmr.msra.gmra.mrb[32].mxu0 %vm2682_vm3, %v3422_v10  ;;  %7415 = vmatmul.mubr.msk.f32.vlgmr.msra.gmra.mrb[34].mxu1 %vm2682_vm3, %v3422_v10 }
 0x6d3   : > { %8443 = vmatpush3.bf16.msra.mxu0 %v9637_v18  ;;  %8461 = vmatpush3.bf16.msra.mxu1 %v9639_v19 }
 0x6d4   : > { %7386 = vmatprep.mubr.msk.f32.mxu0 %vm9035_vm0, %v9033_v1  ;;  %8444 = vmatprep.subr.bf16.mxu0 %v9034_v33 }
 0x6d5   : > { %7428 = vmatprep.mubr.msk.f32.mxu1 %vm9035_vm0, %v9033_v1  ;;  %8475 = vmatprep.subr.bf16.mxu1 %v9525_v13 }
 0x6d6   : > { %7387 = vmatmul.mubr.msk.f32.vlgmr.msra.gmra.mrb[34].mxu0 %vm2682_vm3, %v3422_v10  ;;  %7429 = vmatmul.mubr.msk.f32.vlgmr.msra.gmra.mrb[36].mxu1 %vm2682_vm3, %v3422_v10 }
 0x6d7   : > { %8446 = vmatpush3.bf16.msra.mxu0 %v9651_v23  ;;  %7393 = vmatprep.mubr.msk.f32.mxu0 %vm9035_vm0, %v9033_v1 }
 0x6d8   : > { %8450 = vmatprep.subr.bf16.mxu0 %v9034_v33  ;;  %8477 = vmatpush1.bf16.msra.mxu1 %v9527_v20 }
 0x6d9   : > { %8479 = vmatprep.subr.bf16.mxu1 %v9529_v14  ;;  %4232 = vmatprep.mubr.f32.mxu1 %v9033_v1 }
 0x6da   : > { %7394 = vmatmul.mubr.msk.f32.vlgmr.msra.gmra.mrb[36].mxu0 %vm2682_vm3, %v3422_v10 }
 0x6db   : > { %8452 = vmatpush3.bf16.msra.mxu0 %v9664_v28  ;;  %7407 = vmatprep.mubr.msk.f32.mxu0 %vm9035_vm0, %v9033_v1 }
 0x6dc   : > { %8456 = vmatprep.subr.bf16.mxu0 %v9034_v33  ;;  %8481 = vmatpush1.bf16.msra.mxu1 %v9533_v25 }
 0x6dd   : > { %8483 = vmatprep.subr.bf16.mxu1 %v9536_v26 }
 0x6de   : > { %7408 = vmatmul.mubr.msk.f32.vlgmr.msra.gmra.mrb[38].mxu0 %vm2682_vm3, %v3422_v10 }
 0x6df   : > { %8458 = vmatpush3.bf16.msra.mxu0 %v9674_v35  ;;  %7421 = vmatprep.mubr.msk.f32.mxu0 %vm9035_vm0, %v9033_v1 }
 0x6e0   : > { %8462 = vmatprep.subr.bf16.mxu0 %v9034_v33  ;;  %8485 = vmatpush1.bf16.msra.mxu1 %v9539_v29 }
 0x6e1   : > { %8487 = vmatprep.subr.bf16.mxu1 %v9555_v49 }
 0x6e2   : > { %7422 = vmatmul.mubr.msk.f32.vlgmr.msra.gmra.mrb[40].mxu0 %vm2682_vm3, %v3422_v10 }
 0x6e3   : > { %7449 = vmatprep.mubr.msk.f32.mxu0 %vm9035_vm0, %v9033_v1 }
 0x6e4   : > { %8489 = vmatpush1.bf16.msra.mxu1 %v9557_v52 }
 0x6e5   : > { %7457 = vmatprep.subr.mxu1 %v9033_v1 }
 0x7a1   : > { %v3494_v39 = vpop.f32.mrb[30].mxu0  ;;  %v3786_v40 = vpop.f32.mrb[32].mxu1 }
 0x7a2   : > { %v7374_v41 = vpop.f32.mrb[31].mxu0  ;;  %v7402_v42 = vpop.f32.mrb[33].mxu1 }
 0x7a5   : > { %v3567_v43 = vpop.f32.mrb[32].mxu0  ;;  %v3932_v44 = vpop.f32.mrb[34].mxu1 }
 0x7a6   : > { %v8463_v45 = vpack.c.bf16 %v3567_v43, %v3494_v39  ;;  %v7381_v15 = vpop.f32.mrb[33].mxu0  ;;  %v7416_v46 = vpop.f32.mrb[35].mxu1 }
 0x7a8   : > { %8464 = vmatpush3.bf16.msra.mxu0 %v8463_v45 }
 0x7a9   : > { %v3640_v47 = vpop.f32.mrb[34].mxu0  ;;  %v4078_v48 = vpop.f32.mrb[36].mxu1  ;;  %8465 = vmatprep.subr.bf16.mxu0 %v9034_v33 }
 0x7aa   : > { %v7388_v50 = vpop.f32.mrb[35].mxu0  ;;  %v7430_v51 = vpop.f32.mrb[37].mxu1 }
 0x7ad   : > { %v3713_v53 = vpop.f32.mrb[36].mxu0 }
 0x7ae   : > { %v8466_v54 = vpack.c.bf16 %v3713_v53, %v3640_v47  ;;  %v7395_v55 = vpop.f32.mrb[37].mxu0 }
 0x7b0   : > { %8467 = vmatpush3.bf16.msra.mxu0 %v8466_v54 }
 0x7b1   : > { %v3859_v56 = vpop.f32.mrb[38].mxu0  ;;  %8468 = vmatprep.subr.bf16.mxu0 %v9034_v33 }
 0x7b2   : > { %v8469_v57 = vpack.c.bf16 %v3859_v56, %v3786_v40  ;;  %v7409_v58 = vpop.f32.mrb[39].mxu0 }
 0x7b3   : > { %v5004_v58 = vld [vmem:[#allocation14] sm:$0xf] }
 0x7b4   : > { %8470 = vmatpush3.bf16.msra.mxu0 %v8469_v57  ;;  %v4922_v57 = vld [vmem:[#allocation5 + $0x20] sm:$0xff] }
 0x7b5   : > { %v4005_v16 = vpop.f32.mrb[40].mxu0  ;;  %8471 = vmatprep.subr.bf16.mxu0 %v9034_v33 }
 0x7b6   : > { %v8472_v60 = vpack.c.bf16 %v4005_v16, %v3932_v44  ;;  %v7423_v62 = vpop.f32.mrb[41].mxu0  ;;  %v5307_v16 = vld [vmem:[#allocation14 + $0x10] sm:$0xf] }
 0x7b8   : > { %8473 = vmatpush3.bf16.msra.mxu0 %v8472_v60  ;;  %v4928_v60 = vpop.permute.xlu1 %4927 }
 0x7b9   : > { %7447 = vmatprep.subr.mxu0 %v9033_v1 }
 0x7bc   : > { %7448 = vmatpush3.msra.mxu0 %v4078_v48 }
 0x7bd   : > { %7450 = vmatmul.mubr.msk.f32.vlgmr.msra.gmra.mrb[42].mxu0 %vm1710_vm2, %v4083_v63  ;;  %7452 = vmatprep.subr.mxu0 %v9033_v1 }
 0x7be   : > { %7454 = vmatprep.mubr.msk.f32.mxu0 %vm9035_vm0, %v9033_v1  ;;  %7453 = vmatpush3.msk.msra.mxu0 %vm4247_vm4, %v4242_v0 }
 0x7bf   : > { %7462 = vmatprep.subr.mxu0 %v9033_v1 }
 0x7c1   : > { %7455 = vmatmul.mubr.msk.f32.vlgmr.msra.gmra.mrb[44].mxu0 %vm4243_vm5, %v4241_v2 }
 0x7c2   : > { %7464 = vmatprep.mubr.msk.f32.mxu0 %vm9035_vm0, %v9033_v1  ;;  %7463 = vmatpush3.msk.msra.mxu0 %vm4247_vm4, %v6773_v3  ;;  %v5082_v3 = vld [vmem:[#allocation14 + $0x4] sm:$0xf] }
 0x7c3   : > { %7472 = vmatprep.subr.mxu0 %v9033_v1 }
 0x7c5   : > { %7465 = vmatmul.mubr.msk.f32.vlgmr.msra.gmra.mrb[46].mxu0 %vm4243_vm5, %v4241_v2 }
 0x7c6   : > { %7474 = vmatprep.mubr.msk.f32.mxu0 %vm9035_vm0, %v9033_v1  ;;  %7473 = vmatpush3.msk.msra.mxu0 %vm4247_vm4, %v6779_v4  ;;  %v5457_v4 = vld [vmem:[#allocation14 + $0x18] sm:$0xf] }
 0x7c7   : > { %7482 = vmatprep.subr.mxu0 %v9033_v1 }
 0x7c9   : > { %7475 = vmatmul.mubr.msk.f32.vlgmr.msra.gmra.mrb[48].mxu0 %vm4243_vm5, %v4241_v2 }
 0x7ca   : > { %7484 = vmatprep.mubr.msk.f32.mxu0 %vm9035_vm0, %v9033_v1  ;;  %7483 = vmatpush3.msk.msra.mxu0 %vm4247_vm4, %v6785_v5  ;;  %v5157_v5 = vld [vmem:[#allocation14 + $0x8] sm:$0xf] }
 0x7cb   : > { %7492 = vmatprep.subr.mxu0 %v9033_v1 }
 0x7cd   : > { %7485 = vmatmul.mubr.msk.f32.vlgmr.msra.gmra.mrb[50].mxu0 %vm4243_vm5, %v4241_v2 }
 0x7ce   : > { %7494 = vmatprep.mubr.msk.f32.mxu0 %vm9035_vm0, %v9033_v1  ;;  %7493 = vmatpush3.msk.msra.mxu0 %vm4247_vm4, %v6791_v6  ;;  %v5607_v6 = vld [vmem:[#allocation14 + $0x20] sm:$0xf] }
 0x7cf   : > { %7518 = vmatprep.subr.mxu0 %v9033_v1 }
 0x7d1   : > { %7495 = vmatmul.mubr.msk.f32.vlgmr.msra.gmra.mrb[52].mxu0 %vm4243_vm5, %v4241_v2 }
 0x7d2   : > { %7520 = vmatprep.mubr.msk.f32.mxu0 %vm9035_vm0, %v9033_v1  ;;  %7519 = vmatpush3.msk.msra.mxu0 %vm4247_vm4, %v5004_v58 }
 0x7d3   : > { %7523 = vmatprep.subr.mxu0 %v9033_v1 }
 0x890   : > { %v4160_v10 = vpop.f32.mrb[42].mxu0 }
 0x891   : > { %v4161_v11 = vadd.f32 %v4160_v10, %v4089_v9  ;;  %v7451_v12 = vpop.f32.mrb[43].mxu0  ;;  %v5232_v9 = vld [vmem:[#allocation14 + $0xc] sm:$0xf]  ;;  %v5382_v10 = vld [vmem:[#allocation14 + $0x14] sm:$0xf] }
 0x893   : > { %v4164_v17 = vmax.f32 %v4161_v11, 0.0  ;;  %v5532_v11 = vld [vmem:[#allocation14 + $0x1c] sm:$0xf] }
 0x894   : > { %v4317_v32 = vpop.f32.mrb[44].mxu0 }
 0x895   : > { %6767 = vmatmul.mubr.msk.f32.vlgmr.msra.gmra.mrb[20].mxu1 %vm1798_vm1, %v4164_v17  ;;  %v7456_v34 = vpop.f32.mrb[45].mxu0 }
 0x896   : > { %7458 = vmatpush3.msk.msra.mxu1 %vm4247_vm4, %v6770_v21  ;;  %7459 = vmatprep.mubr.msk.f32.mxu1 %vm9035_vm0, %v9033_v1 }
 0x897   : > { %7467 = vmatprep.subr.mxu1 %v9033_v1 }
 0x898   : > { %v4467_v36 = vpop.f32.mrb[46].mxu0 }
 0x899   : > { %7460 = vmatmul.mubr.msk.f32.vlgmr.msra.gmra.mrb[38].mxu1 %vm4243_vm5, %v4241_v2  ;;  %v7466_v37 = vpop.f32.mrb[47].mxu0 }
 0x89a   : > { %7468 = vmatpush3.msk.msra.mxu1 %vm4247_vm4, %v6776_v22  ;;  %7469 = vmatprep.mubr.msk.f32.mxu1 %vm9035_vm0, %v9033_v1 }
 0x89b   : > { %7477 = vmatprep.subr.mxu1 %v9033_v1 }
 0x89c   : > { %v4617_v38 = vpop.f32.mrb[48].mxu0 }
 0x89d   : > { %7470 = vmatmul.mubr.msk.f32.vlgmr.msra.gmra.mrb[40].mxu1 %vm4243_vm5, %v4241_v2  ;;  %v7476_v39 = vpop.f32.mrb[49].mxu0 }
 0x89e   : > { %7478 = vmatpush3.msk.msra.mxu1 %vm4247_vm4, %v6782_v24  ;;  %7479 = vmatprep.mubr.msk.f32.mxu1 %vm9035_vm0, %v9033_v1 }
 0x89f   : > { %7487 = vmatprep.subr.mxu1 %v9033_v1 }
 0x8a0   : > { %v4767_v40 = vpop.f32.mrb[50].mxu0 }
 0x8a1   : > { %7480 = vmatmul.mubr.msk.f32.vlgmr.msra.gmra.mrb[42].mxu1 %vm4243_vm5, %v4241_v2  ;;  %v7486_v41 = vpop.f32.mrb[51].mxu0 }
 0x8a2   : > { %7488 = vmatpush3.msk.msra.mxu1 %vm4247_vm4, %v6788_v27  ;;  %7489 = vmatprep.mubr.msk.f32.mxu1 %vm9035_vm0, %v9033_v1 }
 0x8a3   : > { %8490 = vmatprep.subr.bf16.mxu1 %v9034_v33 }
 0x8a4   : > { %v4917_v42 = vpop.f32.mrb[52].mxu0 }
 0x8a5   : > { %7490 = vmatmul.mubr.msk.f32.vlgmr.msra.gmra.mrb[44].mxu1 %vm4243_vm5, %v4241_v2  ;;  %v7496_v43 = vpop.f32.mrb[53].mxu0 }
 0x8a6   : > { %7515 = vmatprep.mubr.msk.f32.mxu1 %vm9035_vm0, %v9033_v1 }
 0x96c   : > { %v4392_v44 = vpop.f32.mrb[38].mxu1 }
 0x96d   : > { %v8491_v45 = vpack.c.bf16 %v4392_v44, %v4317_v32  ;;  %v7461_v15 = vpop.f32.mrb[39].mxu1 }
 0x96f   : > { %8492 = vmatpush3.bf16.msra.mxu1 %v8491_v45 }
 0x970   : > { %v4542_v46 = vpop.f32.mrb[40].mxu1  ;;  %8493 = vmatprep.subr.bf16.mxu1 %v9034_v33 }
 0x971   : > { %v8494_v47 = vpack.c.bf16 %v4542_v46, %v4467_v36  ;;  %v7471_v48 = vpop.f32.mrb[41].mxu1 }
 0x972   : > { %v5682_v48 = vld [vmem:[#allocation5 + $0x28] sm:$0xff] }
 0x973   : > { %8495 = vmatpush3.bf16.msra.mxu1 %v8494_v47 }
 0x974   : > { %v4692_v50 = vpop.f32.mrb[42].mxu1  ;;  %8496 = vmatprep.subr.bf16.mxu1 %v9034_v33 }
 0x975   : > { %v8497_v51 = vpack.c.bf16 %v4692_v50, %v4617_v38  ;;  %v7481_v53 = vpop.f32.mrb[43].mxu1  ;;  %v5688_v50 = vpop.permute.xlu0 %5687 }
 0x977   : > { %8498 = vmatpush3.bf16.msra.mxu1 %v8497_v51 }
 0x978   : > { %v4842_v54 = vpop.f32.mrb[44].mxu1  ;;  %8499 = vmatprep.subr.bf16.mxu1 %v9034_v33 }
 0x979   : > { %v8500_v55 = vpack.c.bf16 %v4842_v54, %v4767_v40  ;;  %v7491_v56 = vpop.f32.mrb[45].mxu1 }
 0x97b   : > { %8501 = vmatpush3.bf16.msra.mxu1 %v8500_v55 }
 0x97c   : > { %7513 = vmatprep.subr.mxu1 %v9033_v1 }
 0x97f   : > { %7514 = vmatpush3.msra.mxu1 %v4917_v42 }
 0x980   : > { %7516 = vmatmul.mubr.msk.f32.vlgmr.msra.gmra.mrb[46].mxu1 %vm1710_vm2, %v4922_v57  ;;  %7538 = vmatprep.subr.mxu1 %v9033_v1 }
 0x981   : > { %7540 = vmatprep.mubr.msk.f32.mxu1 %vm9035_vm0, %v9033_v1  ;;  %7539 = vmatpush3.msk.msra.mxu1 %vm4247_vm4, %v5307_v16 }
 0x982   : > { %7548 = vmatprep.subr.mxu1 %v9033_v1 }
 0xa53   : > { %v4999_v62 = vpop.f32.mrb[46].mxu1 }
 0xa54   : > { %v5000_v63 = vadd.f32 %v4999_v62, %v4928_v60  ;;  %v7517_v0 = vpop.f32.mrb[47].mxu1 }
 0xa56   : > { %v5003_v2 = vmax.f32 %v5000_v63, 0.0 }
 0xa58   : > { %7521 = vmatmul.mubr.msk.f32.vlgmr.msra.gmra.mrb[54].mxu0 %vm4243_vm5, %v5003_v2  ;;  %7541 = vmatmul.mubr.msk.f32.vlgmr.msra.gmra.mrb[48].mxu1 %vm4243_vm5, %v5003_v2 }
 0xa59   : > { %7524 = vmatpush3.msk.msra.mxu0 %vm4247_vm4, %v5082_v3  ;;  %7525 = vmatprep.mubr.msk.f32.mxu0 %vm9035_vm0, %v9033_v1 }
 0xa5a   : > { %7528 = vmatprep.subr.mxu0 %v9033_v1  ;;  %7549 = vmatpush3.msk.msra.mxu1 %vm4247_vm4, %v5457_v4 }
 0xa5b   : > { %7550 = vmatprep.mubr.msk.f32.mxu1 %vm9035_vm0, %v9033_v1  ;;  %7558 = vmatprep.subr.mxu1 %v9033_v1 }
 0xa5c   : > { %7526 = vmatmul.mubr.msk.f32.vlgmr.msra.gmra.mrb[56].mxu0 %vm4243_vm5, %v5003_v2  ;;  %7551 = vmatmul.mubr.msk.f32.vlgmr.msra.gmra.mrb[50].mxu1 %vm4243_vm5, %v5003_v2 }
 0xa5d   : > { %7529 = vmatpush3.msk.msra.mxu0 %vm4247_vm4, %v5157_v5  ;;  %7530 = vmatprep.mubr.msk.f32.mxu0 %vm9035_vm0, %v9033_v1 }
 0xa5e   : > { %7533 = vmatprep.subr.mxu0 %v9033_v1  ;;  %7559 = vmatpush3.msk.msra.mxu1 %vm4247_vm4, %v5607_v6 }
 0xa5f   : > { %7560 = vmatprep.mubr.msk.f32.mxu1 %vm9035_vm0, %v9033_v1  ;;  %8514 = vmatprep.subr.bf16.mxu1 %v9034_v33 }
 0xa60   : > { %7531 = vmatmul.mubr.msk.f32.vlgmr.msra.gmra.mrb[58].mxu0 %vm4243_vm5, %v5003_v2  ;;  %7561 = vmatmul.mubr.msk.f32.vlgmr.msra.gmra.mrb[52].mxu1 %vm4243_vm5, %v5003_v2 }
 0xa61   : > { %7534 = vmatpush3.msk.msra.mxu0 %vm4247_vm4, %v5232_v9  ;;  %7535 = vmatprep.mubr.msk.f32.mxu0 %vm9035_vm0, %v9033_v1 }
 0xa62   : > { %7543 = vmatprep.subr.mxu0 %v9033_v1  ;;  %8516 = vmatpush3.bf16.msra.mxu1 %v9621_v59 }
 0xa63   : > { %7588 = vmatprep.mubr.msk.f32.mxu1 %vm9035_vm0, %v9033_v1  ;;  %8517 = vmatprep.subr.bf16.mxu1 %v9034_v33 }
 0xa64   : > { %7536 = vmatmul.mubr.msk.f32.vlgmr.msra.gmra.mrb[60].mxu0 %vm4243_vm5, %v5003_v2 }
 0xa65   : > { %7544 = vmatpush3.msk.msra.mxu0 %vm4247_vm4, %v5382_v10  ;;  %7545 = vmatprep.mubr.msk.f32.mxu0 %vm9035_vm0, %v9033_v1  ;;  %v6398_v10 = vld [vmem:[#allocation5 + $0x30] sm:$0xff] }
 0xa66   : > { %7553 = vmatprep.subr.mxu0 %v9033_v1 }
 0xa68   : > { %7546 = vmatmul.mubr.msk.f32.vlgmr.msra.gmra.mrb[62].mxu0 %vm4243_vm5, %v5003_v2 }
 0xa69   : > { %7554 = vmatpush3.msk.msra.mxu0 %vm4247_vm4, %v5532_v11  ;;  %7555 = vmatprep.mubr.msk.f32.mxu0 %vm9035_vm0, %v9033_v1 }
 0xa6a   : > { %8502 = vmatprep.subr.bf16.mxu0 %v9034_v33 }
 0xa6c   : > { %7556 = vmatmul.mubr.msk.f32.vlgmr.msra.gmra.mrb[64].mxu0 %vm4243_vm5, %v5003_v2 }
 0xa6d   : > { %7581 = vmatprep.mubr.msk.f32.mxu0 %vm9035_vm0, %v9033_v1 }
 0xb2b   : > { %v5077_v59 = vpop.f32.mrb[54].mxu0  ;;  %v5377_v12 = vpop.f32.mrb[48].mxu1 }
 0xb2c   : > { %v7522_v17 = vpop.f32.mrb[55].mxu0  ;;  %v7542_v21 = vpop.f32.mrb[49].mxu1 }
 0xb2f   : > { %v5152_v22 = vpop.f32.mrb[56].mxu0  ;;  %v5527_v24 = vpop.f32.mrb[50].mxu1 }
 0xb30   : > { %v8503_v27 = vpack.c.bf16 %v5152_v22, %v5077_v59  ;;  %v7527_v32 = vpop.f32.mrb[57].mxu0  ;;  %v7552_v34 = vpop.f32.mrb[51].mxu1 }
 0xb32   : > { %8504 = vmatpush3.bf16.msra.mxu0 %v8503_v27 }
 0xb33   : > { %v5227_v36 = vpop.f32.mrb[58].mxu0  ;;  %v5677_v37 = vpop.f32.mrb[52].mxu1  ;;  %8505 = vmatprep.subr.bf16.mxu0 %v9034_v33 }
 0xb34   : > { %v7532_v38 = vpop.f32.mrb[59].mxu0  ;;  %v7562_v39 = vpop.f32.mrb[53].mxu1 }
 0xb37   : > { %v5302_v40 = vpop.f32.mrb[60].mxu0 }
 0xb38   : > { %v8506_v41 = vpack.c.bf16 %v5302_v40, %v5227_v36  ;;  %v7537_v42 = vpop.f32.mrb[61].mxu0 }
 0xb3a   : > { %8507 = vmatpush3.bf16.msra.mxu0 %v8506_v41 }
 0xb3b   : > { %v5452_v43 = vpop.f32.mrb[62].mxu0  ;;  %8508 = vmatprep.subr.bf16.mxu0 %v9034_v33 }
 0xb3c   : > { %v8509_v44 = vpack.c.bf16 %v5452_v43, %v5377_v12  ;;  %v7547_v45 = vpop.f32.mrb[63].mxu0 }
 0xb3e   : > { %8510 = vmatpush3.bf16.msra.mxu0 %v8509_v44 }
 0xb3f   : > { %v5602_v15 = vpop.f32.mrb[64].mxu0  ;;  %8511 = vmatprep.subr.bf16.mxu0 %v9034_v33 }
 0xb40   : > { %v8512_v46 = vpack.c.bf16 %v5602_v15, %v5527_v24  ;;  %v7557_v47 = vpop.f32.mrb[65].mxu0 }
 0xb42   : > { %8513 = vmatpush3.bf16.msra.mxu0 %v8512_v46 }
 0xb43   : > { %7579 = vmatprep.subr.mxu0 %v9033_v1 }
 0xb46   : > { %7580 = vmatpush3.msra.mxu0 %v5677_v37 }
 0xb47   : > { %7582 = vmatmul.mubr.msk.f32.vlgmr.msra.gmra.mrb[66].mxu0 %vm1710_vm2, %v5682_v48  ;;  %8526 = vmatprep.subr.bf16.mxu0 %v9034_v33 }
 0xb48   : > { %8528 = vmatpush3.bf16.msra.mxu0 %v9623_v61  ;;  %7616 = vmatprep.mubr.msk.f32.mxu0 %vm9035_vm0, %v9033_v1 }
 0xb49   : > { %8532 = vmatprep.subr.bf16.mxu0 %v9034_v33 }
 0xc1a   : > { %v5759_v51 = vpop.f32.mrb[66].mxu0 }
 0xc1b   : > { %v5760_v53 = vadd.f32 %v5759_v51, %v5688_v50  ;;  %v7583_v54 = vpop.f32.mrb[67].mxu0 }
 0xc1d   : > { %v5763_v55 = vmax.f32 %v5760_v53, 0.0 }
 0xc1f   : > { %7589 = vmatmul.mubr.msk.f32.vlgmr.msra.gmra.mrb[54].mxu1 %vm2682_vm3, %v5763_v55  ;;  %7617 = vmatmul.mubr.msk.f32.vlgmr.msra.gmra.mrb[68].mxu0 %vm2682_vm3, %v5763_v55 }
 0xc20   : > { %8519 = vmatpush3.bf16.msra.mxu1 %v9629_v7  ;;  %8534 = vmatpush3.bf16.msra.mxu0 %v9631_v8 }
 0xc21   : > { %7595 = vmatprep.mubr.msk.f32.mxu1 %vm9035_vm0, %v9033_v1  ;;  %8520 = vmatprep.subr.bf16.mxu1 %v9034_v33 }
 0xc22   : > { %7630 = vmatprep.mubr.msk.f32.mxu0 %vm9035_vm0, %v9033_v1  ;;  %8538 = vmatprep.subr.bf16.mxu0 %v9034_v33 }
 0xc23   : > { %7596 = vmatmul.mubr.msk.f32.vlgmr.msra.gmra.mrb[56].mxu1 %vm2682_vm3, %v5763_v55  ;;  %7631 = vmatmul.mubr.msk.f32.vlgmr.msra.gmra.mrb[70].mxu0 %vm2682_vm3, %v5763_v55 }
 0xc24   : > { %8522 = vmatpush3.bf16.msra.mxu1 %v9637_v18  ;;  %8540 = vmatpush3.bf16.msra.mxu0 %v9639_v19 }
 0xc25   : > { %7602 = vmatprep.mubr.msk.f32.mxu1 %vm9035_vm0, %v9033_v1  ;;  %8523 = vmatprep.subr.bf16.mxu1 %v9034_v33 }
 0xc26   : > { %7644 = vmatprep.mubr.msk.f32.mxu0 %vm9035_vm0, %v9033_v1 }
 0xc27   : > { %7603 = vmatmul.mubr.msk.f32.vlgmr.msra.gmra.mrb[58].mxu1 %vm2682_vm3, %v5763_v55  ;;  %7645 = vmatmul.mubr.msk.f32.vlgmr.msra.gmra.mrb[72].mxu0 %vm2682_vm3, %v5763_v55 }
 0xc28   : > { %8525 = vmatpush3.bf16.msra.mxu1 %v9651_v23  ;;  %7609 = vmatprep.mubr.msk.f32.mxu1 %vm9035_vm0, %v9033_v1 }
 0xc29   : > { %8529 = vmatprep.subr.bf16.mxu1 %v9034_v33 }
 0xc2b   : > { %7610 = vmatmul.mubr.msk.f32.vlgmr.msra.gmra.mrb[60].mxu1 %vm2682_vm3, %v5763_v55 }
 0xc2c   : > { %8531 = vmatpush3.bf16.msra.mxu1 %v9664_v28  ;;  %7623 = vmatprep.mubr.msk.f32.mxu1 %vm9035_vm0, %v9033_v1 }
 0xc2d   : > { %8535 = vmatprep.subr.bf16.mxu1 %v9034_v33 }
 0xc2f   : > { %7624 = vmatmul.mubr.msk.f32.vlgmr.msra.gmra.mrb[62].mxu1 %vm2682_vm3, %v5763_v55 }
 0xc30   : > { %8537 = vmatpush3.bf16.msra.mxu1 %v9674_v35  ;;  %7637 = vmatprep.mubr.msk.f32.mxu1 %vm9035_vm0, %v9033_v1 }
 0xc31   : > { %8541 = vmatprep.subr.bf16.mxu1 %v9034_v33 }
 0xc33   : > { %7638 = vmatmul.mubr.msk.f32.vlgmr.msra.gmra.mrb[64].mxu1 %vm2682_vm3, %v5763_v55 }
 0xc34   : > { %7665 = vmatprep.mubr.msk.f32.mxu1 %vm9035_vm0, %v9033_v1 }
 0xcf2   : > { %v5833_v61 = vpop.f32.mrb[54].mxu1  ;;  %v6113_v7 = vpop.f32.mrb[68].mxu0 }
 0xcf3   : > { %v7590_v8 = vpop.f32.mrb[55].mxu1  ;;  %v7618_v18 = vpop.f32.mrb[69].mxu0 }
 0xcf6   : > { %v5903_v19 = vpop.f32.mrb[56].mxu1  ;;  %v6253_v23 = vpop.f32.mrb[70].mxu0 }
 0xcf7   : > { %v8542_v28 = vpack.c.bf16 %v5903_v19, %v5833_v61  ;;  %v7597_v56 = vpop.f32.mrb[57].mxu1  ;;  %v7632_v57 = vpop.f32.mrb[71].mxu0 }
 0xcf9   : > { %8543 = vmatpush3.bf16.msra.mxu1 %v8542_v28 }
 0xcfa   : > { %v5973_v35 = vpop.f32.mrb[58].mxu1  ;;  %v6393_v58 = vpop.f32.mrb[72].mxu0  ;;  %8544 = vmatprep.subr.bf16.mxu1 %v9034_v33 }
 0xcfb   : > { %v7604_v16 = vpop.f32.mrb[59].mxu1  ;;  %v7646_v60 = vpop.f32.mrb[73].mxu0 }
 0xcfe   : > { %v6043_v62 = vpop.f32.mrb[60].mxu1 }
 0xcff   : > { %v8545_v63 = vpack.c.bf16 %v6043_v62, %v5973_v35  ;;  %v7611_v0 = vpop.f32.mrb[61].mxu1 }
 0xd01   : > { %8546 = vmatpush3.bf16.msra.mxu1 %v8545_v63 }
 0xd02   : > { %v6183_v2 = vpop.f32.mrb[62].mxu1  ;;  %8547 = vmatprep.subr.bf16.mxu1 %v9034_v33 }
 0xd03   : > { %v8548_v3 = vpack.c.bf16 %v6183_v2, %v6113_v7  ;;  %v7625_v4 = vpop.f32.mrb[63].mxu1 }
 0xd05   : > { %8549 = vmatpush3.bf16.msra.mxu1 %v8548_v3 }
 0xd06   : > { %v6323_v5 = vpop.f32.mrb[64].mxu1  ;;  %8550 = vmatprep.subr.bf16.mxu1 %v9034_v33  ;;  %v6404_v33 = vpop.permute.xlu1 %6403 }
 0xd07   : > { %v8551_v6 = vpack.c.bf16 %v6323_v5, %v6253_v23  ;;  %v7639_v9 = vpop.f32.mrb[65].mxu1 }
 0xd09   : > { %8552 = vmatpush3.bf16.msra.mxu1 %v8551_v6 }
 0xd0a   : > { %7663 = vmatprep.subr.mxu1 %v9033_v1 }
 0xd0d   : > { %7664 = vmatpush3.msra.mxu1 %v6393_v58 }
 0xd0e   : > { %7666 = vmatmul.mubr.msk.f32.vlgmr.msra.gmra.mrb[66].mxu1 %vm1710_vm2, %v6398_v10  ;;  %8554 = vmatprep.subr.bf16.mxu1 %v9525_v13 }
 0xd0f   : > { %8556 = vmatpush1.bf16.msra.mxu1 %v9527_v20  ;;  %6547 = vmatprep.mubr.f32.mxu1 %v9033_v1  ;;  %v1708_v1 = vpop.permute.xlu0 %1707 }
 0xd10   : > { %8558 = vmatprep.subr.bf16.mxu1 %v9529_v14  ;;  %v1781_v14 = vadd.f32 %v9543_v30, %v1708_v1 }
 0xd13   : > { %8560 = vmatpush1.bf16.msra.mxu1 %v9533_v25  ;;  %v1783_v25 = vadd.f32 %v9545_v31, %v1708_v1 }
 0xd14   : > { %8562 = vmatprep.subr.bf16.mxu1 %v9536_v26  ;;  %v1785_v26 = vmax.f32 %v1781_v14, 0.0 }
 0xd17   : > { %8564 = vmatpush1.bf16.msra.mxu1 %v9539_v29  ;;  %v1786_v29 = vmax.f32 %v1783_v25, 0.0 }
 0xd18   : > { %8566 = vmatprep.subr.bf16.mxu1 %v9555_v49 }
 0xd1b   : > { %8568 = vmatpush1.bf16.msra.mxu1 %v9557_v52 }
 0xde1   : > { %v6475_v13 = vpop.f32.mrb[66].mxu1 }
 0xde2   : > { %v6476_v11 = vadd.f32 %v6475_v13, %v6404_v33  ;;  %v7667_v20 = vpop.f32.mrb[67].mxu1 }
 0xde4   : > { %v6479_v59 = vmax.f32 %v6476_v11, 0.0 }
 0xde6   : > { %6827 = vmatmul.mubr.msk.f32.vlgmr.msra.gmra.mrb[20].mxu1 %vm1798_vm1, %v6479_v59 }
 0xeb9   : > { %v6549_v49 = vpop.f32.mrb[20].mxu1 }
 0xeba   : > { %v8569_v52 = vadd.f32 %v6549_v49, %v1785_v26  ;;  %v6551_v12 = vpop.f32.mrb[21].mxu1 }
 0xebb   : > { %v8570_v17 = vadd.f32 %v6551_v12, %v1786_v29 }
 0xebc   : > { %v6556_v21 = vmul.f32 0.25, %v8569_v52 }
 0xebd   : > { %v6557_v22 = vmul.f32 0.25, %v8570_v17 }
 0xebe   : > { %6558 = vst [vmem:[%s477_s27] sm:$0xff] %v6556_v21 }
 0xebf   : > { %6559 = vst [vmem:[%s477_s27 + $0x8] sm:$0xff] %v6557_v22 }
 0xec0   : > { %8948 = shalt.err (!%p8945_p10)
}
 0xec1   : > { %s8949_s3 = scalar_lea.hbm %s9909_s20, 256  ;;  %s8953_s25 = scalar_lea.hbm %s9997_s8, 512 }
 0xec2   : > { %p8950_p11 = scmp.ne.s32.totalorder %s9909_s20, %s8949_s3  ;;  %p8954_p9 = scmp.lt.u32.totalorder %s9909_s20, %s9997_s8 }
 0xec3   : > { %p8955_p7 = scmp.lt.u32.totalorder %s8953_s25, %s8949_s3  ;;  %p8957_p12 = scmp.lt.u32.totalorder %s8949_s3, %s9909_s20 }
 0xec4   : > { %p8951_p8 = pnand %p8950_p11, %p9998_p1 }
 0xec5   : > { %p8956_p4 = por %p8955_p7, %p8954_p9 }
 0xec6   : > { %p8952_p5 = pneg %p8951_p8 }
 0xec7   : > { %p8958_p13 = por %p8957_p12, %p8956_p4 }
 0xec9   : > { %p8959_p0 = pnand %p8958_p13, %p8952_p5 }
 0xecb   : > { %8962 = shalt.err (!%p8959_p0)
}
 0xecc   : > { %8608 = dma.vmem_to_hbm [thread:$0]  (%p9998_p1), %s9911_s28, 256, %s9909_s20, %s6561_s23  }
 0xecd PF: > { %s6587_s21 = sand.u32 1, %s9005_s13   ;;  %p9999_p2 = scmp.ne.s32.totalorder %s9985_s10, 0 }
 0xece   : > { %p10000_p3 = scmp.ge.s32.totalorder %s9017_s16, 2  ;;  %s6588_s18 = scalar_lea.sflag [#allocation4], %s6587_s21 }
 0xed0   : > { %p8637_p6 = pnand %p10000_p3, %p9999_p2 }
 0xed2   : > { %9000 = dma.done.wait (!%p8637_p6), %s6588_s18, 256  }
 0xed3   : > { %9002 = vsyncadd (!%p8637_p6), %s6588_s18, 4294967040  ;;  %p27_p10 = scmp.ge.s32.totalorder %s9306_s26, 4   ;;  %s10001_s13 = smov %s9009_s14 }
 0xed4   : > { %s10002_s14 = smov %s9013_s15  ;;  %s10003_s15 = smov %s9318_s22 }
 0xed5   : > { %s10004_s16 = smov %s9306_s26  ;;  %29 = sbr.rel (!%p27_p10) target bundleno = 14 (0xe), region = 193 }
 0xedc   :  { %6593 = vsyncpa [#allocation3], 1 }
 0xedd   :  { %6595 = vsyncpa [#allocation3 + $0x1], 1 }
 0xede   :  { %6596 = vsyncpa [#allocation6], 1 }
 0xedf   :  { %6597 = vsyncpa [#allocation9], 1 }
 0xee0   :  { %6598 = vsyncpa [#allocation12], 1 }
 0xee1   :  { %6599 = vsyncpa [#allocation15], 1 }
 0xee2   :  { %6600 = vsyncpa [#allocation4], 1 }
 0xee3   :  { %6602 = vsyncpa [#allocation4 + $0x1], 1 }

</bundles_post_ra>
